<compile_context>
chip_gen: v6e
topology: v6e:2x2x1
jax: 0.10.0
libtpu: 0.0.40
codegen_flags: <defaults>
</compile_context>

<pallas_src>
import numpy as np
import jax
import jax.numpy as jnp
from jax import lax
from jax.experimental import pallas as pl
from jax.experimental.pallas import tpu as pltpu

# ---------------------------------------------------------------- constants --
H0, W0, C0 = 32, 32, 3          # input
K = 5                           # conv kernel size
C1, OH1 = 6, 28                 # conv1: 6 channels, 28x28 valid output
PH1, PW1 = 14, 14               # pool1 output
C2, OH2 = 16, 10                # conv2: 16 channels, 10x10 valid output
PH2, PW2 = 5, 5                 # pool2 output
F1, F2, F3 = 120, 84, 10        # fc dims

S0P = 1152                      # padded flat input length  (>= 1027+1, mult of 128)
L1 = OH1 * W0                   # 896  conv1 output strip length (28 rows x 32 cols)
S1P = 256                       # padded flat pool1 length  (>= 199+1)
L2 = OH2 * PW1                  # 140  conv2 output strip length (10 rows x 14 cols)
NP2 = PH2 * PW2                 # 25   pool2 flat spatial size
M1 = L1 - 1 - W0                # 863  pool1 candidate length
M2 = L2 - 1 - PW1               # 125  pool2 candidate length


# ------------------------------------------------------------------- kernel --

def _lenet_kernel(x_ref, w1_ref, b1_ref, p1_ref, w2_ref, b2_ref, p2_ref,
                  w3_ref, b3_ref, w4_ref, b4_ref, w5_ref, b5_ref, o_ref):
    x = x_ref[0]                                            # (3, 1152) flat image

    # ---- conv1 + bias + relu (strip shift-and-accumulate, lane-dense) ------
    acc1 = jnp.zeros((C1, L1), jnp.float32)
    for kh in range(K):
        for kw in range(K):
            t = kh * K + kw
            sl = x[:, kh * W0 + kw: kh * W0 + kw + L1]      # (3, 896)
            acc1 = acc1 + jnp.dot(w1_ref[t], sl,
                                  preferred_element_type=jnp.float32)
    a1 = jnp.maximum(acc1 + b1_ref[...], 0.0)               # (6, 896)

    # ---- pool1 (2x2 max) fused: shifted maxima + 0/1 selection matmul ------
    m = jnp.maximum(a1[:, :L1 - 1], a1[:, 1:])              # (6, 895) max over ow pair
    m = jnp.maximum(m[:, :M1], m[:, W0:])                   # (6, 863) max over oh pair
    pool1 = jnp.dot(m, p1_ref[...],
                    preferred_element_type=jnp.float32)     # (6, 256), cols>=196 are 0

    # ---- conv2 + bias + relu ------------------------------------------------
    acc2 = jnp.zeros((C2, L2), jnp.float32)
    for kh in range(K):
        for kw in range(K):
            t = kh * K + kw
            sl = pool1[:, kh * PW1 + kw: kh * PW1 + kw + L2]  # (6, 140)
            acc2 = acc2 + jnp.dot(w2_ref[t], sl,
                                  preferred_element_type=jnp.float32)
    a2 = jnp.maximum(acc2 + b2_ref[...], 0.0)               # (16, 140)

    # ---- pool2 (2x2 max) ----------------------------------------------------
    m = jnp.maximum(a2[:, :L2 - 1], a2[:, 1:])              # (16, 139)
    m = jnp.maximum(m[:, :M2], m[:, PW1:])                  # (16, 125)
    pool2 = jnp.dot(m, p2_ref[...],
                    preferred_element_type=jnp.float32)     # (16, 25)

    # ---- fc1 + relu (torch NCHW flatten folded into w3 layout (16,25,120)) --
    y = b3_ref[...]                                         # (1, 120)
    for c in range(C2):
        y = y + jnp.dot(pool2[c:c + 1, :], w3_ref[c],
                        preferred_element_type=jnp.float32)
    y = jnp.maximum(y, 0.0)

    # ---- fc2 + relu, fc3 ----------------------------------------------------
    y = jnp.maximum(jnp.dot(y, w4_ref[...],
                            preferred_element_type=jnp.float32) + b4_ref[...], 0.0)
    y = jnp.dot(y, w5_ref[...],
                preferred_element_type=jnp.float32) + b5_ref[...]
    o_ref[0] = y                                            # (1, 10)


# ------------------------------------------------------------------ wrapper --

@jax.jit
def net_forward(x_nchw, kp):
    """Pallas forward of Net. x_nchw: (B, 3, 32, 32) float32 -> (B, 10)."""
    B = x_nchw.shape[0]
    # NCHW input already matches the (C, H*W) flat layout; pad lanes for strips.
    xf = x_nchw.reshape(B, C0, H0 * W0)
    xf = jnp.pad(xf, ((0, 0), (0, 0), (0, S0P - H0 * W0)))

    args = (xf, kp["w1"], kp["b1"], kp["p1"], kp["w2"], kp["b2"], kp["p2"],
            kp["w3"], kp["b3"], kp["w4"], kp["b4"], kp["w5"], kp["b5"])

    flops_per_image = (2 * K * K * C1 * C0 * L1 + 2 * C1 * M1 * S1P
                       + 2 * K * K * C2 * C1 * L2 + 2 * C2 * M2 * NP2
                       + 2 * C2 * NP2 * F1 + 2 * F1 * F2 + 2 * F2 * F3)
    bytes_accessed = 4 * (sum(int(np.prod(a.shape)) for a in args) + B * F3)

    out = pl.pallas_call(
        _lenet_kernel,
        out_shape=jax.ShapeDtypeStruct((B, 1, F3), jnp.float32),
        grid=(B,),
        in_specs=[
            pl.BlockSpec((1, C0, S0P), lambda i: (i, 0, 0)),      # image i
            pl.BlockSpec((K * K, C1, C0), lambda i: (0, 0, 0)),   # conv1 taps
            pl.BlockSpec((C1, 1), lambda i: (0, 0)),              # conv1 bias
            pl.BlockSpec((M1, S1P), lambda i: (0, 0)),            # pool1 select
            pl.BlockSpec((K * K, C2, C1), lambda i: (0, 0, 0)),   # conv2 taps
            pl.BlockSpec((C2, 1), lambda i: (0, 0)),              # conv2 bias
            pl.BlockSpec((M2, NP2), lambda i: (0, 0)),            # pool2 select
            pl.BlockSpec((C2, NP2, F1), lambda i: (0, 0, 0)),     # fc1 w (flatten-folded)
            pl.BlockSpec((1, F1), lambda i: (0, 0)),              # fc1 b
            pl.BlockSpec((F1, F2), lambda i: (0, 0)),             # fc2 w
            pl.BlockSpec((1, F2), lambda i: (0, 0)),              # fc2 b
            pl.BlockSpec((F2, F3), lambda i: (0, 0)),             # fc3 w
            pl.BlockSpec((1, F3), lambda i: (0, 0)),              # fc3 b
        ],
        out_specs=pl.BlockSpec((1, 1, F3), lambda i: (i, 0, 0)),
        compiler_params=pltpu.CompilerParams(
            dimension_semantics=("parallel",)),
        cost_estimate=pl.CostEstimate(flops=B * flops_per_image,
                                      transcendentals=0,
                                      bytes_accessed=bytes_accessed),
    )(*args)
    return out.reshape(B, F3)


# --------------------------------------------------------------- parameters --

def init_params(key):
    """Deterministic init; PyTorch layouts (conv OIHW, linear (out, in))."""
    ks = jax.random.split(key, 10)

    def u(k, shape, fan_in):
        bound = 1.0 / float(np.sqrt(fan_in))
        return jax.random.uniform(k, shape, jnp.float32, -bound, bound)

    return {
        "conv1_w": u(ks[0], (C1, C0, K, K), C0 * K * K),
        "conv1_b": u(ks[1], (C1,), C0 * K * K),
        "conv2_w": u(ks[2], (C2, C1, K, K), C1 * K * K),
        "conv2_b": u(ks[3], (C2,), C1 * K * K),
        "fc1_w": u(ks[4], (F1, C2 * NP2), C2 * NP2),
        "fc1_b": u(ks[5], (F1,), C2 * NP2),
        "fc2_w": u(ks[6], (F2, F1), F1),
        "fc2_b": u(ks[7], (F2,), F1),
        "fc3_w": u(ks[8], (F3, F2), F2),
        "fc3_b": u(ks[9], (F3,), F2),
    }


def _pool_select(cand_len, src_w, out_h, out_w, out_cols):
    """0/1 matrix: column (ph*out_w+pw) selects candidate row 2*ph*src_w+2*pw."""
    p = np.zeros((cand_len, out_cols), np.float32)
    for ph in range(out_h):
        for pw in range(out_w):
            p[2 * ph * src_w + 2 * pw, ph * out_w + pw] = 1.0
    return jnp.asarray(p)


def kernel_params(p):
    """Rearrange PyTorch-layout params into the forms the fused kernel consumes."""
    w1 = jnp.transpose(p["conv1_w"], (2, 3, 0, 1)).reshape(K * K, C1, C0)
    w2 = jnp.transpose(p["conv2_w"], (2, 3, 0, 1)).reshape(K * K, C2, C1)
    # Fold torch's NCHW flatten (feature = c*25 + h*5 + w) into fc1's weight.
    w3 = jnp.transpose(p["fc1_w"].reshape(F1, C2, NP2), (1, 2, 0))     # (16, 25, 120)
    return {
        "w1": w1, "b1": p["conv1_b"].reshape(C1, 1),
        "w2": w2, "b2": p["conv2_b"].reshape(C2, 1),
        "p1": _pool_select(M1, W0, PH1, PW1, S1P),
        "p2": _pool_select(M2, PW1, PH2, PW2, NP2),
        "w3": w3, "b3": p["fc1_b"].reshape(1, F1),
        "w4": p["fc2_w"].T, "b4": p["fc2_b"].reshape(1, F2),
        "w5": p["fc3_w"].T, "b5": p["fc3_b"].reshape(1, F3),
    }


# ----------------------------------------------------- pure-JAX reference ---

def _maxpool_ref(y):  # NCHW
    B, C, H, W = y.shape
    return y.reshape(B, C, H // 2, 2, W // 2, 2).max(axis=(3, 5))


def reference_forward(x, p):
    dn = ("NCHW", "OIHW", "NCHW")
    y = lax.conv_general_dilated(x, p["conv1_w"], (1, 1), "VALID",
                                 dimension_numbers=dn)
    y = _maxpool_ref(jax.nn.relu(y + p["conv1_b"][None, :, None, None]))
    y = lax.conv_general_dilated(y, p["conv2_w"], (1, 1), "VALID",
                                 dimension_numbers=dn)
    y = _maxpool_ref(jax.nn.relu(y + p["conv2_b"][None, :, None, None]))
    y = y.reshape(y.shape[0], -1)
    y = jax.nn.relu(y @ p["fc1_w"].T + p["fc1_b"])
    y = jax.nn.relu(y @ p["fc2_w"].T + p["fc2_b"])
    return y @ p["fc3_w"].T + p["fc3_b"]


# -------------------------------------------------------------------- main --

if __name__ == "__main__":
    key = jax.random.PRNGKey(0)
    k_x, k_p = jax.random.split(key)

    x = jax.random.normal(k_x, (4, 3, 32, 32), jnp.float32)   # NCHW, like torch
    params = init_params(k_p)
    kparams = kernel_params(params)

    out = jax.block_until_ready(net_forward(x, kparams))
    assert out.shape == (4, 10)

    ref = reference_forward(x, params)
    np.testing.assert_allclose(np.asarray(out), np.asarray(ref),
                               rtol=2e-2, atol=2e-2)
    print("KERNEL_OK")
</pallas_src>

<mosaic_0001>
module attributes {stable_mosaic.version = 11 : i64} {
  func.func @_lenet_kernel(%arg0: i32, %arg1: memref<1x3x1152xf32, #tpu.memory_space<vmem>>, %arg2: memref<25x6x3xf32, #tpu.memory_space<vmem>>, %arg3: memref<6x1xf32, #tpu.memory_space<vmem>>, %arg4: memref<863x256xf32, #tpu.memory_space<vmem>>, %arg5: memref<25x16x6xf32, #tpu.memory_space<vmem>>, %arg6: memref<16x1xf32, #tpu.memory_space<vmem>>, %arg7: memref<125x25xf32, #tpu.memory_space<vmem>>, %arg8: memref<16x25x120xf32, #tpu.memory_space<vmem>>, %arg9: memref<1x120xf32, #tpu.memory_space<vmem>>, %arg10: memref<120x84xf32, #tpu.memory_space<vmem>>, %arg11: memref<1x84xf32, #tpu.memory_space<vmem>>, %arg12: memref<84x10xf32, #tpu.memory_space<vmem>>, %arg13: memref<1x10xf32, #tpu.memory_space<vmem>>, %arg14: memref<1x1x10xf32, #tpu.memory_space<vmem>>) attributes {dimension_semantics = [#tpu.dimension_semantics<parallel>], iteration_bounds = array<i64: 4>, scalar_prefetch = 0 : i64, scratch_operands = 0 : i64, tpu.core_type = #tpu.core_type<tc>, window_params = [{transform_indices = @transform_0, window_bounds = array<i64: 1, 3, 1152>}, {pipeline_mode = #tpu.pipeline_mode<synchronous>, transform_indices = @transform_1, window_bounds = array<i64: 25, 6, 3>}, {pipeline_mode = #tpu.pipeline_mode<synchronous>, transform_indices = @transform_2, window_bounds = array<i64: 6, 1>}, {pipeline_mode = #tpu.pipeline_mode<synchronous>, transform_indices = @transform_3, window_bounds = array<i64: 863, 256>}, {pipeline_mode = #tpu.pipeline_mode<synchronous>, transform_indices = @transform_4, window_bounds = array<i64: 25, 16, 6>}, {pipeline_mode = #tpu.pipeline_mode<synchronous>, transform_indices = @transform_5, window_bounds = array<i64: 16, 1>}, {pipeline_mode = #tpu.pipeline_mode<synchronous>, transform_indices = @transform_6, window_bounds = array<i64: 125, 25>}, {pipeline_mode = #tpu.pipeline_mode<synchronous>, transform_indices = @transform_7, window_bounds = array<i64: 16, 25, 120>}, {pipeline_mode = #tpu.pipeline_mode<synchronous>, transform_indices = @transform_8, window_bounds = array<i64: 1, 120>}, {pipeline_mode = #tpu.pipeline_mode<synchronous>, transform_indices = @transform_9, window_bounds = array<i64: 120, 84>}, {pipeline_mode = #tpu.pipeline_mode<synchronous>, transform_indices = @transform_10, window_bounds = array<i64: 1, 84>}, {pipeline_mode = #tpu.pipeline_mode<synchronous>, transform_indices = @transform_11, window_bounds = array<i64: 84, 10>}, {pipeline_mode = #tpu.pipeline_mode<synchronous>, transform_indices = @transform_12, window_bounds = array<i64: 1, 10>}, {transform_indices = @transform_13, window_bounds = array<i64: 1, 1, 10>}]} {
    %c0 = arith.constant 0 : index
    %c0_0 = arith.constant 0 : index
    %c0_1 = arith.constant 0 : index
    %0 = vector.load %arg1[%c0, %c0_0, %c0_1] : memref<1x3x1152xf32, #tpu.memory_space<vmem>>, vector<1x3x1152xf32>
    %1 = vector.shape_cast %0 : vector<1x3x1152xf32> to vector<3x1152xf32>
    %cst = arith.constant 0.000000e+00 : f32
    %2 = vector.broadcast %cst : f32 to vector<6x896xf32>
    %3 = vector.extract_strided_slice %1 {offsets = [0, 0], sizes = [3, 896], strides = [1, 1]} : vector<3x1152xf32> to vector<3x896xf32>
    %c0_2 = arith.constant 0 : index
    %c0_3 = arith.constant 0 : index
    %c0_4 = arith.constant 0 : index
    %4 = vector.load %arg2[%c0_2, %c0_3, %c0_4] : memref<25x6x3xf32, #tpu.memory_space<vmem>>, vector<1x6x3xf32>
    %5 = vector.shape_cast %4 : vector<1x6x3xf32> to vector<6x3xf32>
    %cst_5 = arith.constant dense<0.000000e+00> : vector<6x896xf32>
    %6 = tpu.matmul %5, %3, %cst_5 {dimension_numbers = #tpu.dot_dimension_numbers<[1], [0], [0], [1], [0, 0, 1, 1], [], []>} : vector<6x3xf32>, vector<3x896xf32>, vector<6x896xf32> -> vector<6x896xf32>
    %7 = arith.addf %2, %6 : vector<6x896xf32>
    %8 = vector.extract_strided_slice %1 {offsets = [0, 1], sizes = [3, 896], strides = [1, 1]} : vector<3x1152xf32> to vector<3x896xf32>
    %c1 = arith.constant 1 : index
    %c0_6 = arith.constant 0 : index
    %c0_7 = arith.constant 0 : index
    %9 = vector.load %arg2[%c1, %c0_6, %c0_7] : memref<25x6x3xf32, #tpu.memory_space<vmem>>, vector<1x6x3xf32>
    %10 = vector.shape_cast %9 : vector<1x6x3xf32> to vector<6x3xf32>
    %cst_8 = arith.constant dense<0.000000e+00> : vector<6x896xf32>
    %11 = tpu.matmul %10, %8, %cst_8 {dimension_numbers = #tpu.dot_dimension_numbers<[1], [0], [0], [1], [0, 0, 1, 1], [], []>} : vector<6x3xf32>, vector<3x896xf32>, vector<6x896xf32> -> vector<6x896xf32>
    %12 = arith.addf %7, %11 : vector<6x896xf32>
    %13 = vector.extract_strided_slice %1 {offsets = [0, 2], sizes = [3, 896], strides = [1, 1]} : vector<3x1152xf32> to vector<3x896xf32>
    %c2 = arith.constant 2 : index
    %c0_9 = arith.constant 0 : index
    %c0_10 = arith.constant 0 : index
    %14 = vector.load %arg2[%c2, %c0_9, %c0_10] : memref<25x6x3xf32, #tpu.memory_space<vmem>>, vector<1x6x3xf32>
    %15 = vector.shape_cast %14 : vector<1x6x3xf32> to vector<6x3xf32>
    %cst_11 = arith.constant dense<0.000000e+00> : vector<6x896xf32>
    %16 = tpu.matmul %15, %13, %cst_11 {dimension_numbers = #tpu.dot_dimension_numbers<[1], [0], [0], [1], [0, 0, 1, 1], [], []>} : vector<6x3xf32>, vector<3x896xf32>, vector<6x896xf32> -> vector<6x896xf32>
    %17 = arith.addf %12, %16 : vector<6x896xf32>
    %18 = vector.extract_strided_slice %1 {offsets = [0, 3], sizes = [3, 896], strides = [1, 1]} : vector<3x1152xf32> to vector<3x896xf32>
    %c3 = arith.constant 3 : index
    %c0_12 = arith.constant 0 : index
    %c0_13 = arith.constant 0 : index
    %19 = vector.load %arg2[%c3, %c0_12, %c0_13] : memref<25x6x3xf32, #tpu.memory_space<vmem>>, vector<1x6x3xf32>
    %20 = vector.shape_cast %19 : vector<1x6x3xf32> to vector<6x3xf32>
    %cst_14 = arith.constant dense<0.000000e+00> : vector<6x896xf32>
    %21 = tpu.matmul %20, %18, %cst_14 {dimension_numbers = #tpu.dot_dimension_numbers<[1], [0], [0], [1], [0, 0, 1, 1], [], []>} : vector<6x3xf32>, vector<3x896xf32>, vector<6x896xf32> -> vector<6x896xf32>
    %22 = arith.addf %17, %21 : vector<6x896xf32>
    %23 = vector.extract_strided_slice %1 {offsets = [0, 4], sizes = [3, 896], strides = [1, 1]} : vector<3x1152xf32> to vector<3x896xf32>
    %c4 = arith.constant 4 : index
    %c0_15 = arith.constant 0 : index
    %c0_16 = arith.constant 0 : index
    %24 = vector.load %arg2[%c4, %c0_15, %c0_16] : memref<25x6x3xf32, #tpu.memory_space<vmem>>, vector<1x6x3xf32>
    %25 = vector.shape_cast %24 : vector<1x6x3xf32> to vector<6x3xf32>
    %cst_17 = arith.constant dense<0.000000e+00> : vector<6x896xf32>
    %26 = tpu.matmul %25, %23, %cst_17 {dimension_numbers = #tpu.dot_dimension_numbers<[1], [0], [0], [1], [0, 0, 1, 1], [], []>} : vector<6x3xf32>, vector<3x896xf32>, vector<6x896xf32> -> vector<6x896xf32>
    %27 = arith.addf %22, %26 : vector<6x896xf32>
    %28 = vector.extract_strided_slice %1 {offsets = [0, 32], sizes = [3, 896], strides = [1, 1]} : vector<3x1152xf32> to vector<3x896xf32>
    %c5 = arith.constant 5 : index
    %c0_18 = arith.constant 0 : index
    %c0_19 = arith.constant 0 : index
    %29 = vector.load %arg2[%c5, %c0_18, %c0_19] : memref<25x6x3xf32, #tpu.memory_space<vmem>>, vector<1x6x3xf32>
    %30 = vector.shape_cast %29 : vector<1x6x3xf32> to vector<6x3xf32>
    %cst_20 = arith.constant dense<0.000000e+00> : vector<6x896xf32>
    %31 = tpu.matmul %30, %28, %cst_20 {dimension_numbers = #tpu.dot_dimension_numbers<[1], [0], [0], [1], [0, 0, 1, 1], [], []>} : vector<6x3xf32>, vector<3x896xf32>, vector<6x896xf32> -> vector<6x896xf32>
    %32 = arith.addf %27, %31 : vector<6x896xf32>
    %33 = vector.extract_strided_slice %1 {offsets = [0, 33], sizes = [3, 896], strides = [1, 1]} : vector<3x1152xf32> to vector<3x896xf32>
    %c6 = arith.constant 6 : index
    %c0_21 = arith.constant 0 : index
    %c0_22 = arith.constant 0 : index
    %34 = vector.load %arg2[%c6, %c0_21, %c0_22] : memref<25x6x3xf32, #tpu.memory_space<vmem>>, vector<1x6x3xf32>
    %35 = vector.shape_cast %34 : vector<1x6x3xf32> to vector<6x3xf32>
    %cst_23 = arith.constant dense<0.000000e+00> : vector<6x896xf32>
    %36 = tpu.matmul %35, %33, %cst_23 {dimension_numbers = #tpu.dot_dimension_numbers<[1], [0], [0], [1], [0, 0, 1, 1], [], []>} : vector<6x3xf32>, vector<3x896xf32>, vector<6x896xf32> -> vector<6x896xf32>
    %37 = arith.addf %32, %36 : vector<6x896xf32>
    %38 = vector.extract_strided_slice %1 {offsets = [0, 34], sizes = [3, 896], strides = [1, 1]} : vector<3x1152xf32> to vector<3x896xf32>
    %c7 = arith.constant 7 : index
    %c0_24 = arith.constant 0 : index
    %c0_25 = arith.constant 0 : index
    %39 = vector.load %arg2[%c7, %c0_24, %c0_25] : memref<25x6x3xf32, #tpu.memory_space<vmem>>, vector<1x6x3xf32>
    %40 = vector.shape_cast %39 : vector<1x6x3xf32> to vector<6x3xf32>
    %cst_26 = arith.constant dense<0.000000e+00> : vector<6x896xf32>
    %41 = tpu.matmul %40, %38, %cst_26 {dimension_numbers = #tpu.dot_dimension_numbers<[1], [0], [0], [1], [0, 0, 1, 1], [], []>} : vector<6x3xf32>, vector<3x896xf32>, vector<6x896xf32> -> vector<6x896xf32>
    %42 = arith.addf %37, %41 : vector<6x896xf32>
    %43 = vector.extract_strided_slice %1 {offsets = [0, 35], sizes = [3, 896], strides = [1, 1]} : vector<3x1152xf32> to vector<3x896xf32>
    %c8 = arith.constant 8 : index
    %c0_27 = arith.constant 0 : index
    %c0_28 = arith.constant 0 : index
    %44 = vector.load %arg2[%c8, %c0_27, %c0_28] : memref<25x6x3xf32, #tpu.memory_space<vmem>>, vector<1x6x3xf32>
    %45 = vector.shape_cast %44 : vector<1x6x3xf32> to vector<6x3xf32>
    %cst_29 = arith.constant dense<0.000000e+00> : vector<6x896xf32>
    %46 = tpu.matmul %45, %43, %cst_29 {dimension_numbers = #tpu.dot_dimension_numbers<[1], [0], [0], [1], [0, 0, 1, 1], [], []>} : vector<6x3xf32>, vector<3x896xf32>, vector<6x896xf32> -> vector<6x896xf32>
    %47 = arith.addf %42, %46 : vector<6x896xf32>
    %48 = vector.extract_strided_slice %1 {offsets = [0, 36], sizes = [3, 896], strides = [1, 1]} : vector<3x1152xf32> to vector<3x896xf32>
    %c9 = arith.constant 9 : index
    %c0_30 = arith.constant 0 : index
    %c0_31 = arith.constant 0 : index
    %49 = vector.load %arg2[%c9, %c0_30, %c0_31] : memref<25x6x3xf32, #tpu.memory_space<vmem>>, vector<1x6x3xf32>
    %50 = vector.shape_cast %49 : vector<1x6x3xf32> to vector<6x3xf32>
    %cst_32 = arith.constant dense<0.000000e+00> : vector<6x896xf32>
    %51 = tpu.matmul %50, %48, %cst_32 {dimension_numbers = #tpu.dot_dimension_numbers<[1], [0], [0], [1], [0, 0, 1, 1], [], []>} : vector<6x3xf32>, vector<3x896xf32>, vector<6x896xf32> -> vector<6x896xf32>
    %52 = arith.addf %47, %51 : vector<6x896xf32>
    %53 = vector.extract_strided_slice %1 {offsets = [0, 64], sizes = [3, 896], strides = [1, 1]} : vector<3x1152xf32> to vector<3x896xf32>
    %c10 = arith.constant 10 : index
    %c0_33 = arith.constant 0 : index
    %c0_34 = arith.constant 0 : index
    %54 = vector.load %arg2[%c10, %c0_33, %c0_34] : memref<25x6x3xf32, #tpu.memory_space<vmem>>, vector<1x6x3xf32>
    %55 = vector.shape_cast %54 : vector<1x6x3xf32> to vector<6x3xf32>
    %cst_35 = arith.constant dense<0.000000e+00> : vector<6x896xf32>
    %56 = tpu.matmul %55, %53, %cst_35 {dimension_numbers = #tpu.dot_dimension_numbers<[1], [0], [0], [1], [0, 0, 1, 1], [], []>} : vector<6x3xf32>, vector<3x896xf32>, vector<6x896xf32> -> vector<6x896xf32>
    %57 = arith.addf %52, %56 : vector<6x896xf32>
    %58 = vector.extract_strided_slice %1 {offsets = [0, 65], sizes = [3, 896], strides = [1, 1]} : vector<3x1152xf32> to vector<3x896xf32>
    %c11 = arith.constant 11 : index
    %c0_36 = arith.constant 0 : index
    %c0_37 = arith.constant 0 : index
    %59 = vector.load %arg2[%c11, %c0_36, %c0_37] : memref<25x6x3xf32, #tpu.memory_space<vmem>>, vector<1x6x3xf32>
    %60 = vector.shape_cast %59 : vector<1x6x3xf32> to vector<6x3xf32>
    %cst_38 = arith.constant dense<0.000000e+00> : vector<6x896xf32>
    %61 = tpu.matmul %60, %58, %cst_38 {dimension_numbers = #tpu.dot_dimension_numbers<[1], [0], [0], [1], [0, 0, 1, 1], [], []>} : vector<6x3xf32>, vector<3x896xf32>, vector<6x896xf32> -> vector<6x896xf32>
    %62 = arith.addf %57, %61 : vector<6x896xf32>
    %63 = vector.extract_strided_slice %1 {offsets = [0, 66], sizes = [3, 896], strides = [1, 1]} : vector<3x1152xf32> to vector<3x896xf32>
    %c12 = arith.constant 12 : index
    %c0_39 = arith.constant 0 : index
    %c0_40 = arith.constant 0 : index
    %64 = vector.load %arg2[%c12, %c0_39, %c0_40] : memref<25x6x3xf32, #tpu.memory_space<vmem>>, vector<1x6x3xf32>
    %65 = vector.shape_cast %64 : vector<1x6x3xf32> to vector<6x3xf32>
    %cst_41 = arith.constant dense<0.000000e+00> : vector<6x896xf32>
    %66 = tpu.matmul %65, %63, %cst_41 {dimension_numbers = #tpu.dot_dimension_numbers<[1], [0], [0], [1], [0, 0, 1, 1], [], []>} : vector<6x3xf32>, vector<3x896xf32>, vector<6x896xf32> -> vector<6x896xf32>
    %67 = arith.addf %62, %66 : vector<6x896xf32>
    %68 = vector.extract_strided_slice %1 {offsets = [0, 67], sizes = [3, 896], strides = [1, 1]} : vector<3x1152xf32> to vector<3x896xf32>
    %c13 = arith.constant 13 : index
    %c0_42 = arith.constant 0 : index
    %c0_43 = arith.constant 0 : index
    %69 = vector.load %arg2[%c13, %c0_42, %c0_43] : memref<25x6x3xf32, #tpu.memory_space<vmem>>, vector<1x6x3xf32>
    %70 = vector.shape_cast %69 : vector<1x6x3xf32> to vector<6x3xf32>
    %cst_44 = arith.constant dense<0.000000e+00> : vector<6x896xf32>
    %71 = tpu.matmul %70, %68, %cst_44 {dimension_numbers = #tpu.dot_dimension_numbers<[1], [0], [0], [1], [0, 0, 1, 1], [], []>} : vector<6x3xf32>, vector<3x896xf32>, vector<6x896xf32> -> vector<6x896xf32>
    %72 = arith.addf %67, %71 : vector<6x896xf32>
    %73 = vector.extract_strided_slice %1 {offsets = [0, 68], sizes = [3, 896], strides = [1, 1]} : vector<3x1152xf32> to vector<3x896xf32>
    %c14 = arith.constant 14 : index
    %c0_45 = arith.constant 0 : index
    %c0_46 = arith.constant 0 : index
    %74 = vector.load %arg2[%c14, %c0_45, %c0_46] : memref<25x6x3xf32, #tpu.memory_space<vmem>>, vector<1x6x3xf32>
    %75 = vector.shape_cast %74 : vector<1x6x3xf32> to vector<6x3xf32>
    %cst_47 = arith.constant dense<0.000000e+00> : vector<6x896xf32>
    %76 = tpu.matmul %75, %73, %cst_47 {dimension_numbers = #tpu.dot_dimension_numbers<[1], [0], [0], [1], [0, 0, 1, 1], [], []>} : vector<6x3xf32>, vector<3x896xf32>, vector<6x896xf32> -> vector<6x896xf32>
    %77 = arith.addf %72, %76 : vector<6x896xf32>
    %78 = vector.extract_strided_slice %1 {offsets = [0, 96], sizes = [3, 896], strides = [1, 1]} : vector<3x1152xf32> to vector<3x896xf32>
    %c15 = arith.constant 15 : index
    %c0_48 = arith.constant 0 : index
    %c0_49 = arith.constant 0 : index
    %79 = vector.load %arg2[%c15, %c0_48, %c0_49] : memref<25x6x3xf32, #tpu.memory_space<vmem>>, vector<1x6x3xf32>
    %80 = vector.shape_cast %79 : vector<1x6x3xf32> to vector<6x3xf32>
    %cst_50 = arith.constant dense<0.000000e+00> : vector<6x896xf32>
    %81 = tpu.matmul %80, %78, %cst_50 {dimension_numbers = #tpu.dot_dimension_numbers<[1], [0], [0], [1], [0, 0, 1, 1], [], []>} : vector<6x3xf32>, vector<3x896xf32>, vector<6x896xf32> -> vector<6x896xf32>
    %82 = arith.addf %77, %81 : vector<6x896xf32>
    %83 = vector.extract_strided_slice %1 {offsets = [0, 97], sizes = [3, 896], strides = [1, 1]} : vector<3x1152xf32> to vector<3x896xf32>
    %c16 = arith.constant 16 : index
    %c0_51 = arith.constant 0 : index
    %c0_52 = arith.constant 0 : index
    %84 = vector.load %arg2[%c16, %c0_51, %c0_52] : memref<25x6x3xf32, #tpu.memory_space<vmem>>, vector<1x6x3xf32>
    %85 = vector.shape_cast %84 : vector<1x6x3xf32> to vector<6x3xf32>
    %cst_53 = arith.constant dense<0.000000e+00> : vector<6x896xf32>
    %86 = tpu.matmul %85, %83, %cst_53 {dimension_numbers = #tpu.dot_dimension_numbers<[1], [0], [0], [1], [0, 0, 1, 1], [], []>} : vector<6x3xf32>, vector<3x896xf32>, vector<6x896xf32> -> vector<6x896xf32>
    %87 = arith.addf %82, %86 : vector<6x896xf32>
    %88 = vector.extract_strided_slice %1 {offsets = [0, 98], sizes = [3, 896], strides = [1, 1]} : vector<3x1152xf32> to vector<3x896xf32>
    %c17 = arith.constant 17 : index
    %c0_54 = arith.constant 0 : index
    %c0_55 = arith.constant 0 : index
    %89 = vector.load %arg2[%c17, %c0_54, %c0_55] : memref<25x6x3xf32, #tpu.memory_space<vmem>>, vector<1x6x3xf32>
    %90 = vector.shape_cast %89 : vector<1x6x3xf32> to vector<6x3xf32>
    %cst_56 = arith.constant dense<0.000000e+00> : vector<6x896xf32>
    %91 = tpu.matmul %90, %88, %cst_56 {dimension_numbers = #tpu.dot_dimension_numbers<[1], [0], [0], [1], [0, 0, 1, 1], [], []>} : vector<6x3xf32>, vector<3x896xf32>, vector<6x896xf32> -> vector<6x896xf32>
    %92 = arith.addf %87, %91 : vector<6x896xf32>
    %93 = vector.extract_strided_slice %1 {offsets = [0, 99], sizes = [3, 896], strides = [1, 1]} : vector<3x1152xf32> to vector<3x896xf32>
    %c18 = arith.constant 18 : index
    %c0_57 = arith.constant 0 : index
    %c0_58 = arith.constant 0 : index
    %94 = vector.load %arg2[%c18, %c0_57, %c0_58] : memref<25x6x3xf32, #tpu.memory_space<vmem>>, vector<1x6x3xf32>
    %95 = vector.shape_cast %94 : vector<1x6x3xf32> to vector<6x3xf32>
    %cst_59 = arith.constant dense<0.000000e+00> : vector<6x896xf32>
    %96 = tpu.matmul %95, %93, %cst_59 {dimension_numbers = #tpu.dot_dimension_numbers<[1], [0], [0], [1], [0, 0, 1, 1], [], []>} : vector<6x3xf32>, vector<3x896xf32>, vector<6x896xf32> -> vector<6x896xf32>
    %97 = arith.addf %92, %96 : vector<6x896xf32>
    %98 = vector.extract_strided_slice %1 {offsets = [0, 100], sizes = [3, 896], strides = [1, 1]} : vector<3x1152xf32> to vector<3x896xf32>
    %c19 = arith.constant 19 : index
    %c0_60 = arith.constant 0 : index
    %c0_61 = arith.constant 0 : index
    %99 = vector.load %arg2[%c19, %c0_60, %c0_61] : memref<25x6x3xf32, #tpu.memory_space<vmem>>, vector<1x6x3xf32>
    %100 = vector.shape_cast %99 : vector<1x6x3xf32> to vector<6x3xf32>
    %cst_62 = arith.constant dense<0.000000e+00> : vector<6x896xf32>
    %101 = tpu.matmul %100, %98, %cst_62 {dimension_numbers = #tpu.dot_dimension_numbers<[1], [0], [0], [1], [0, 0, 1, 1], [], []>} : vector<6x3xf32>, vector<3x896xf32>, vector<6x896xf32> -> vector<6x896xf32>
    %102 = arith.addf %97, %101 : vector<6x896xf32>
    %103 = vector.extract_strided_slice %1 {offsets = [0, 128], sizes = [3, 896], strides = [1, 1]} : vector<3x1152xf32> to vector<3x896xf32>
    %c20 = arith.constant 20 : index
    %c0_63 = arith.constant 0 : index
    %c0_64 = arith.constant 0 : index
    %104 = vector.load %arg2[%c20, %c0_63, %c0_64] : memref<25x6x3xf32, #tpu.memory_space<vmem>>, vector<1x6x3xf32>
    %105 = vector.shape_cast %104 : vector<1x6x3xf32> to vector<6x3xf32>
    %cst_65 = arith.constant dense<0.000000e+00> : vector<6x896xf32>
    %106 = tpu.matmul %105, %103, %cst_65 {dimension_numbers = #tpu.dot_dimension_numbers<[1], [0], [0], [1], [0, 0, 1, 1], [], []>} : vector<6x3xf32>, vector<3x896xf32>, vector<6x896xf32> -> vector<6x896xf32>
    %107 = arith.addf %102, %106 : vector<6x896xf32>
    %108 = vector.extract_strided_slice %1 {offsets = [0, 129], sizes = [3, 896], strides = [1, 1]} : vector<3x1152xf32> to vector<3x896xf32>
    %c21 = arith.constant 21 : index
    %c0_66 = arith.constant 0 : index
    %c0_67 = arith.constant 0 : index
    %109 = vector.load %arg2[%c21, %c0_66, %c0_67] : memref<25x6x3xf32, #tpu.memory_space<vmem>>, vector<1x6x3xf32>
    %110 = vector.shape_cast %109 : vector<1x6x3xf32> to vector<6x3xf32>
    %cst_68 = arith.constant dense<0.000000e+00> : vector<6x896xf32>
    %111 = tpu.matmul %110, %108, %cst_68 {dimension_numbers = #tpu.dot_dimension_numbers<[1], [0], [0], [1], [0, 0, 1, 1], [], []>} : vector<6x3xf32>, vector<3x896xf32>, vector<6x896xf32> -> vector<6x896xf32>
    %112 = arith.addf %107, %111 : vector<6x896xf32>
    %113 = vector.extract_strided_slice %1 {offsets = [0, 130], sizes = [3, 896], strides = [1, 1]} : vector<3x1152xf32> to vector<3x896xf32>
    %c22 = arith.constant 22 : index
    %c0_69 = arith.constant 0 : index
    %c0_70 = arith.constant 0 : index
    %114 = vector.load %arg2[%c22, %c0_69, %c0_70] : memref<25x6x3xf32, #tpu.memory_space<vmem>>, vector<1x6x3xf32>
    %115 = vector.shape_cast %114 : vector<1x6x3xf32> to vector<6x3xf32>
    %cst_71 = arith.constant dense<0.000000e+00> : vector<6x896xf32>
    %116 = tpu.matmul %115, %113, %cst_71 {dimension_numbers = #tpu.dot_dimension_numbers<[1], [0], [0], [1], [0, 0, 1, 1], [], []>} : vector<6x3xf32>, vector<3x896xf32>, vector<6x896xf32> -> vector<6x896xf32>
    %117 = arith.addf %112, %116 : vector<6x896xf32>
    %118 = vector.extract_strided_slice %1 {offsets = [0, 131], sizes = [3, 896], strides = [1, 1]} : vector<3x1152xf32> to vector<3x896xf32>
    %c23 = arith.constant 23 : index
    %c0_72 = arith.constant 0 : index
    %c0_73 = arith.constant 0 : index
    %119 = vector.load %arg2[%c23, %c0_72, %c0_73] : memref<25x6x3xf32, #tpu.memory_space<vmem>>, vector<1x6x3xf32>
    %120 = vector.shape_cast %119 : vector<1x6x3xf32> to vector<6x3xf32>
    %cst_74 = arith.constant dense<0.000000e+00> : vector<6x896xf32>
    %121 = tpu.matmul %120, %118, %cst_74 {dimension_numbers = #tpu.dot_dimension_numbers<[1], [0], [0], [1], [0, 0, 1, 1], [], []>} : vector<6x3xf32>, vector<3x896xf32>, vector<6x896xf32> -> vector<6x896xf32>
    %122 = arith.addf %117, %121 : vector<6x896xf32>
    %123 = vector.extract_strided_slice %1 {offsets = [0, 132], sizes = [3, 896], strides = [1, 1]} : vector<3x1152xf32> to vector<3x896xf32>
    %c24 = arith.constant 24 : index
    %c0_75 = arith.constant 0 : index
    %c0_76 = arith.constant 0 : index
    %124 = vector.load %arg2[%c24, %c0_75, %c0_76] : memref<25x6x3xf32, #tpu.memory_space<vmem>>, vector<1x6x3xf32>
    %125 = vector.shape_cast %124 : vector<1x6x3xf32> to vector<6x3xf32>
    %cst_77 = arith.constant dense<0.000000e+00> : vector<6x896xf32>
    %126 = tpu.matmul %125, %123, %cst_77 {dimension_numbers = #tpu.dot_dimension_numbers<[1], [0], [0], [1], [0, 0, 1, 1], [], []>} : vector<6x3xf32>, vector<3x896xf32>, vector<6x896xf32> -> vector<6x896xf32>
    %127 = arith.addf %122, %126 : vector<6x896xf32>
    %c0_78 = arith.constant 0 : index
    %c0_79 = arith.constant 0 : index
    %128 = vector.load %arg3[%c0_78, %c0_79] : memref<6x1xf32, #tpu.memory_space<vmem>>, vector<6x1xf32>
    %129 = vector.broadcast %128 : vector<6x1xf32> to vector<6x896xf32>
    %130 = arith.addf %127, %129 : vector<6x896xf32>
    %cst_80 = arith.constant 0.000000e+00 : f32
    %131 = vector.broadcast %cst_80 : f32 to vector<6x896xf32>
    %132 = arith.maximumf %130, %131 : vector<6x896xf32>
    %133 = vector.extract_strided_slice %132 {offsets = [0, 0], sizes = [6, 895], strides = [1, 1]} : vector<6x896xf32> to vector<6x895xf32>
    %134 = vector.extract_strided_slice %132 {offsets = [0, 1], sizes = [6, 895], strides = [1, 1]} : vector<6x896xf32> to vector<6x895xf32>
    %135 = arith.maximumf %133, %134 : vector<6x895xf32>
    %136 = vector.extract_strided_slice %135 {offsets = [0, 0], sizes = [6, 863], strides = [1, 1]} : vector<6x895xf32> to vector<6x863xf32>
    %137 = vector.extract_strided_slice %135 {offsets = [0, 32], sizes = [6, 863], strides = [1, 1]} : vector<6x895xf32> to vector<6x863xf32>
    %138 = arith.maximumf %136, %137 : vector<6x863xf32>
    %c0_81 = arith.constant 0 : index
    %c0_82 = arith.constant 0 : index
    %139 = vector.load %arg4[%c0_81, %c0_82] : memref<863x256xf32, #tpu.memory_space<vmem>>, vector<863x256xf32>
    %cst_83 = arith.constant dense<0.000000e+00> : vector<6x256xf32>
    %140 = tpu.matmul %138, %139, %cst_83 {dimension_numbers = #tpu.dot_dimension_numbers<[1], [0], [0], [1], [0, 0, 1, 1], [], []>} : vector<6x863xf32>, vector<863x256xf32>, vector<6x256xf32> -> vector<6x256xf32>
    %cst_84 = arith.constant 0.000000e+00 : f32
    %141 = vector.broadcast %cst_84 : f32 to vector<16x140xf32>
    %142 = vector.extract_strided_slice %140 {offsets = [0, 0], sizes = [6, 140], strides = [1, 1]} : vector<6x256xf32> to vector<6x140xf32>
    %c0_85 = arith.constant 0 : index
    %c0_86 = arith.constant 0 : index
    %c0_87 = arith.constant 0 : index
    %143 = vector.load %arg5[%c0_85, %c0_86, %c0_87] : memref<25x16x6xf32, #tpu.memory_space<vmem>>, vector<1x16x6xf32>
    %144 = vector.shape_cast %143 : vector<1x16x6xf32> to vector<16x6xf32>
    %cst_88 = arith.constant dense<0.000000e+00> : vector<16x140xf32>
    %145 = tpu.matmul %144, %142, %cst_88 {dimension_numbers = #tpu.dot_dimension_numbers<[1], [0], [0], [1], [0, 0, 1, 1], [], []>} : vector<16x6xf32>, vector<6x140xf32>, vector<16x140xf32> -> vector<16x140xf32>
    %146 = arith.addf %141, %145 : vector<16x140xf32>
    %147 = vector.extract_strided_slice %140 {offsets = [0, 1], sizes = [6, 140], strides = [1, 1]} : vector<6x256xf32> to vector<6x140xf32>
    %c1_89 = arith.constant 1 : index
    %c0_90 = arith.constant 0 : index
    %c0_91 = arith.constant 0 : index
    %148 = vector.load %arg5[%c1_89, %c0_90, %c0_91] : memref<25x16x6xf32, #tpu.memory_space<vmem>>, vector<1x16x6xf32>
    %149 = vector.shape_cast %148 : vector<1x16x6xf32> to vector<16x6xf32>
    %cst_92 = arith.constant dense<0.000000e+00> : vector<16x140xf32>
    %150 = tpu.matmul %149, %147, %cst_92 {dimension_numbers = #tpu.dot_dimension_numbers<[1], [0], [0], [1], [0, 0, 1, 1], [], []>} : vector<16x6xf32>, vector<6x140xf32>, vector<16x140xf32> -> vector<16x140xf32>
    %151 = arith.addf %146, %150 : vector<16x140xf32>
    %152 = vector.extract_strided_slice %140 {offsets = [0, 2], sizes = [6, 140], strides = [1, 1]} : vector<6x256xf32> to vector<6x140xf32>
    %c2_93 = arith.constant 2 : index
    %c0_94 = arith.constant 0 : index
    %c0_95 = arith.constant 0 : index
    %153 = vector.load %arg5[%c2_93, %c0_94, %c0_95] : memref<25x16x6xf32, #tpu.memory_space<vmem>>, vector<1x16x6xf32>
    %154 = vector.shape_cast %153 : vector<1x16x6xf32> to vector<16x6xf32>
    %cst_96 = arith.constant dense<0.000000e+00> : vector<16x140xf32>
    %155 = tpu.matmul %154, %152, %cst_96 {dimension_numbers = #tpu.dot_dimension_numbers<[1], [0], [0], [1], [0, 0, 1, 1], [], []>} : vector<16x6xf32>, vector<6x140xf32>, vector<16x140xf32> -> vector<16x140xf32>
    %156 = arith.addf %151, %155 : vector<16x140xf32>
    %157 = vector.extract_strided_slice %140 {offsets = [0, 3], sizes = [6, 140], strides = [1, 1]} : vector<6x256xf32> to vector<6x140xf32>
    %c3_97 = arith.constant 3 : index
    %c0_98 = arith.constant 0 : index
    %c0_99 = arith.constant 0 : index
    %158 = vector.load %arg5[%c3_97, %c0_98, %c0_99] : memref<25x16x6xf32, #tpu.memory_space<vmem>>, vector<1x16x6xf32>
    %159 = vector.shape_cast %158 : vector<1x16x6xf32> to vector<16x6xf32>
    %cst_100 = arith.constant dense<0.000000e+00> : vector<16x140xf32>
    %160 = tpu.matmul %159, %157, %cst_100 {dimension_numbers = #tpu.dot_dimension_numbers<[1], [0], [0], [1], [0, 0, 1, 1], [], []>} : vector<16x6xf32>, vector<6x140xf32>, vector<16x140xf32> -> vector<16x140xf32>
    %161 = arith.addf %156, %160 : vector<16x140xf32>
    %162 = vector.extract_strided_slice %140 {offsets = [0, 4], sizes = [6, 140], strides = [1, 1]} : vector<6x256xf32> to vector<6x140xf32>
    %c4_101 = arith.constant 4 : index
    %c0_102 = arith.constant 0 : index
    %c0_103 = arith.constant 0 : index
    %163 = vector.load %arg5[%c4_101, %c0_102, %c0_103] : memref<25x16x6xf32, #tpu.memory_space<vmem>>, vector<1x16x6xf32>
    %164 = vector.shape_cast %163 : vector<1x16x6xf32> to vector<16x6xf32>
    %cst_104 = arith.constant dense<0.000000e+00> : vector<16x140xf32>
    %165 = tpu.matmul %164, %162, %cst_104 {dimension_numbers = #tpu.dot_dimension_numbers<[1], [0], [0], [1], [0, 0, 1, 1], [], []>} : vector<16x6xf32>, vector<6x140xf32>, vector<16x140xf32> -> vector<16x140xf32>
    %166 = arith.addf %161, %165 : vector<16x140xf32>
    %167 = vector.extract_strided_slice %140 {offsets = [0, 14], sizes = [6, 140], strides = [1, 1]} : vector<6x256xf32> to vector<6x140xf32>
    %c5_105 = arith.constant 5 : index
    %c0_106 = arith.constant 0 : index
    %c0_107 = arith.constant 0 : index
    %168 = vector.load %arg5[%c5_105, %c0_106, %c0_107] : memref<25x16x6xf32, #tpu.memory_space<vmem>>, vector<1x16x6xf32>
    %169 = vector.shape_cast %168 : vector<1x16x6xf32> to vector<16x6xf32>
    %cst_108 = arith.constant dense<0.000000e+00> : vector<16x140xf32>
    %170 = tpu.matmul %169, %167, %cst_108 {dimension_numbers = #tpu.dot_dimension_numbers<[1], [0], [0], [1], [0, 0, 1, 1], [], []>} : vector<16x6xf32>, vector<6x140xf32>, vector<16x140xf32> -> vector<16x140xf32>
    %171 = arith.addf %166, %170 : vector<16x140xf32>
    %172 = vector.extract_strided_slice %140 {offsets = [0, 15], sizes = [6, 140], strides = [1, 1]} : vector<6x256xf32> to vector<6x140xf32>
    %c6_109 = arith.constant 6 : index
    %c0_110 = arith.constant 0 : index
    %c0_111 = arith.constant 0 : index
    %173 = vector.load %arg5[%c6_109, %c0_110, %c0_111] : memref<25x16x6xf32, #tpu.memory_space<vmem>>, vector<1x16x6xf32>
    %174 = vector.shape_cast %173 : vector<1x16x6xf32> to vector<16x6xf32>
    %cst_112 = arith.constant dense<0.000000e+00> : vector<16x140xf32>
    %175 = tpu.matmul %174, %172, %cst_112 {dimension_numbers = #tpu.dot_dimension_numbers<[1], [0], [0], [1], [0, 0, 1, 1], [], []>} : vector<16x6xf32>, vector<6x140xf32>, vector<16x140xf32> -> vector<16x140xf32>
    %176 = arith.addf %171, %175 : vector<16x140xf32>
    %177 = vector.extract_strided_slice %140 {offsets = [0, 16], sizes = [6, 140], strides = [1, 1]} : vector<6x256xf32> to vector<6x140xf32>
    %c7_113 = arith.constant 7 : index
    %c0_114 = arith.constant 0 : index
    %c0_115 = arith.constant 0 : index
    %178 = vector.load %arg5[%c7_113, %c0_114, %c0_115] : memref<25x16x6xf32, #tpu.memory_space<vmem>>, vector<1x16x6xf32>
    %179 = vector.shape_cast %178 : vector<1x16x6xf32> to vector<16x6xf32>
    %cst_116 = arith.constant dense<0.000000e+00> : vector<16x140xf32>
    %180 = tpu.matmul %179, %177, %cst_116 {dimension_numbers = #tpu.dot_dimension_numbers<[1], [0], [0], [1], [0, 0, 1, 1], [], []>} : vector<16x6xf32>, vector<6x140xf32>, vector<16x140xf32> -> vector<16x140xf32>
    %181 = arith.addf %176, %180 : vector<16x140xf32>
    %182 = vector.extract_strided_slice %140 {offsets = [0, 17], sizes = [6, 140], strides = [1, 1]} : vector<6x256xf32> to vector<6x140xf32>
    %c8_117 = arith.constant 8 : index
    %c0_118 = arith.constant 0 : index
    %c0_119 = arith.constant 0 : index
    %183 = vector.load %arg5[%c8_117, %c0_118, %c0_119] : memref<25x16x6xf32, #tpu.memory_space<vmem>>, vector<1x16x6xf32>
    %184 = vector.shape_cast %183 : vector<1x16x6xf32> to vector<16x6xf32>
    %cst_120 = arith.constant dense<0.000000e+00> : vector<16x140xf32>
    %185 = tpu.matmul %184, %182, %cst_120 {dimension_numbers = #tpu.dot_dimension_numbers<[1], [0], [0], [1], [0, 0, 1, 1], [], []>} : vector<16x6xf32>, vector<6x140xf32>, vector<16x140xf32> -> vector<16x140xf32>
    %186 = arith.addf %181, %185 : vector<16x140xf32>
    %187 = vector.extract_strided_slice %140 {offsets = [0, 18], sizes = [6, 140], strides = [1, 1]} : vector<6x256xf32> to vector<6x140xf32>
    %c9_121 = arith.constant 9 : index
    %c0_122 = arith.constant 0 : index
    %c0_123 = arith.constant 0 : index
    %188 = vector.load %arg5[%c9_121, %c0_122, %c0_123] : memref<25x16x6xf32, #tpu.memory_space<vmem>>, vector<1x16x6xf32>
    %189 = vector.shape_cast %188 : vector<1x16x6xf32> to vector<16x6xf32>
    %cst_124 = arith.constant dense<0.000000e+00> : vector<16x140xf32>
    %190 = tpu.matmul %189, %187, %cst_124 {dimension_numbers = #tpu.dot_dimension_numbers<[1], [0], [0], [1], [0, 0, 1, 1], [], []>} : vector<16x6xf32>, vector<6x140xf32>, vector<16x140xf32> -> vector<16x140xf32>
    %191 = arith.addf %186, %190 : vector<16x140xf32>
    %192 = vector.extract_strided_slice %140 {offsets = [0, 28], sizes = [6, 140], strides = [1, 1]} : vector<6x256xf32> to vector<6x140xf32>
    %c10_125 = arith.constant 10 : index
    %c0_126 = arith.constant 0 : index
    %c0_127 = arith.constant 0 : index
    %193 = vector.load %arg5[%c10_125, %c0_126, %c0_127] : memref<25x16x6xf32, #tpu.memory_space<vmem>>, vector<1x16x6xf32>
    %194 = vector.shape_cast %193 : vector<1x16x6xf32> to vector<16x6xf32>
    %cst_128 = arith.constant dense<0.000000e+00> : vector<16x140xf32>
    %195 = tpu.matmul %194, %192, %cst_128 {dimension_numbers = #tpu.dot_dimension_numbers<[1], [0], [0], [1], [0, 0, 1, 1], [], []>} : vector<16x6xf32>, vector<6x140xf32>, vector<16x140xf32> -> vector<16x140xf32>
    %196 = arith.addf %191, %195 : vector<16x140xf32>
    %197 = vector.extract_strided_slice %140 {offsets = [0, 29], sizes = [6, 140], strides = [1, 1]} : vector<6x256xf32> to vector<6x140xf32>
    %c11_129 = arith.constant 11 : index
    %c0_130 = arith.constant 0 : index
    %c0_131 = arith.constant 0 : index
    %198 = vector.load %arg5[%c11_129, %c0_130, %c0_131] : memref<25x16x6xf32, #tpu.memory_space<vmem>>, vector<1x16x6xf32>
    %199 = vector.shape_cast %198 : vector<1x16x6xf32> to vector<16x6xf32>
    %cst_132 = arith.constant dense<0.000000e+00> : vector<16x140xf32>
    %200 = tpu.matmul %199, %197, %cst_132 {dimension_numbers = #tpu.dot_dimension_numbers<[1], [0], [0], [1], [0, 0, 1, 1], [], []>} : vector<16x6xf32>, vector<6x140xf32>, vector<16x140xf32> -> vector<16x140xf32>
    %201 = arith.addf %196, %200 : vector<16x140xf32>
    %202 = vector.extract_strided_slice %140 {offsets = [0, 30], sizes = [6, 140], strides = [1, 1]} : vector<6x256xf32> to vector<6x140xf32>
    %c12_133 = arith.constant 12 : index
    %c0_134 = arith.constant 0 : index
    %c0_135 = arith.constant 0 : index
    %203 = vector.load %arg5[%c12_133, %c0_134, %c0_135] : memref<25x16x6xf32, #tpu.memory_space<vmem>>, vector<1x16x6xf32>
    %204 = vector.shape_cast %203 : vector<1x16x6xf32> to vector<16x6xf32>
    %cst_136 = arith.constant dense<0.000000e+00> : vector<16x140xf32>
    %205 = tpu.matmul %204, %202, %cst_136 {dimension_numbers = #tpu.dot_dimension_numbers<[1], [0], [0], [1], [0, 0, 1, 1], [], []>} : vector<16x6xf32>, vector<6x140xf32>, vector<16x140xf32> -> vector<16x140xf32>
    %206 = arith.addf %201, %205 : vector<16x140xf32>
    %207 = vector.extract_strided_slice %140 {offsets = [0, 31], sizes = [6, 140], strides = [1, 1]} : vector<6x256xf32> to vector<6x140xf32>
    %c13_137 = arith.constant 13 : index
    %c0_138 = arith.constant 0 : index
    %c0_139 = arith.constant 0 : index
    %208 = vector.load %arg5[%c13_137, %c0_138, %c0_139] : memref<25x16x6xf32, #tpu.memory_space<vmem>>, vector<1x16x6xf32>
    %209 = vector.shape_cast %208 : vector<1x16x6xf32> to vector<16x6xf32>
    %cst_140 = arith.constant dense<0.000000e+00> : vector<16x140xf32>
    %210 = tpu.matmul %209, %207, %cst_140 {dimension_numbers = #tpu.dot_dimension_numbers<[1], [0], [0], [1], [0, 0, 1, 1], [], []>} : vector<16x6xf32>, vector<6x140xf32>, vector<16x140xf32> -> vector<16x140xf32>
    %211 = arith.addf %206, %210 : vector<16x140xf32>
    %212 = vector.extract_strided_slice %140 {offsets = [0, 32], sizes = [6, 140], strides = [1, 1]} : vector<6x256xf32> to vector<6x140xf32>
    %c14_141 = arith.constant 14 : index
    %c0_142 = arith.constant 0 : index
    %c0_143 = arith.constant 0 : index
    %213 = vector.load %arg5[%c14_141, %c0_142, %c0_143] : memref<25x16x6xf32, #tpu.memory_space<vmem>>, vector<1x16x6xf32>
    %214 = vector.shape_cast %213 : vector<1x16x6xf32> to vector<16x6xf32>
    %cst_144 = arith.constant dense<0.000000e+00> : vector<16x140xf32>
    %215 = tpu.matmul %214, %212, %cst_144 {dimension_numbers = #tpu.dot_dimension_numbers<[1], [0], [0], [1], [0, 0, 1, 1], [], []>} : vector<16x6xf32>, vector<6x140xf32>, vector<16x140xf32> -> vector<16x140xf32>
    %216 = arith.addf %211, %215 : vector<16x140xf32>
    %217 = vector.extract_strided_slice %140 {offsets = [0, 42], sizes = [6, 140], strides = [1, 1]} : vector<6x256xf32> to vector<6x140xf32>
    %c15_145 = arith.constant 15 : index
    %c0_146 = arith.constant 0 : index
    %c0_147 = arith.constant 0 : index
    %218 = vector.load %arg5[%c15_145, %c0_146, %c0_147] : memref<25x16x6xf32, #tpu.memory_space<vmem>>, vector<1x16x6xf32>
    %219 = vector.shape_cast %218 : vector<1x16x6xf32> to vector<16x6xf32>
    %cst_148 = arith.constant dense<0.000000e+00> : vector<16x140xf32>
    %220 = tpu.matmul %219, %217, %cst_148 {dimension_numbers = #tpu.dot_dimension_numbers<[1], [0], [0], [1], [0, 0, 1, 1], [], []>} : vector<16x6xf32>, vector<6x140xf32>, vector<16x140xf32> -> vector<16x140xf32>
    %221 = arith.addf %216, %220 : vector<16x140xf32>
    %222 = vector.extract_strided_slice %140 {offsets = [0, 43], sizes = [6, 140], strides = [1, 1]} : vector<6x256xf32> to vector<6x140xf32>
    %c16_149 = arith.constant 16 : index
    %c0_150 = arith.constant 0 : index
    %c0_151 = arith.constant 0 : index
    %223 = vector.load %arg5[%c16_149, %c0_150, %c0_151] : memref<25x16x6xf32, #tpu.memory_space<vmem>>, vector<1x16x6xf32>
    %224 = vector.shape_cast %223 : vector<1x16x6xf32> to vector<16x6xf32>
    %cst_152 = arith.constant dense<0.000000e+00> : vector<16x140xf32>
    %225 = tpu.matmul %224, %222, %cst_152 {dimension_numbers = #tpu.dot_dimension_numbers<[1], [0], [0], [1], [0, 0, 1, 1], [], []>} : vector<16x6xf32>, vector<6x140xf32>, vector<16x140xf32> -> vector<16x140xf32>
    %226 = arith.addf %221, %225 : vector<16x140xf32>
    %227 = vector.extract_strided_slice %140 {offsets = [0, 44], sizes = [6, 140], strides = [1, 1]} : vector<6x256xf32> to vector<6x140xf32>
    %c17_153 = arith.constant 17 : index
    %c0_154 = arith.constant 0 : index
    %c0_155 = arith.constant 0 : index
    %228 = vector.load %arg5[%c17_153, %c0_154, %c0_155] : memref<25x16x6xf32, #tpu.memory_space<vmem>>, vector<1x16x6xf32>
    %229 = vector.shape_cast %228 : vector<1x16x6xf32> to vector<16x6xf32>
    %cst_156 = arith.constant dense<0.000000e+00> : vector<16x140xf32>
    %230 = tpu.matmul %229, %227, %cst_156 {dimension_numbers = #tpu.dot_dimension_numbers<[1], [0], [0], [1], [0, 0, 1, 1], [], []>} : vector<16x6xf32>, vector<6x140xf32>, vector<16x140xf32> -> vector<16x140xf32>
    %231 = arith.addf %226, %230 : vector<16x140xf32>
    %232 = vector.extract_strided_slice %140 {offsets = [0, 45], sizes = [6, 140], strides = [1, 1]} : vector<6x256xf32> to vector<6x140xf32>
    %c18_157 = arith.constant 18 : index
    %c0_158 = arith.constant 0 : index
    %c0_159 = arith.constant 0 : index
    %233 = vector.load %arg5[%c18_157, %c0_158, %c0_159] : memref<25x16x6xf32, #tpu.memory_space<vmem>>, vector<1x16x6xf32>
    %234 = vector.shape_cast %233 : vector<1x16x6xf32> to vector<16x6xf32>
    %cst_160 = arith.constant dense<0.000000e+00> : vector<16x140xf32>
    %235 = tpu.matmul %234, %232, %cst_160 {dimension_numbers = #tpu.dot_dimension_numbers<[1], [0], [0], [1], [0, 0, 1, 1], [], []>} : vector<16x6xf32>, vector<6x140xf32>, vector<16x140xf32> -> vector<16x140xf32>
    %236 = arith.addf %231, %235 : vector<16x140xf32>
    %237 = vector.extract_strided_slice %140 {offsets = [0, 46], sizes = [6, 140], strides = [1, 1]} : vector<6x256xf32> to vector<6x140xf32>
    %c19_161 = arith.constant 19 : index
    %c0_162 = arith.constant 0 : index
    %c0_163 = arith.constant 0 : index
    %238 = vector.load %arg5[%c19_161, %c0_162, %c0_163] : memref<25x16x6xf32, #tpu.memory_space<vmem>>, vector<1x16x6xf32>
    %239 = vector.shape_cast %238 : vector<1x16x6xf32> to vector<16x6xf32>
    %cst_164 = arith.constant dense<0.000000e+00> : vector<16x140xf32>
    %240 = tpu.matmul %239, %237, %cst_164 {dimension_numbers = #tpu.dot_dimension_numbers<[1], [0], [0], [1], [0, 0, 1, 1], [], []>} : vector<16x6xf32>, vector<6x140xf32>, vector<16x140xf32> -> vector<16x140xf32>
    %241 = arith.addf %236, %240 : vector<16x140xf32>
    %242 = vector.extract_strided_slice %140 {offsets = [0, 56], sizes = [6, 140], strides = [1, 1]} : vector<6x256xf32> to vector<6x140xf32>
    %c20_165 = arith.constant 20 : index
    %c0_166 = arith.constant 0 : index
    %c0_167 = arith.constant 0 : index
    %243 = vector.load %arg5[%c20_165, %c0_166, %c0_167] : memref<25x16x6xf32, #tpu.memory_space<vmem>>, vector<1x16x6xf32>
    %244 = vector.shape_cast %243 : vector<1x16x6xf32> to vector<16x6xf32>
    %cst_168 = arith.constant dense<0.000000e+00> : vector<16x140xf32>
    %245 = tpu.matmul %244, %242, %cst_168 {dimension_numbers = #tpu.dot_dimension_numbers<[1], [0], [0], [1], [0, 0, 1, 1], [], []>} : vector<16x6xf32>, vector<6x140xf32>, vector<16x140xf32> -> vector<16x140xf32>
    %246 = arith.addf %241, %245 : vector<16x140xf32>
    %247 = vector.extract_strided_slice %140 {offsets = [0, 57], sizes = [6, 140], strides = [1, 1]} : vector<6x256xf32> to vector<6x140xf32>
    %c21_169 = arith.constant 21 : index
    %c0_170 = arith.constant 0 : index
    %c0_171 = arith.constant 0 : index
    %248 = vector.load %arg5[%c21_169, %c0_170, %c0_171] : memref<25x16x6xf32, #tpu.memory_space<vmem>>, vector<1x16x6xf32>
    %249 = vector.shape_cast %248 : vector<1x16x6xf32> to vector<16x6xf32>
    %cst_172 = arith.constant dense<0.000000e+00> : vector<16x140xf32>
    %250 = tpu.matmul %249, %247, %cst_172 {dimension_numbers = #tpu.dot_dimension_numbers<[1], [0], [0], [1], [0, 0, 1, 1], [], []>} : vector<16x6xf32>, vector<6x140xf32>, vector<16x140xf32> -> vector<16x140xf32>
    %251 = arith.addf %246, %250 : vector<16x140xf32>
    %252 = vector.extract_strided_slice %140 {offsets = [0, 58], sizes = [6, 140], strides = [1, 1]} : vector<6x256xf32> to vector<6x140xf32>
    %c22_173 = arith.constant 22 : index
    %c0_174 = arith.constant 0 : index
    %c0_175 = arith.constant 0 : index
    %253 = vector.load %arg5[%c22_173, %c0_174, %c0_175] : memref<25x16x6xf32, #tpu.memory_space<vmem>>, vector<1x16x6xf32>
    %254 = vector.shape_cast %253 : vector<1x16x6xf32> to vector<16x6xf32>
    %cst_176 = arith.constant dense<0.000000e+00> : vector<16x140xf32>
    %255 = tpu.matmul %254, %252, %cst_176 {dimension_numbers = #tpu.dot_dimension_numbers<[1], [0], [0], [1], [0, 0, 1, 1], [], []>} : vector<16x6xf32>, vector<6x140xf32>, vector<16x140xf32> -> vector<16x140xf32>
    %256 = arith.addf %251, %255 : vector<16x140xf32>
    %257 = vector.extract_strided_slice %140 {offsets = [0, 59], sizes = [6, 140], strides = [1, 1]} : vector<6x256xf32> to vector<6x140xf32>
    %c23_177 = arith.constant 23 : index
    %c0_178 = arith.constant 0 : index
    %c0_179 = arith.constant 0 : index
    %258 = vector.load %arg5[%c23_177, %c0_178, %c0_179] : memref<25x16x6xf32, #tpu.memory_space<vmem>>, vector<1x16x6xf32>
    %259 = vector.shape_cast %258 : vector<1x16x6xf32> to vector<16x6xf32>
    %cst_180 = arith.constant dense<0.000000e+00> : vector<16x140xf32>
    %260 = tpu.matmul %259, %257, %cst_180 {dimension_numbers = #tpu.dot_dimension_numbers<[1], [0], [0], [1], [0, 0, 1, 1], [], []>} : vector<16x6xf32>, vector<6x140xf32>, vector<16x140xf32> -> vector<16x140xf32>
    %261 = arith.addf %256, %260 : vector<16x140xf32>
    %262 = vector.extract_strided_slice %140 {offsets = [0, 60], sizes = [6, 140], strides = [1, 1]} : vector<6x256xf32> to vector<6x140xf32>
    %c24_181 = arith.constant 24 : index
    %c0_182 = arith.constant 0 : index
    %c0_183 = arith.constant 0 : index
    %263 = vector.load %arg5[%c24_181, %c0_182, %c0_183] : memref<25x16x6xf32, #tpu.memory_space<vmem>>, vector<1x16x6xf32>
    %264 = vector.shape_cast %263 : vector<1x16x6xf32> to vector<16x6xf32>
    %cst_184 = arith.constant dense<0.000000e+00> : vector<16x140xf32>
    %265 = tpu.matmul %264, %262, %cst_184 {dimension_numbers = #tpu.dot_dimension_numbers<[1], [0], [0], [1], [0, 0, 1, 1], [], []>} : vector<16x6xf32>, vector<6x140xf32>, vector<16x140xf32> -> vector<16x140xf32>
    %266 = arith.addf %261, %265 : vector<16x140xf32>
    %c0_185 = arith.constant 0 : index
    %c0_186 = arith.constant 0 : index
    %267 = vector.load %arg6[%c0_185, %c0_186] : memref<16x1xf32, #tpu.memory_space<vmem>>, vector<16x1xf32>
    %268 = vector.broadcast %267 : vector<16x1xf32> to vector<16x140xf32>
    %269 = arith.addf %266, %268 : vector<16x140xf32>
    %cst_187 = arith.constant 0.000000e+00 : f32
    %270 = vector.broadcast %cst_187 : f32 to vector<16x140xf32>
    %271 = arith.maximumf %269, %270 : vector<16x140xf32>
    %272 = vector.extract_strided_slice %271 {offsets = [0, 0], sizes = [16, 139], strides = [1, 1]} : vector<16x140xf32> to vector<16x139xf32>
    %273 = vector.extract_strided_slice %271 {offsets = [0, 1], sizes = [16, 139], strides = [1, 1]} : vector<16x140xf32> to vector<16x139xf32>
    %274 = arith.maximumf %272, %273 : vector<16x139xf32>
    %275 = vector.extract_strided_slice %274 {offsets = [0, 0], sizes = [16, 125], strides = [1, 1]} : vector<16x139xf32> to vector<16x125xf32>
    %276 = vector.extract_strided_slice %274 {offsets = [0, 14], sizes = [16, 125], strides = [1, 1]} : vector<16x139xf32> to vector<16x125xf32>
    %277 = arith.maximumf %275, %276 : vector<16x125xf32>
    %c0_188 = arith.constant 0 : index
    %c0_189 = arith.constant 0 : index
    %278 = vector.load %arg7[%c0_188, %c0_189] : memref<125x25xf32, #tpu.memory_space<vmem>>, vector<125x25xf32>
    %cst_190 = arith.constant dense<0.000000e+00> : vector<16x25xf32>
    %279 = tpu.matmul %277, %278, %cst_190 {dimension_numbers = #tpu.dot_dimension_numbers<[1], [0], [0], [1], [0, 0, 1, 1], [], []>} : vector<16x125xf32>, vector<125x25xf32>, vector<16x25xf32> -> vector<16x25xf32>
    %c0_191 = arith.constant 0 : index
    %c0_192 = arith.constant 0 : index
    %280 = vector.load %arg9[%c0_191, %c0_192] : memref<1x120xf32, #tpu.memory_space<vmem>>, vector<1x120xf32>
    %281 = vector.extract_strided_slice %279 {offsets = [0, 0], sizes = [1, 25], strides = [1, 1]} : vector<16x25xf32> to vector<1x25xf32>
    %c0_193 = arith.constant 0 : index
    %c0_194 = arith.constant 0 : index
    %c0_195 = arith.constant 0 : index
    %282 = vector.load %arg8[%c0_193, %c0_194, %c0_195] : memref<16x25x120xf32, #tpu.memory_space<vmem>>, vector<1x25x120xf32>
    %283 = vector.shape_cast %282 : vector<1x25x120xf32> to vector<25x120xf32>
    %cst_196 = arith.constant dense<0.000000e+00> : vector<1x120xf32>
    %284 = tpu.matmul %281, %283, %cst_196 {dimension_numbers = #tpu.dot_dimension_numbers<[1], [0], [0], [1], [0, 0, 1, 1], [], []>} : vector<1x25xf32>, vector<25x120xf32>, vector<1x120xf32> -> vector<1x120xf32>
    %285 = arith.addf %280, %284 : vector<1x120xf32>
    %286 = vector.extract_strided_slice %279 {offsets = [1, 0], sizes = [1, 25], strides = [1, 1]} : vector<16x25xf32> to vector<1x25xf32>
    %c1_197 = arith.constant 1 : index
    %c0_198 = arith.constant 0 : index
    %c0_199 = arith.constant 0 : index
    %287 = vector.load %arg8[%c1_197, %c0_198, %c0_199] : memref<16x25x120xf32, #tpu.memory_space<vmem>>, vector<1x25x120xf32>
    %288 = vector.shape_cast %287 : vector<1x25x120xf32> to vector<25x120xf32>
    %cst_200 = arith.constant dense<0.000000e+00> : vector<1x120xf32>
    %289 = tpu.matmul %286, %288, %cst_200 {dimension_numbers = #tpu.dot_dimension_numbers<[1], [0], [0], [1], [0, 0, 1, 1], [], []>} : vector<1x25xf32>, vector<25x120xf32>, vector<1x120xf32> -> vector<1x120xf32>
    %290 = arith.addf %285, %289 : vector<1x120xf32>
    %291 = vector.extract_strided_slice %279 {offsets = [2, 0], sizes = [1, 25], strides = [1, 1]} : vector<16x25xf32> to vector<1x25xf32>
    %c2_201 = arith.constant 2 : index
    %c0_202 = arith.constant 0 : index
    %c0_203 = arith.constant 0 : index
    %292 = vector.load %arg8[%c2_201, %c0_202, %c0_203] : memref<16x25x120xf32, #tpu.memory_space<vmem>>, vector<1x25x120xf32>
    %293 = vector.shape_cast %292 : vector<1x25x120xf32> to vector<25x120xf32>
    %cst_204 = arith.constant dense<0.000000e+00> : vector<1x120xf32>
    %294 = tpu.matmul %291, %293, %cst_204 {dimension_numbers = #tpu.dot_dimension_numbers<[1], [0], [0], [1], [0, 0, 1, 1], [], []>} : vector<1x25xf32>, vector<25x120xf32>, vector<1x120xf32> -> vector<1x120xf32>
    %295 = arith.addf %290, %294 : vector<1x120xf32>
    %296 = vector.extract_strided_slice %279 {offsets = [3, 0], sizes = [1, 25], strides = [1, 1]} : vector<16x25xf32> to vector<1x25xf32>
    %c3_205 = arith.constant 3 : index
    %c0_206 = arith.constant 0 : index
    %c0_207 = arith.constant 0 : index
    %297 = vector.load %arg8[%c3_205, %c0_206, %c0_207] : memref<16x25x120xf32, #tpu.memory_space<vmem>>, vector<1x25x120xf32>
    %298 = vector.shape_cast %297 : vector<1x25x120xf32> to vector<25x120xf32>
    %cst_208 = arith.constant dense<0.000000e+00> : vector<1x120xf32>
    %299 = tpu.matmul %296, %298, %cst_208 {dimension_numbers = #tpu.dot_dimension_numbers<[1], [0], [0], [1], [0, 0, 1, 1], [], []>} : vector<1x25xf32>, vector<25x120xf32>, vector<1x120xf32> -> vector<1x120xf32>
    %300 = arith.addf %295, %299 : vector<1x120xf32>
    %301 = vector.extract_strided_slice %279 {offsets = [4, 0], sizes = [1, 25], strides = [1, 1]} : vector<16x25xf32> to vector<1x25xf32>
    %c4_209 = arith.constant 4 : index
    %c0_210 = arith.constant 0 : index
    %c0_211 = arith.constant 0 : index
    %302 = vector.load %arg8[%c4_209, %c0_210, %c0_211] : memref<16x25x120xf32, #tpu.memory_space<vmem>>, vector<1x25x120xf32>
    %303 = vector.shape_cast %302 : vector<1x25x120xf32> to vector<25x120xf32>
    %cst_212 = arith.constant dense<0.000000e+00> : vector<1x120xf32>
    %304 = tpu.matmul %301, %303, %cst_212 {dimension_numbers = #tpu.dot_dimension_numbers<[1], [0], [0], [1], [0, 0, 1, 1], [], []>} : vector<1x25xf32>, vector<25x120xf32>, vector<1x120xf32> -> vector<1x120xf32>
    %305 = arith.addf %300, %304 : vector<1x120xf32>
    %306 = vector.extract_strided_slice %279 {offsets = [5, 0], sizes = [1, 25], strides = [1, 1]} : vector<16x25xf32> to vector<1x25xf32>
    %c5_213 = arith.constant 5 : index
    %c0_214 = arith.constant 0 : index
    %c0_215 = arith.constant 0 : index
    %307 = vector.load %arg8[%c5_213, %c0_214, %c0_215] : memref<16x25x120xf32, #tpu.memory_space<vmem>>, vector<1x25x120xf32>
    %308 = vector.shape_cast %307 : vector<1x25x120xf32> to vector<25x120xf32>
    %cst_216 = arith.constant dense<0.000000e+00> : vector<1x120xf32>
    %309 = tpu.matmul %306, %308, %cst_216 {dimension_numbers = #tpu.dot_dimension_numbers<[1], [0], [0], [1], [0, 0, 1, 1], [], []>} : vector<1x25xf32>, vector<25x120xf32>, vector<1x120xf32> -> vector<1x120xf32>
    %310 = arith.addf %305, %309 : vector<1x120xf32>
    %311 = vector.extract_strided_slice %279 {offsets = [6, 0], sizes = [1, 25], strides = [1, 1]} : vector<16x25xf32> to vector<1x25xf32>
    %c6_217 = arith.constant 6 : index
    %c0_218 = arith.constant 0 : index
    %c0_219 = arith.constant 0 : index
    %312 = vector.load %arg8[%c6_217, %c0_218, %c0_219] : memref<16x25x120xf32, #tpu.memory_space<vmem>>, vector<1x25x120xf32>
    %313 = vector.shape_cast %312 : vector<1x25x120xf32> to vector<25x120xf32>
    %cst_220 = arith.constant dense<0.000000e+00> : vector<1x120xf32>
    %314 = tpu.matmul %311, %313, %cst_220 {dimension_numbers = #tpu.dot_dimension_numbers<[1], [0], [0], [1], [0, 0, 1, 1], [], []>} : vector<1x25xf32>, vector<25x120xf32>, vector<1x120xf32> -> vector<1x120xf32>
    %315 = arith.addf %310, %314 : vector<1x120xf32>
    %316 = vector.extract_strided_slice %279 {offsets = [7, 0], sizes = [1, 25], strides = [1, 1]} : vector<16x25xf32> to vector<1x25xf32>
    %c7_221 = arith.constant 7 : index
    %c0_222 = arith.constant 0 : index
    %c0_223 = arith.constant 0 : index
    %317 = vector.load %arg8[%c7_221, %c0_222, %c0_223] : memref<16x25x120xf32, #tpu.memory_space<vmem>>, vector<1x25x120xf32>
    %318 = vector.shape_cast %317 : vector<1x25x120xf32> to vector<25x120xf32>
    %cst_224 = arith.constant dense<0.000000e+00> : vector<1x120xf32>
    %319 = tpu.matmul %316, %318, %cst_224 {dimension_numbers = #tpu.dot_dimension_numbers<[1], [0], [0], [1], [0, 0, 1, 1], [], []>} : vector<1x25xf32>, vector<25x120xf32>, vector<1x120xf32> -> vector<1x120xf32>
    %320 = arith.addf %315, %319 : vector<1x120xf32>
    %321 = vector.extract_strided_slice %279 {offsets = [8, 0], sizes = [1, 25], strides = [1, 1]} : vector<16x25xf32> to vector<1x25xf32>
    %c8_225 = arith.constant 8 : index
    %c0_226 = arith.constant 0 : index
    %c0_227 = arith.constant 0 : index
    %322 = vector.load %arg8[%c8_225, %c0_226, %c0_227] : memref<16x25x120xf32, #tpu.memory_space<vmem>>, vector<1x25x120xf32>
    %323 = vector.shape_cast %322 : vector<1x25x120xf32> to vector<25x120xf32>
    %cst_228 = arith.constant dense<0.000000e+00> : vector<1x120xf32>
    %324 = tpu.matmul %321, %323, %cst_228 {dimension_numbers = #tpu.dot_dimension_numbers<[1], [0], [0], [1], [0, 0, 1, 1], [], []>} : vector<1x25xf32>, vector<25x120xf32>, vector<1x120xf32> -> vector<1x120xf32>
    %325 = arith.addf %320, %324 : vector<1x120xf32>
    %326 = vector.extract_strided_slice %279 {offsets = [9, 0], sizes = [1, 25], strides = [1, 1]} : vector<16x25xf32> to vector<1x25xf32>
    %c9_229 = arith.constant 9 : index
    %c0_230 = arith.constant 0 : index
    %c0_231 = arith.constant 0 : index
    %327 = vector.load %arg8[%c9_229, %c0_230, %c0_231] : memref<16x25x120xf32, #tpu.memory_space<vmem>>, vector<1x25x120xf32>
    %328 = vector.shape_cast %327 : vector<1x25x120xf32> to vector<25x120xf32>
    %cst_232 = arith.constant dense<0.000000e+00> : vector<1x120xf32>
    %329 = tpu.matmul %326, %328, %cst_232 {dimension_numbers = #tpu.dot_dimension_numbers<[1], [0], [0], [1], [0, 0, 1, 1], [], []>} : vector<1x25xf32>, vector<25x120xf32>, vector<1x120xf32> -> vector<1x120xf32>
    %330 = arith.addf %325, %329 : vector<1x120xf32>
    %331 = vector.extract_strided_slice %279 {offsets = [10, 0], sizes = [1, 25], strides = [1, 1]} : vector<16x25xf32> to vector<1x25xf32>
    %c10_233 = arith.constant 10 : index
    %c0_234 = arith.constant 0 : index
    %c0_235 = arith.constant 0 : index
    %332 = vector.load %arg8[%c10_233, %c0_234, %c0_235] : memref<16x25x120xf32, #tpu.memory_space<vmem>>, vector<1x25x120xf32>
    %333 = vector.shape_cast %332 : vector<1x25x120xf32> to vector<25x120xf32>
    %cst_236 = arith.constant dense<0.000000e+00> : vector<1x120xf32>
    %334 = tpu.matmul %331, %333, %cst_236 {dimension_numbers = #tpu.dot_dimension_numbers<[1], [0], [0], [1], [0, 0, 1, 1], [], []>} : vector<1x25xf32>, vector<25x120xf32>, vector<1x120xf32> -> vector<1x120xf32>
    %335 = arith.addf %330, %334 : vector<1x120xf32>
    %336 = vector.extract_strided_slice %279 {offsets = [11, 0], sizes = [1, 25], strides = [1, 1]} : vector<16x25xf32> to vector<1x25xf32>
    %c11_237 = arith.constant 11 : index
    %c0_238 = arith.constant 0 : index
    %c0_239 = arith.constant 0 : index
    %337 = vector.load %arg8[%c11_237, %c0_238, %c0_239] : memref<16x25x120xf32, #tpu.memory_space<vmem>>, vector<1x25x120xf32>
    %338 = vector.shape_cast %337 : vector<1x25x120xf32> to vector<25x120xf32>
    %cst_240 = arith.constant dense<0.000000e+00> : vector<1x120xf32>
    %339 = tpu.matmul %336, %338, %cst_240 {dimension_numbers = #tpu.dot_dimension_numbers<[1], [0], [0], [1], [0, 0, 1, 1], [], []>} : vector<1x25xf32>, vector<25x120xf32>, vector<1x120xf32> -> vector<1x120xf32>
    %340 = arith.addf %335, %339 : vector<1x120xf32>
    %341 = vector.extract_strided_slice %279 {offsets = [12, 0], sizes = [1, 25], strides = [1, 1]} : vector<16x25xf32> to vector<1x25xf32>
    %c12_241 = arith.constant 12 : index
    %c0_242 = arith.constant 0 : index
    %c0_243 = arith.constant 0 : index
    %342 = vector.load %arg8[%c12_241, %c0_242, %c0_243] : memref<16x25x120xf32, #tpu.memory_space<vmem>>, vector<1x25x120xf32>
    %343 = vector.shape_cast %342 : vector<1x25x120xf32> to vector<25x120xf32>
    %cst_244 = arith.constant dense<0.000000e+00> : vector<1x120xf32>
    %344 = tpu.matmul %341, %343, %cst_244 {dimension_numbers = #tpu.dot_dimension_numbers<[1], [0], [0], [1], [0, 0, 1, 1], [], []>} : vector<1x25xf32>, vector<25x120xf32>, vector<1x120xf32> -> vector<1x120xf32>
    %345 = arith.addf %340, %344 : vector<1x120xf32>
    %346 = vector.extract_strided_slice %279 {offsets = [13, 0], sizes = [1, 25], strides = [1, 1]} : vector<16x25xf32> to vector<1x25xf32>
    %c13_245 = arith.constant 13 : index
    %c0_246 = arith.constant 0 : index
    %c0_247 = arith.constant 0 : index
    %347 = vector.load %arg8[%c13_245, %c0_246, %c0_247] : memref<16x25x120xf32, #tpu.memory_space<vmem>>, vector<1x25x120xf32>
    %348 = vector.shape_cast %347 : vector<1x25x120xf32> to vector<25x120xf32>
    %cst_248 = arith.constant dense<0.000000e+00> : vector<1x120xf32>
    %349 = tpu.matmul %346, %348, %cst_248 {dimension_numbers = #tpu.dot_dimension_numbers<[1], [0], [0], [1], [0, 0, 1, 1], [], []>} : vector<1x25xf32>, vector<25x120xf32>, vector<1x120xf32> -> vector<1x120xf32>
    %350 = arith.addf %345, %349 : vector<1x120xf32>
    %351 = vector.extract_strided_slice %279 {offsets = [14, 0], sizes = [1, 25], strides = [1, 1]} : vector<16x25xf32> to vector<1x25xf32>
    %c14_249 = arith.constant 14 : index
    %c0_250 = arith.constant 0 : index
    %c0_251 = arith.constant 0 : index
    %352 = vector.load %arg8[%c14_249, %c0_250, %c0_251] : memref<16x25x120xf32, #tpu.memory_space<vmem>>, vector<1x25x120xf32>
    %353 = vector.shape_cast %352 : vector<1x25x120xf32> to vector<25x120xf32>
    %cst_252 = arith.constant dense<0.000000e+00> : vector<1x120xf32>
    %354 = tpu.matmul %351, %353, %cst_252 {dimension_numbers = #tpu.dot_dimension_numbers<[1], [0], [0], [1], [0, 0, 1, 1], [], []>} : vector<1x25xf32>, vector<25x120xf32>, vector<1x120xf32> -> vector<1x120xf32>
    %355 = arith.addf %350, %354 : vector<1x120xf32>
    %356 = vector.extract_strided_slice %279 {offsets = [15, 0], sizes = [1, 25], strides = [1, 1]} : vector<16x25xf32> to vector<1x25xf32>
    %c15_253 = arith.constant 15 : index
    %c0_254 = arith.constant 0 : index
    %c0_255 = arith.constant 0 : index
    %357 = vector.load %arg8[%c15_253, %c0_254, %c0_255] : memref<16x25x120xf32, #tpu.memory_space<vmem>>, vector<1x25x120xf32>
    %358 = vector.shape_cast %357 : vector<1x25x120xf32> to vector<25x120xf32>
    %cst_256 = arith.constant dense<0.000000e+00> : vector<1x120xf32>
    %359 = tpu.matmul %356, %358, %cst_256 {dimension_numbers = #tpu.dot_dimension_numbers<[1], [0], [0], [1], [0, 0, 1, 1], [], []>} : vector<1x25xf32>, vector<25x120xf32>, vector<1x120xf32> -> vector<1x120xf32>
    %360 = arith.addf %355, %359 : vector<1x120xf32>
    %cst_257 = arith.constant 0.000000e+00 : f32
    %361 = vector.broadcast %cst_257 : f32 to vector<1x120xf32>
    %362 = arith.maximumf %360, %361 : vector<1x120xf32>
    %c0_258 = arith.constant 0 : index
    %c0_259 = arith.constant 0 : index
    %363 = vector.load %arg10[%c0_258, %c0_259] : memref<120x84xf32, #tpu.memory_space<vmem>>, vector<120x84xf32>
    %cst_260 = arith.constant dense<0.000000e+00> : vector<1x84xf32>
    %364 = tpu.matmul %362, %363, %cst_260 {dimension_numbers = #tpu.dot_dimension_numbers<[1], [0], [0], [1], [0, 0, 1, 1], [], []>} : vector<1x120xf32>, vector<120x84xf32>, vector<1x84xf32> -> vector<1x84xf32>
    %c0_261 = arith.constant 0 : index
    %c0_262 = arith.constant 0 : index
    %365 = vector.load %arg11[%c0_261, %c0_262] : memref<1x84xf32, #tpu.memory_space<vmem>>, vector<1x84xf32>
    %366 = arith.addf %364, %365 : vector<1x84xf32>
    %cst_263 = arith.constant 0.000000e+00 : f32
    %367 = vector.broadcast %cst_263 : f32 to vector<1x84xf32>
    %368 = arith.maximumf %366, %367 : vector<1x84xf32>
    %c0_264 = arith.constant 0 : index
    %c0_265 = arith.constant 0 : index
    %369 = vector.load %arg12[%c0_264, %c0_265] : memref<84x10xf32, #tpu.memory_space<vmem>>, vector<84x10xf32>
    %cst_266 = arith.constant dense<0.000000e+00> : vector<1x10xf32>
    %370 = tpu.matmul %368, %369, %cst_266 {dimension_numbers = #tpu.dot_dimension_numbers<[1], [0], [0], [1], [0, 0, 1, 1], [], []>} : vector<1x84xf32>, vector<84x10xf32>, vector<1x10xf32> -> vector<1x10xf32>
    %c0_267 = arith.constant 0 : index
    %c0_268 = arith.constant 0 : index
    %371 = vector.load %arg13[%c0_267, %c0_268] : memref<1x10xf32, #tpu.memory_space<vmem>>, vector<1x10xf32>
    %372 = arith.addf %370, %371 : vector<1x10xf32>
    %c0_269 = arith.constant 0 : index
    %c0_270 = arith.constant 0 : index
    %c0_271 = arith.constant 0 : index
    %373 = vector.load %arg14[%c0_269, %c0_270, %c0_271] : memref<1x1x10xf32, #tpu.memory_space<vmem>>, vector<1x1x10xf32>
    %374 = vector.shape_cast %373 : vector<1x1x10xf32> to vector<1x10xf32>
    %375 = vector.shape_cast %372 : vector<1x10xf32> to vector<1x1x10xf32>
    tpu.vector_store %arg14[%c0_269, %c0_270, %c0_271], %375 {strides = array<i32>} : memref<1x1x10xf32, #tpu.memory_space<vmem>>, vector<1x1x10xf32>,
    return
  }
  func.func @transform_0(%arg0: i32) -> (i32, i32, i32) {
    %c0_i32 = arith.constant 0 : i32
    %c0_i32_0 = arith.constant 0 : i32
    %c0_i32_1 = arith.constant 0 : i32
    return %arg0, %c0_i32, %c0_i32_0 : i32, i32, i32
  }
  func.func @transform_1(%arg0: i32) -> (i32, i32, i32) {
    %c0_i32 = arith.constant 0 : i32
    %c0_i32_0 = arith.constant 0 : i32
    %c0_i32_1 = arith.constant 0 : i32
    %c0_i32_2 = arith.constant 0 : i32
    return %c0_i32, %c0_i32_0, %c0_i32_1 : i32, i32, i32
  }
  func.func @transform_2(%arg0: i32) -> (i32, i32) {
    %c0_i32 = arith.constant 0 : i32
    %c0_i32_0 = arith.constant 0 : i32
    %c0_i32_1 = arith.constant 0 : i32
    return %c0_i32, %c0_i32_0 : i32, i32
  }
  func.func @transform_3(%arg0: i32) -> (i32, i32) {
    %c0_i32 = arith.constant 0 : i32
    %c0_i32_0 = arith.constant 0 : i32
    %c0_i32_1 = arith.constant 0 : i32
    return %c0_i32, %c0_i32_0 : i32, i32
  }
  func.func @transform_4(%arg0: i32) -> (i32, i32, i32) {
    %c0_i32 = arith.constant 0 : i32
    %c0_i32_0 = arith.constant 0 : i32
    %c0_i32_1 = arith.constant 0 : i32
    %c0_i32_2 = arith.constant 0 : i32
    return %c0_i32, %c0_i32_0, %c0_i32_1 : i32, i32, i32
  }
  func.func @transform_5(%arg0: i32) -> (i32, i32) {
    %c0_i32 = arith.constant 0 : i32
    %c0_i32_0 = arith.constant 0 : i32
    %c0_i32_1 = arith.constant 0 : i32
    return %c0_i32, %c0_i32_0 : i32, i32
  }
  func.func @transform_6(%arg0: i32) -> (i32, i32) {
    %c0_i32 = arith.constant 0 : i32
    %c0_i32_0 = arith.constant 0 : i32
    %c0_i32_1 = arith.constant 0 : i32
    return %c0_i32, %c0_i32_0 : i32, i32
  }
  func.func @transform_7(%arg0: i32) -> (i32, i32, i32) {
    %c0_i32 = arith.constant 0 : i32
    %c0_i32_0 = arith.constant 0 : i32
    %c0_i32_1 = arith.constant 0 : i32
    %c0_i32_2 = arith.constant 0 : i32
    return %c0_i32, %c0_i32_0, %c0_i32_1 : i32, i32, i32
  }
  func.func @transform_8(%arg0: i32) -> (i32, i32) {
    %c0_i32 = arith.constant 0 : i32
    %c0_i32_0 = arith.constant 0 : i32
    %c0_i32_1 = arith.constant 0 : i32
    return %c0_i32, %c0_i32_0 : i32, i32
  }
  func.func @transform_9(%arg0: i32) -> (i32, i32) {
    %c0_i32 = arith.constant 0 : i32
    %c0_i32_0 = arith.constant 0 : i32
    %c0_i32_1 = arith.constant 0 : i32
    return %c0_i32, %c0_i32_0 : i32, i32
  }
  func.func @transform_10(%arg0: i32) -> (i32, i32) {
    %c0_i32 = arith.constant 0 : i32
    %c0_i32_0 = arith.constant 0 : i32
    %c0_i32_1 = arith.constant 0 : i32
    return %c0_i32, %c0_i32_0 : i32, i32
  }
  func.func @transform_11(%arg0: i32) -> (i32, i32) {
    %c0_i32 = arith.constant 0 : i32
    %c0_i32_0 = arith.constant 0 : i32
    %c0_i32_1 = arith.constant 0 : i32
    return %c0_i32, %c0_i32_0 : i32, i32
  }
  func.func @transform_12(%arg0: i32) -> (i32, i32) {
    %c0_i32 = arith.constant 0 : i32
    %c0_i32_0 = arith.constant 0 : i32
    %c0_i32_1 = arith.constant 0 : i32
    return %c0_i32, %c0_i32_0 : i32, i32
  }
  func.func @transform_13(%arg0: i32) -> (i32, i32, i32) {
    %c0_i32 = arith.constant 0 : i32
    %c0_i32_0 = arith.constant 0 : i32
    %c0_i32_1 = arith.constant 0 : i32
    return %arg0, %c0_i32, %c0_i32_0 : i32, i32, i32
  }
}

</mosaic_0001>

<bundles_post_ra>
// kernel: net_forward.1
= control target key start
LH: loop header
LB: loop body
LE: loop exit
PB: predicated region body
PF: predicated region fallthrough
CT: control target
= control target key end

     0   :  { %s17942_s0 = inlined_call_operand.vmem [shape: f32[4,3,1152], index: 0, kind: input, shape index: {}]   ;;  %s17943_s1 = inlined_call_operand.vmem [shape: f32[25,6,3], index: 1, kind: input, shape index: {}]   ;;  %s17944_s2 = inlined_call_operand.vmem [shape: f32[6,1], index: 2, kind: input, shape index: {}]   ;;  %s17945_s3 = inlined_call_operand.vmem [shape: f32[863,256], index: 3, kind: input, shape index: {}]   ;;  %s17946_s4 = inlined_call_operand.vmem [shape: f32[25,16,6], index: 4, kind: input, shape index: {}]   ;;  %s17947_s5 = inlined_call_operand.vmem [shape: f32[16,1], index: 5, kind: input, shape index: {}]   ;;  %s17948_s6 = inlined_call_operand.vmem [shape: f32[125,25], index: 6, kind: input, shape index: {}]   ;;  %s17949_s7 = inlined_call_operand.vmem [shape: f32[16,25,120], index: 7, kind: input, shape index: {}]   ;;  %s17950_s8 = inlined_call_operand.vmem [shape: f32[1,120], index: 8, kind: input, shape index: {}]   ;;  %s17951_s9 = inlined_call_operand.vmem [shape: f32[120,84], index: 9, kind: input, shape index: {}]   ;;  %s17952_s10 = inlined_call_operand.vmem [shape: f32[1,84], index: 10, kind: input, shape index: {}]   ;;  %s17953_s11 = inlined_call_operand.vmem [shape: f32[84,10], index: 11, kind: input, shape index: {}]   ;;  %s17954_s12 = inlined_call_operand.vmem [shape: f32[1,10], index: 12, kind: input, shape index: {}]   ;;  %s17955_s13 = inlined_call_operand.hbm [shape: f32[4,1,10], index: 13, kind: output, shape index: {}]  }
   0x1   :  { %17968 = sst [smem:[#allocation18_spill]] %s17942_s0 }
   0x2   :  { %17969 = sst [smem:[#allocation19_spill]] %s17943_s1 }
   0x3   :  { %17970 = sst [smem:[#allocation20_spill]] %s17944_s2 }
   0x4   :  { %18 = vsyncpa [#allocation3], 0 }
   0x5   :  { %20 = vsyncpa [#allocation3 + $0x1], 0  ;;  %s14810_s25 = smov 0   ;;  %s14812_s26 = smov 0  }
   0x6   :  { %s14814_s27 = smov 0   ;;  %s14816_s28 = smov 0  }
   0x7 LB: > { %s14831_s29 = sadd.s32 4294967295, %s14696_s28   ;;  %s13394_s30 = sadd.s32 4294967294, %s14696_s28   ;;  %s14696_s28 = sphi %s14816_s28, %s18011_s28   ;;  %s14692_s27 = sphi %s14814_s27, %s18010_s27   ;;  %s14688_s26 = sphi %s14812_s26, %s18009_s26   ;;  %s14684_s25 = sphi %s14810_s25, %s18008_s25  }
   0x8   : > { %s14835_s14 = sadd.s32 1, %s14696_s28   ;;  %s311_s15 = sadd.s32 1, %s14692_s27 }
   0x9   : > { %s308_s16 = ssub.s32 %s14696_s28, %s14835_s14  ;;  %p321_p0 = scmp.ne.s32.totalorder %s14692_s27, %s14688_s26 }
   0xa   : > { %p309_p1 = scmp.eq.s32.totalorder %s308_s16, 0  ;;  %p322_p2 = scmp.eq.s32.totalorder %s14831_s29, 3 }
   0xb   : > { %p327_p3 = scmp.ne.s32.totalorder %s14688_s26, %s14684_s25  ;;  %p328_p4 = scmp.eq.s32.totalorder %s13394_s30, 3 }
   0xc   : > { %s14846_s17 = scalar_select %p309_p1, %s14692_s27, %s311_s15  }
   0xd   : > { %p14848_p5 = por %p322_p2, %p321_p0  ;;  %p14852_p6 = por %p328_p4, %p327_p3 }
   0xe   : > { %17971 = sst [smem:[#allocation5_spill]] %s14846_s17  ;;  %p13397_p7 = scmp.ge.s32.totalorder %s14696_s28, 1 }
   0xf   : > { %p390_p8 = scmp.lt.s32.totalorder %s14696_s28, 5 }
  0x11   : > { %p391_p9 = pnand %p13397_p7, %p390_p8 }
  0x13   : > { %394 = sbr.rel (%p391_p9) target bundleno = 2808 (0xaf8), region = 72 }
  0x18   : > { %p433_p10 = scmp.lt.s32.totalorder %s14831_s29, 3  ;;  %s17974_s0 = sld [smem:[#allocation18_spill]]  ;;  %v17958_v0 = vmov 0.0   ;;  %vm470_vm0 = vcmask 1039360   ;;  %vm482_vm1 = vcmask 1042432   ;;  %vm478_vm2 = vcmask 23552  }
  0x19   : > { %561 = vmatprep.mubr.f32.mxu1 %v17958_v0  ;;  %703 = vmatprep.mubr.f32.mxu0 %v17958_v0  ;;  %s17966_s30 = smov 127   ;;  %s17964_s15 = smov 126   ;;  %vm14708_vm3 = vmmov 0   ;;  %vm1098_vm4 = vcmask 1031168   ;;  %vm1431_vm5 = vcmask 1022976   ;;  %vm1764_vm6 = vcmask 1014784  }
  0x1a   : > { %s434_s20 = scalar_select %p433_p10, %s14831_s29, 3  ;;  %vm2097_vm7 = vcmask 785408   ;;  %vm2430_vm8 = vcmask 777216   ;;  %vm2763_vm9 = vcmask 769024   ;;  %vm3096_vm10 = vcmask 760832  }
  0x1b   : > { %s17962_s16 = smov 125   ;;  %s14704_s22 = smov 95   ;;  %vm3429_vm11 = vcmask 752640   ;;  %vm3762_vm12 = vcmask 523264   ;;  %vm4095_vm13 = vcmask 515072   ;;  %vm4428_vm14 = vcmask 506880  }
  0x1c   : > { %s14520_s21 = smul.u32 36, %s434_s20  ;;  %s17960_s20 = smov 124   ;;  %vm4761_vm15 = vcmask 498688  }
  0x1d   : > { %s14705_s23 = smov 94   ;;  %s17975_s1 = sld [smem:[#allocation19_spill]] }
  0x1e   : > { %s14863_s24 = scalar_lea.vmem %s17974_s0, %s14520_s21  ;;  %s17956_s21 = smov 96  }
  0x1f   : > { %v14868_v1 = vld [vmem:[%s14863_s24 + $0x8] sm:$0x77]  ;;  %v14871_v2 = vld [vmem:[%s14863_s24] sm:$0x77]  ;;  %v14882_v4 = vld [vmem:[%s14863_s24 + $0x10] sm:$0x77] }
  0x20   : > { %458 = vrot.lane.b32.xlu0 %v14868_v1, %s17966_s30  ;;  %454 = vrot.lane.b32.xlu1 %v14871_v2, %s17966_s30  ;;  %v14879_v3 = vcombine.high %v14868_v1, %v14868_v1  ;;  %v14890_v5 = vcombine.high %v14882_v4, %v14882_v4  ;;  %v14894_v6 = vcombine.high %v14871_v2, %v14871_v2  ;;  %v14897_v7 = vld [vmem:[%s14863_s24 + $0x18] sm:$0x77]  ;;  %s17988_s2 = sld [smem:[#allocation20_spill]]  ;;  %s18005_s17 = smov 125  }
  0x21   : > { %v14905_v8 = vcombine.high %v14897_v7, %v14897_v7  ;;  %s14720_s0 = smov 114  }
  0x23   : > { %v13399_v17 = vld [vmem:[%s17975_s1 + $0x8] sm:$0x3f]  ;;  %v443_v28 = vld [vmem:[%s17975_s1] sm:$0x3f]  ;;  %v13422_v39 = vld [vmem:[%s17975_s1 + $0x10] sm:$0x3f] }
  0x24   : > { %462 = vrot.lane.b32.xlu0 %v14882_v4, %s17966_s30  ;;  %460 = vrot.lane.b32.xlu1 %v14879_v3, %s17966_s30  ;;  %v13434_v52 = vld [vmem:[%s17975_s1 + $0x18] sm:$0x3f] }
  0x28   : > { %464 = vrot.lane.b32.xlu1 %v14890_v5, %s17966_s30  ;;  %456 = vrot.lane.b32.xlu0 %v14894_v6, %s17966_s30 }
  0x2c   : > { %468 = vrot.lane.b32.xlu1 %v14905_v8, %s17966_s30  ;;  %466 = vrot.lane.b32.xlu0 %v14897_v7, %s17966_s30 }
  0x30   : > { %1086 = vrot.lane.b32.xlu1 %v14868_v1, %s17964_s15  ;;  %1084 = vrot.lane.b32.xlu0 %v14894_v6, %s17964_s15 }
  0x34   : > { %1090 = vrot.lane.b32.xlu1 %v14882_v4, %s17964_s15  ;;  %1088 = vrot.lane.b32.xlu0 %v14879_v3, %s17964_s15 }
  0x38   : > { %1092 = vrot.lane.b32.xlu1 %v14890_v5, %s17964_s15  ;;  %1082 = vrot.lane.b32.xlu0 %v14871_v2, %s17964_s15 }
  0x3c   : > { %1096 = vrot.lane.b32.xlu1 %v14905_v8, %s17964_s15  ;;  %1094 = vrot.lane.b32.xlu0 %v14897_v7, %s17964_s15 }
  0x40   : > { %1419 = vrot.lane.b32.xlu1 %v14868_v1, %s17962_s16  ;;  %1417 = vrot.lane.b32.xlu0 %v14894_v6, %s17962_s16 }
  0x44   : > { %1423 = vrot.lane.b32.xlu1 %v14882_v4, %s17962_s16  ;;  %1421 = vrot.lane.b32.xlu0 %v14879_v3, %s17962_s16 }
  0x48   : > { %1425 = vrot.lane.b32.xlu1 %v14890_v5, %s17962_s16  ;;  %1415 = vrot.lane.b32.xlu0 %v14871_v2, %s17962_s16 }
  0x4c   : > { %1429 = vrot.lane.b32.xlu1 %v14905_v8, %s17962_s16  ;;  %1427 = vrot.lane.b32.xlu0 %v14897_v7, %s17962_s16 }
  0x50   : > { %1752 = vrot.lane.b32.xlu1 %v14868_v1, %s17960_s20  ;;  %1750 = vrot.lane.b32.xlu0 %v14894_v6, %s17960_s20 }
  0x54   : > { %1756 = vrot.lane.b32.xlu1 %v14882_v4, %s17960_s20  ;;  %1754 = vrot.lane.b32.xlu0 %v14879_v3, %s17960_s20 }
  0x58   : > { %1758 = vrot.lane.b32.xlu1 %v14890_v5, %s17960_s20  ;;  %1748 = vrot.lane.b32.xlu0 %v14871_v2, %s17960_s20 }
  0x5c   : > { %1762 = vrot.lane.b32.xlu1 %v14905_v8, %s17960_s20  ;;  %1760 = vrot.lane.b32.xlu0 %v14897_v7, %s17960_s20 }
  0x60   : > { %2085 = vrot.lane.b32.xlu1 %v14868_v1, %s17956_s21  ;;  %2083 = vrot.lane.b32.xlu0 %v14894_v6, %s17956_s21 }
  0x64   : > { %2089 = vrot.lane.b32.xlu1 %v14882_v4, %s17956_s21  ;;  %2087 = vrot.lane.b32.xlu0 %v14879_v3, %s17956_s21 }
  0x68   : > { %2091 = vrot.lane.b32.xlu1 %v14890_v5, %s17956_s21  ;;  %2081 = vrot.lane.b32.xlu0 %v14871_v2, %s17956_s21 }
  0x6c   : > { %2095 = vrot.lane.b32.xlu1 %v14905_v8, %s17956_s21  ;;  %2093 = vrot.lane.b32.xlu0 %v14897_v7, %s17956_s21  ;;  %s14706_s21 = smov 93  }
  0x70   : > { %2418 = vrot.lane.b32.xlu1 %v14868_v1, %s14704_s22  ;;  %2416 = vrot.lane.b32.xlu0 %v14894_v6, %s14704_s22 }
  0x74   : > { %2422 = vrot.lane.b32.xlu1 %v14882_v4, %s14704_s22  ;;  %2420 = vrot.lane.b32.xlu0 %v14879_v3, %s14704_s22 }
  0x78   : > { %2424 = vrot.lane.b32.xlu1 %v14890_v5, %s14704_s22  ;;  %2414 = vrot.lane.b32.xlu0 %v14871_v2, %s14704_s22 }
  0x7c   : > { %2428 = vrot.lane.b32.xlu1 %v14905_v8, %s14704_s22  ;;  %2426 = vrot.lane.b32.xlu0 %v14897_v7, %s14704_s22  ;;  %s14711_s22 = smov 62  }
  0x80   : > { %2751 = vrot.lane.b32.xlu1 %v14868_v1, %s14705_s23  ;;  %2749 = vrot.lane.b32.xlu0 %v14894_v6, %s14705_s23 }
  0x84   : > { %2755 = vrot.lane.b32.xlu1 %v14882_v4, %s14705_s23  ;;  %2753 = vrot.lane.b32.xlu0 %v14879_v3, %s14705_s23 }
  0x88   : > { %2757 = vrot.lane.b32.xlu1 %v14890_v5, %s14705_s23  ;;  %2747 = vrot.lane.b32.xlu0 %v14871_v2, %s14705_s23 }
  0x8c   : > { %2761 = vrot.lane.b32.xlu1 %v14905_v8, %s14705_s23  ;;  %2759 = vrot.lane.b32.xlu0 %v14897_v7, %s14705_s23  ;;  %s14724_s23 = smov 110  }
  0x90   : > { %3084 = vrot.lane.b32.xlu1 %v14868_v1, %s14706_s21  ;;  %3082 = vrot.lane.b32.xlu0 %v14894_v6, %s14706_s21 }
  0x92   : > { %v459_v9 = vpop.permute.xlu0 %458  ;;  %v455_v10 = vpop.permute.xlu1 %454 }
  0x94   : > { %3088 = vrot.lane.b32.xlu1 %v14882_v4, %s14706_s21  ;;  %3086 = vrot.lane.b32.xlu0 %v14879_v3, %s14706_s21 }
  0x96   : > { %v463_v11 = vpop.permute.xlu0 %462  ;;  %v461_v12 = vpop.permute.xlu1 %460 }
  0x97   : > { %v15012_v19 = vsel %vm470_vm0, %v461_v12, %v463_v11  ;;  %v15015_v21 = vsel %vm470_vm0, %v459_v9, %v461_v12 }
  0x98   : > { %3090 = vrot.lane.b32.xlu1 %v14890_v5, %s14706_s21  ;;  %3080 = vrot.lane.b32.xlu0 %v14871_v2, %s14706_s21 }
  0x9a   : > { %v465_v13 = vpop.permute.xlu1 %464  ;;  %v457_v14 = vpop.permute.xlu0 %456 }
  0x9b   : > { %v14998_v15 = vsel %vm470_vm0, %v457_v14, %v459_v9  ;;  %v471_v16 = vsel %vm470_vm0, %v455_v10, %v457_v14  ;;  %v15032_v23 = vsel %vm470_vm0, %v463_v11, %v465_v13  ;;  %v13446_v10 = vld [vmem:[%s17975_s1 + $0x20] sm:$0x3f] }
  0x9c   : > { %3094 = vrot.lane.b32.xlu1 %v14905_v8, %s14706_s21  ;;  %3092 = vrot.lane.b32.xlu0 %v14897_v7, %s14706_s21  ;;  %s14707_s21 = smov 92  }
  0x9d   : > { %13400 = vmatprep.subr.msk.mxu1 %vm482_vm1, %v14998_v15 }
  0x9e   : > { %13401 = vmatpush1.msk.msra.mxu1 %vm482_vm1, %v471_v16  ;;  %v15009_v18 = vpop.permute.xlu1 %468  ;;  %v467_v20 = vpop.permute.xlu0 %466 }
  0x9f   : > { %13402 = vmatmul.mubr.msk.f32.vlgmr.msra.gmra.mxu1 %vm478_vm2, %v13399_v17  ;;  %13403 = vmatprep.subr.msk.mxu1 %vm482_vm1, %v15012_v19  ;;  %v15021_v22 = vsel %vm470_vm0, %v465_v13, %v467_v20  ;;  %v15039_v26 = vsel %vm470_vm0, %v467_v20, %v15009_v18 }
  0xa0   : > { %13404 = vmatpush1.msk.msra.mxu1 %vm482_vm1, %v15015_v21  ;;  %3417 = vrot.lane.b32.xlu1 %v14868_v1, %s14707_s21 }
  0xa1   : > { %3415 = vrot.lane.b32.xlu0 %v14894_v6, %s14707_s21  ;;  %13406 = vmatprep.subr.msk.mxu0 %vm482_vm1, %v15021_v22 }
  0xa2   : > { %632 = vmatprep.mubr.f32.mxu1 %v17958_v0  ;;  %13407 = vmatpush1.msk.msra.mxu0 %vm482_vm1, %v15032_v23  ;;  %v1087_v24 = vpop.permute.xlu1 %1086  ;;  %v1085_v25 = vpop.permute.xlu0 %1084 }
  0xa3   : > { %14126 = vmatprep.subr.mxu1 %v17958_v0  ;;  %13405 = vmatmul.mubr.msk.f32.vlgmr.msra.gmra.mxu1 %vm478_vm2, %v13399_v17  ;;  %v15069_v30 = vsel %vm1098_vm4, %v1085_v25, %v1087_v24 }
  0xa4   : > { %13408 = vmatmul.mubr.msk.f32.vlgmr.msra.gmra.mxu0 %vm478_vm2, %v13399_v17  ;;  %14127 = vmatpush3.msk.msra.mxu1 %vm482_vm1, %v15039_v26 }
  0xa5   : > { %13411 = vmatprep.subr.msk.mxu0 %vm482_vm1, %v14894_v6  ;;  %3421 = vrot.lane.b32.xlu1 %v14882_v4, %s14707_s21 }
  0xa6   : > { %3419 = vrot.lane.b32.xlu0 %v14879_v3, %s14707_s21  ;;  %13412 = vmatpush1.msk.msra.mxu0 %vm482_vm1, %v14871_v2  ;;  %v1091_v27 = vpop.permute.xlu1 %1090  ;;  %v1089_v29 = vpop.permute.xlu0 %1088 }
  0xa7   : > { %14128 = vmatprep.mubr.msk.f32.mxu1 %vm14708_vm3, %v17958_v0  ;;  %861 = vmatprep.mubr.f32.mxu0 %v17958_v0  ;;  %v15087_v34 = vsel %vm1098_vm4, %v1089_v29, %v1091_v27  ;;  %v15105_v38 = vsel %vm1098_vm4, %v1087_v24, %v1089_v29 }
  0xa8   : > { %13417 = vmatprep.subr.msk.mxu0 %vm482_vm1, %v14890_v5  ;;  %14129 = vmatmul.mubr.msk.f32.vlgmr.msra.gmra.mxu1 %vm478_vm2, %v13399_v17 }
  0xa9   : > { %13413 = vmatmul.mubr.msk.f32.vlgmr.msra.gmra.mxu0 %vm478_vm2, %v443_v28  ;;  %13414 = vmatprep.subr.msk.mxu1 %vm482_vm1, %v14879_v3 }
  0xaa   : > { %13418 = vmatpush1.msk.msra.mxu0 %vm482_vm1, %v14882_v4  ;;  %3423 = vrot.lane.b32.xlu1 %v14890_v5, %s14707_s21  ;;  %v1093_v31 = vpop.permute.xlu1 %1092  ;;  %v1083_v32 = vpop.permute.xlu0 %1082 }
  0xab   : > { %13423 = vmatprep.subr.msk.mxu0 %vm482_vm1, %v15069_v30  ;;  %3413 = vrot.lane.b32.xlu0 %v14871_v2, %s14707_s21  ;;  %v1099_v33 = vsel %vm1098_vm4, %v1083_v32, %v1085_v25  ;;  %v15121_v42 = vsel %vm1098_vm4, %v1091_v27, %v1093_v31 }
  0xac   : > { %13415 = vmatpush1.msk.msra.mxu1 %vm482_vm1, %v14868_v1  ;;  %932 = vmatprep.mubr.f32.mxu1 %v17958_v0 }
  0xad   : > { %14131 = vmatprep.subr.mxu1 %v17958_v0  ;;  %13416 = vmatmul.mubr.msk.f32.vlgmr.msra.gmra.mxu1 %vm478_vm2, %v443_v28 }
  0xae   : > { %14132 = vmatpush3.msk.msra.mxu1 %vm482_vm1, %v14897_v7  ;;  %1003 = vmatprep.mubr.f32.mxu0 %v17958_v0  ;;  %v15089_v35 = vpop.permute.xlu1 %1096  ;;  %v1095_v36 = vpop.permute.xlu0 %1094 }
  0xaf   : > { %13426 = vmatprep.subr.msk.mxu1 %vm482_vm1, %v15087_v34  ;;  %3427 = vrot.lane.b32.xlu1 %v14905_v8, %s14707_s21  ;;  %v15102_v37 = vsel %vm1098_vm4, %v1093_v31, %v1095_v36  ;;  %v15133_v46 = vsel %vm1098_vm4, %v1095_v36, %v15089_v35  ;;  %v13458_v36 = vld [vmem:[%s17975_s1 + $0x28] sm:$0x3f] }
  0xb0   : > { %3425 = vrot.lane.b32.xlu0 %v14897_v7, %s14707_s21  ;;  %13419 = vmatmul.mubr.msk.f32.vlgmr.msra.gmra.mxu0 %vm478_vm2, %v443_v28  ;;  %s14709_s21 = smov 64  }
  0xb1   : > { %13424 = vmatpush1.msk.msra.mxu0 %vm482_vm1, %v1099_v33  ;;  %14133 = vmatprep.mubr.msk.f32.mxu1 %vm14708_vm3, %v17958_v0 }
  0xb2   : > { %14134 = vmatmul.mubr.msk.f32.vlgmr.msra.gmra.mxu1 %vm478_vm2, %v443_v28  ;;  %1187 = vmatprep.mubr.f32.mxu0 %v17958_v0  ;;  %v1420_v40 = vpop.permute.xlu1 %1419  ;;  %v1418_v41 = vpop.permute.xlu0 %1417 }
  0xb3   : > { %13427 = vmatpush1.msk.msra.mxu1 %vm482_vm1, %v15105_v38  ;;  %3750 = vrot.lane.b32.xlu1 %v14868_v1, %s14709_s21  ;;  %v15129_v43 = vsel %vm1431_vm5, %v1418_v41, %v1420_v40 }
  0xb4   : > { %3748 = vrot.lane.b32.xlu0 %v14894_v6, %s14709_s21  ;;  %13429 = vmatprep.subr.msk.mxu0 %vm482_vm1, %v15102_v37 }
  0xb5   : > { %13425 = vmatmul.mubr.msk.f32.vlgmr.msra.gmra.mxu0 %vm478_vm2, %v13422_v39  ;;  %1258 = vmatprep.mubr.f32.mxu1 %v17958_v0 }
  0xb6   : > { %13430 = vmatpush1.msk.msra.mxu0 %vm482_vm1, %v15121_v42  ;;  %14136 = vmatprep.subr.mxu1 %v17958_v0  ;;  %v1424_v44 = vpop.permute.xlu1 %1423  ;;  %v1422_v45 = vpop.permute.xlu0 %1421 }
  0xb7   : > { %13428 = vmatmul.mubr.msk.f32.vlgmr.msra.gmra.mxu1 %vm478_vm2, %v13422_v39  ;;  %3754 = vrot.lane.b32.xlu1 %v14882_v4, %s14709_s21  ;;  %v15139_v47 = vsel %vm1431_vm5, %v1422_v45, %v1424_v44  ;;  %v15148_v48 = vsel %vm1431_vm5, %v1420_v40, %v1422_v45 }
  0xb8   : > { %14137 = vmatpush3.msk.msra.mxu1 %vm482_vm1, %v15133_v46  ;;  %3752 = vrot.lane.b32.xlu0 %v14879_v3, %s14709_s21 }
  0xb9   : > { %13435 = vmatprep.subr.msk.mxu0 %vm482_vm1, %v15129_v43  ;;  %14138 = vmatprep.mubr.msk.f32.mxu1 %vm14708_vm3, %v17958_v0 }
  0xba   : > { %13438 = vmatprep.subr.msk.mxu1 %vm482_vm1, %v15139_v47  ;;  %v1426_v49 = vpop.permute.xlu1 %1425  ;;  %v1416_v50 = vpop.permute.xlu0 %1415  ;;  %1329 = vmatprep.mubr.f32.mxu0 %v17958_v0 }
  0xbb   : > { %3756 = vrot.lane.b32.xlu1 %v14890_v5, %s14709_s21  ;;  %14139 = vmatmul.mubr.msk.f32.vlgmr.msra.gmra.mxu1 %vm478_vm2, %v13422_v39  ;;  %v1432_v51 = vsel %vm1431_vm5, %v1416_v50, %v1418_v41  ;;  %v15190_v57 = vsel %vm1431_vm5, %v1424_v44, %v1426_v49 }
  0xbc   : > { %3746 = vrot.lane.b32.xlu0 %v14871_v2, %s14709_s21  ;;  %13439 = vmatpush1.msk.msra.mxu1 %vm482_vm1, %v15148_v48 }
  0xbd   : > { %13431 = vmatmul.mubr.msk.f32.vlgmr.msra.gmra.mxu0 %vm478_vm2, %v13422_v39  ;;  %1591 = vmatprep.mubr.f32.mxu1 %v17958_v0 }
  0xbe   : > { %13436 = vmatpush1.msk.msra.mxu0 %vm482_vm1, %v1432_v51  ;;  %v15169_v53 = vpop.permute.xlu1 %1429  ;;  %v1428_v54 = vpop.permute.xlu0 %1427  ;;  %14141 = vmatprep.subr.mxu1 %v17958_v0 }
  0xbf   : > { %3760 = vrot.lane.b32.xlu1 %v14905_v8, %s14709_s21  ;;  %v15176_v55 = vsel %vm1431_vm5, %v1428_v54, %v15169_v53  ;;  %1520 = vmatprep.mubr.f32.mxu0 %v17958_v0  ;;  %v15180_v56 = vsel %vm1431_vm5, %v1426_v49, %v1428_v54 }
  0xc0   : > { %3758 = vrot.lane.b32.xlu0 %v14897_v7, %s14709_s21  ;;  %13440 = vmatmul.mubr.msk.f32.vlgmr.msra.gmra.mxu1 %vm478_vm2, %v13434_v52  ;;  %s14710_s21 = smov 63  }
  0xc1   : > { %13441 = vmatprep.subr.msk.mxu0 %vm482_vm1, %v15180_v56  ;;  %14142 = vmatpush3.msk.msra.mxu1 %vm482_vm1, %v15176_v55 }
  0xc2   : > { %13437 = vmatmul.mubr.msk.f32.vlgmr.msra.gmra.mxu0 %vm478_vm2, %v13434_v52  ;;  %v1753_v58 = vpop.permute.xlu1 %1752  ;;  %v1751_v59 = vpop.permute.xlu0 %1750  ;;  %14143 = vmatprep.mubr.msk.f32.mxu1 %vm14708_vm3, %v17958_v0 }
  0xc3   : > { %4083 = vrot.lane.b32.xlu1 %v14868_v1, %s14710_s21  ;;  %13442 = vmatpush1.msk.msra.mxu0 %vm482_vm1, %v15190_v57  ;;  %v15200_v60 = vsel %vm1764_vm6, %v1751_v59, %v1753_v58 }
  0xc4   : > { %4081 = vrot.lane.b32.xlu0 %v14894_v6, %s14710_s21  ;;  %13447 = vmatprep.subr.msk.mxu0 %vm482_vm1, %v15200_v60 }
  0xc5   : > { %14144 = vmatmul.mubr.msk.f32.vlgmr.msra.gmra.mxu1 %vm478_vm2, %v13434_v52  ;;  %1662 = vmatprep.mubr.f32.mxu0 %v17958_v0 }
  0xc6   : > { %v1757_v61 = vpop.permute.xlu1 %1756  ;;  %v1755_v62 = vpop.permute.xlu0 %1754  ;;  %13443 = vmatmul.mubr.msk.f32.vlgmr.msra.gmra.mxu0 %vm478_vm2, %v13434_v52  ;;  %1924 = vmatprep.mubr.f32.mxu1 %v17958_v0 }
  0xc7   : > { %4087 = vrot.lane.b32.xlu1 %v14882_v4, %s14710_s21  ;;  %v15213_v63 = vsel %vm1764_vm6, %v1753_v58, %v1755_v62  ;;  %v15216_v9 = vsel %vm1764_vm6, %v1755_v62, %v1757_v61  ;;  %1853 = vmatprep.mubr.f32.mxu0 %v17958_v0 }
  0xc8   : > { %4085 = vrot.lane.b32.xlu0 %v14879_v3, %s14710_s21  ;;  %13450 = vmatprep.subr.msk.mxu1 %vm482_vm1, %v15216_v9 }
  0xc9   : > { %13451 = vmatpush1.msk.msra.mxu1 %vm482_vm1, %v15213_v63 }
  0xca   : > { %v1759_v11 = vpop.permute.xlu1 %1758  ;;  %v1749_v12 = vpop.permute.xlu0 %1748  ;;  %14146 = vmatprep.subr.mxu1 %v17958_v0  ;;  %13452 = vmatmul.mubr.msk.f32.vlgmr.msra.gmra.mxu1 %vm478_vm2, %v13446_v10 }
  0xcb   : > { %4089 = vrot.lane.b32.xlu1 %v14890_v5, %s14710_s21  ;;  %v1765_v13 = vsel %vm1764_vm6, %v1749_v12, %v1751_v59  ;;  %14148 = vmatprep.mubr.msk.f32.mxu1 %vm14708_vm3, %v17958_v0  ;;  %v15252_v24 = vsel %vm1764_vm6, %v1757_v61, %v1759_v11 }
  0xcc   : > { %4079 = vrot.lane.b32.xlu0 %v14871_v2, %s14710_s21  ;;  %13448 = vmatpush1.msk.msra.mxu0 %vm482_vm1, %v1765_v13 }
  0xcd   : > { %13449 = vmatmul.mubr.msk.f32.vlgmr.msra.gmra.mxu0 %vm478_vm2, %v13446_v10 }
  0xce   : > { %v15239_v14 = vpop.permute.xlu1 %1762  ;;  %v1761_v16 = vpop.permute.xlu0 %1760  ;;  %1995 = vmatprep.mubr.f32.mxu0 %v17958_v0 }
  0xcf   : > { %4093 = vrot.lane.b32.xlu1 %v14905_v8, %s14710_s21  ;;  %v15246_v17 = vsel %vm1764_vm6, %v1761_v16, %v15239_v14  ;;  %v15249_v20 = vsel %vm1764_vm6, %v1759_v11, %v1761_v16  ;;  %v13470_v11 = vld [vmem:[%s17975_s1 + $0x30] sm:$0x3f] }
  0xd0   : > { %4091 = vrot.lane.b32.xlu0 %v14897_v7, %s14710_s21  ;;  %13453 = vmatprep.subr.msk.mxu0 %vm482_vm1, %v15249_v20  ;;  %s14712_s21 = smov 61  }
  0xd1   : > { %14147 = vmatpush3.msk.msra.mxu1 %vm482_vm1, %v15246_v17  ;;  %13454 = vmatpush1.msk.msra.mxu0 %vm482_vm1, %v15252_v24 }
  0xd2   : > { %v2086_v25 = vpop.permute.xlu1 %2085  ;;  %v2084_v27 = vpop.permute.xlu0 %2083  ;;  %14149 = vmatmul.mubr.msk.f32.vlgmr.msra.gmra.mxu1 %vm478_vm2, %v13446_v10  ;;  %13455 = vmatmul.mubr.msk.f32.vlgmr.msra.gmra.mxu0 %vm478_vm2, %v13446_v10 }
  0xd3   : > { %4416 = vrot.lane.b32.xlu1 %v14868_v1, %s14711_s22  ;;  %v2099_v28 = vsel %vm2097_vm7, %v2084_v27, %v2086_v25  ;;  %2257 = vmatprep.mubr.f32.mxu1 %v17958_v0 }
  0xd4   : > { %4414 = vrot.lane.b32.xlu0 %v14894_v6, %s14711_s22  ;;  %13459 = vmatprep.subr.msk.mxu0 %vm482_vm1, %v2099_v28 }
  0xd5   : > { %2186 = vmatprep.mubr.f32.mxu0 %v17958_v0 }
  0xd6   : > { %v2090_v29 = vpop.permute.xlu1 %2089  ;;  %v2088_v31 = vpop.permute.xlu0 %2087 }
  0xd7   : > { %4420 = vrot.lane.b32.xlu1 %v14882_v4, %s14711_s22  ;;  %v2100_v32 = vsel %vm2097_vm7, %v2086_v25, %v2088_v31  ;;  %v2101_v33 = vsel %vm2097_vm7, %v2088_v31, %v2090_v29 }
  0xd8   : > { %4418 = vrot.lane.b32.xlu0 %v14879_v3, %s14711_s22  ;;  %13462 = vmatprep.subr.msk.mxu1 %vm482_vm1, %v2101_v33 }
  0xd9   : > { %13463 = vmatpush1.msk.msra.mxu1 %vm482_vm1, %v2100_v32 }
  0xda   : > { %v2092_v39 = vpop.permute.xlu1 %2091  ;;  %v2082_v40 = vpop.permute.xlu0 %2081  ;;  %14151 = vmatprep.subr.mxu1 %v17958_v0  ;;  %13464 = vmatmul.mubr.msk.f32.vlgmr.msra.gmra.mxu1 %vm478_vm2, %v13458_v36 }
  0xdb   : > { %4422 = vrot.lane.b32.xlu1 %v14890_v5, %s14711_s22  ;;  %v2098_v41 = vsel %vm2097_vm7, %v2082_v40, %v2084_v27  ;;  %14153 = vmatprep.mubr.msk.f32.mxu1 %vm14708_vm3, %v17958_v0  ;;  %v2102_v51 = vsel %vm2097_vm7, %v2090_v29, %v2092_v39 }
  0xdc   : > { %4412 = vrot.lane.b32.xlu0 %v14871_v2, %s14711_s22  ;;  %13460 = vmatpush1.msk.msra.mxu0 %vm482_vm1, %v2098_v41 }
  0xdd   : > { %13461 = vmatmul.mubr.msk.f32.vlgmr.msra.gmra.mxu0 %vm478_vm2, %v13458_v36 }
  0xde   : > { %v2096_v44 = vpop.permute.xlu1 %2095  ;;  %v2094_v45 = vpop.permute.xlu0 %2093  ;;  %2328 = vmatprep.mubr.f32.mxu0 %v17958_v0 }
  0xdf   : > { %4426 = vrot.lane.b32.xlu1 %v14905_v8, %s14711_s22  ;;  %v2104_v49 = vsel %vm2097_vm7, %v2094_v45, %v2096_v44  ;;  %v2103_v50 = vsel %vm2097_vm7, %v2092_v39, %v2094_v45  ;;  %v13482_v45 = vld [vmem:[%s17975_s1 + $0x38] sm:$0x3f] }
  0xe0   : > { %4424 = vrot.lane.b32.xlu0 %v14897_v7, %s14711_s22  ;;  %13465 = vmatprep.subr.msk.mxu0 %vm482_vm1, %v2103_v50  ;;  %s14713_s22 = smov 60  }
  0xe1   : > { %14152 = vmatpush3.msk.msra.mxu1 %vm482_vm1, %v2104_v49  ;;  %13466 = vmatpush1.msk.msra.mxu0 %vm482_vm1, %v2102_v51 }
  0xe2   : > { %v2419_v52 = vpop.permute.xlu1 %2418  ;;  %v2417_v54 = vpop.permute.xlu0 %2416  ;;  %14154 = vmatmul.mubr.msk.f32.vlgmr.msra.gmra.mxu1 %vm478_vm2, %v13458_v36  ;;  %13467 = vmatmul.mubr.msk.f32.vlgmr.msra.gmra.mxu0 %vm478_vm2, %v13458_v36 }
  0xe3   : > { %4749 = vrot.lane.b32.xlu1 %v14868_v1, %s14712_s21  ;;  %v2432_v58 = vsel %vm2430_vm8, %v2417_v54, %v2419_v52  ;;  %2590 = vmatprep.mubr.f32.mxu1 %v17958_v0 }
  0xe4   : > { %4747 = vrot.lane.b32.xlu0 %v14894_v6, %s14712_s21  ;;  %13471 = vmatprep.subr.msk.mxu0 %vm482_vm1, %v2432_v58 }
  0xe5   : > { %2519 = vmatprep.mubr.f32.mxu0 %v17958_v0 }
  0xe6   : > { %v2423_v59 = vpop.permute.xlu1 %2422  ;;  %v2421_v61 = vpop.permute.xlu0 %2420 }
  0xe7   : > { %4753 = vrot.lane.b32.xlu1 %v14882_v4, %s14712_s21  ;;  %v2433_v62 = vsel %vm2430_vm8, %v2419_v52, %v2421_v61  ;;  %v2434_v10 = vsel %vm2430_vm8, %v2421_v61, %v2423_v59 }
  0xe8   : > { %4751 = vrot.lane.b32.xlu0 %v14879_v3, %s14712_s21  ;;  %13474 = vmatprep.subr.msk.mxu1 %vm482_vm1, %v2434_v10 }
  0xe9   : > { %13475 = vmatpush1.msk.msra.mxu1 %vm482_vm1, %v2433_v62 }
  0xea   : > { %v2425_v12 = vpop.permute.xlu1 %2424  ;;  %v2415_v13 = vpop.permute.xlu0 %2414  ;;  %14156 = vmatprep.subr.mxu1 %v17958_v0  ;;  %13476 = vmatmul.mubr.msk.f32.vlgmr.msra.gmra.mxu1 %vm478_vm2, %v13470_v11 }
  0xeb   : > { %4755 = vrot.lane.b32.xlu1 %v14890_v5, %s14712_s21  ;;  %v2431_v16 = vsel %vm2430_vm8, %v2415_v13, %v2417_v54  ;;  %14158 = vmatprep.mubr.msk.f32.mxu1 %vm14708_vm3, %v17958_v0  ;;  %v2435_v31 = vsel %vm2430_vm8, %v2423_v59, %v2425_v12 }
  0xec   : > { %4745 = vrot.lane.b32.xlu0 %v14871_v2, %s14712_s21  ;;  %13472 = vmatpush1.msk.msra.mxu0 %vm482_vm1, %v2431_v16 }
  0xed   : > { %13473 = vmatmul.mubr.msk.f32.vlgmr.msra.gmra.mxu0 %vm478_vm2, %v13470_v11 }
  0xee   : > { %v2429_v25 = vpop.permute.xlu1 %2428  ;;  %v2427_v27 = vpop.permute.xlu0 %2426  ;;  %2661 = vmatprep.mubr.f32.mxu0 %v17958_v0 }
  0xef   : > { %4759 = vrot.lane.b32.xlu1 %v14905_v8, %s14712_s21  ;;  %v2437_v28 = vsel %vm2430_vm8, %v2427_v27, %v2429_v25  ;;  %v2436_v29 = vsel %vm2430_vm8, %v2425_v12, %v2427_v27  ;;  %v13494_v27 = vld [vmem:[%s17975_s1 + $0x40] sm:$0x3f] }
  0xf0   : > { %4757 = vrot.lane.b32.xlu0 %v14897_v7, %s14712_s21  ;;  %13477 = vmatprep.subr.msk.mxu0 %vm482_vm1, %v2436_v29  ;;  %s14714_s21 = smov 32  }
  0xf1   : > { %14157 = vmatpush3.msk.msra.mxu1 %vm482_vm1, %v2437_v28  ;;  %13478 = vmatpush1.msk.msra.mxu0 %vm482_vm1, %v2435_v31 }
  0xf2   : > { %v2752_v32 = vpop.permute.xlu1 %2751  ;;  %v2750_v33 = vpop.permute.xlu0 %2749  ;;  %14159 = vmatmul.mubr.msk.f32.vlgmr.msra.gmra.mxu1 %vm478_vm2, %v13470_v11  ;;  %13479 = vmatmul.mubr.msk.f32.vlgmr.msra.gmra.mxu0 %vm478_vm2, %v13470_v11 }
  0xf3   : > { %5082 = vrot.lane.b32.xlu1 %v14868_v1, %s14713_s22  ;;  %v2765_v36 = vsel %vm2763_vm9, %v2750_v33, %v2752_v32  ;;  %2923 = vmatprep.mubr.f32.mxu1 %v17958_v0 }
  0xf4   : > { %5080 = vrot.lane.b32.xlu0 %v14894_v6, %s14713_s22  ;;  %13483 = vmatprep.subr.msk.mxu0 %vm482_vm1, %v2765_v36 }
  0xf5   : > { %2852 = vmatprep.mubr.f32.mxu0 %v17958_v0 }
  0xf6   : > { %v2756_v39 = vpop.permute.xlu1 %2755  ;;  %v2754_v40 = vpop.permute.xlu0 %2753 }
  0xf7   : > { %5086 = vrot.lane.b32.xlu1 %v14882_v4, %s14713_s22  ;;  %v2766_v41 = vsel %vm2763_vm9, %v2752_v32, %v2754_v40  ;;  %v2767_v44 = vsel %vm2763_vm9, %v2754_v40, %v2756_v39 }
  0xf8   : > { %5084 = vrot.lane.b32.xlu0 %v14879_v3, %s14713_s22  ;;  %13486 = vmatprep.subr.msk.mxu1 %vm482_vm1, %v2767_v44 }
  0xf9   : > { %13487 = vmatpush1.msk.msra.mxu1 %vm482_vm1, %v2766_v41 }
  0xfa   : > { %v2758_v49 = vpop.permute.xlu1 %2757  ;;  %v2748_v50 = vpop.permute.xlu0 %2747  ;;  %14161 = vmatprep.subr.mxu1 %v17958_v0  ;;  %13488 = vmatmul.mubr.msk.f32.vlgmr.msra.gmra.mxu1 %vm478_vm2, %v13482_v45 }
  0xfb   : > { %5088 = vrot.lane.b32.xlu1 %v14890_v5, %s14713_s22  ;;  %v2764_v51 = vsel %vm2763_vm9, %v2748_v50, %v2750_v33  ;;  %14163 = vmatprep.mubr.msk.f32.mxu1 %vm14708_vm3, %v17958_v0  ;;  %v2768_v61 = vsel %vm2763_vm9, %v2756_v39, %v2758_v49 }
  0xfc   : > { %5078 = vrot.lane.b32.xlu0 %v14871_v2, %s14713_s22  ;;  %13484 = vmatpush1.msk.msra.mxu0 %vm482_vm1, %v2764_v51 }
  0xfd   : > { %13485 = vmatmul.mubr.msk.f32.vlgmr.msra.gmra.mxu0 %vm478_vm2, %v13482_v45 }
  0xfe   : > { %v2762_v52 = vpop.permute.xlu1 %2761  ;;  %v2760_v54 = vpop.permute.xlu0 %2759  ;;  %2994 = vmatprep.mubr.f32.mxu0 %v17958_v0 }
  0xff   : > { %5092 = vrot.lane.b32.xlu1 %v14905_v8, %s14713_s22  ;;  %v2770_v58 = vsel %vm2763_vm9, %v2760_v54, %v2762_v52  ;;  %v2769_v59 = vsel %vm2763_vm9, %v2758_v49, %v2760_v54  ;;  %v13506_v54 = vld [vmem:[%s17975_s1 + $0x48] sm:$0x3f]  ;;  %vm5094_vm9 = vcmask 490496  }
 0x100   : > { %5090 = vrot.lane.b32.xlu0 %v14897_v7, %s14713_s22  ;;  %13489 = vmatprep.subr.msk.mxu0 %vm482_vm1, %v2769_v59  ;;  %s14715_s22 = smov 31  }
 0x101   : > { %14162 = vmatpush3.msk.msra.mxu1 %vm482_vm1, %v2770_v58  ;;  %13490 = vmatpush1.msk.msra.mxu0 %vm482_vm1, %v2768_v61 }
 0x102   : > { %v3085_v62 = vpop.permute.xlu1 %3084  ;;  %v3083_v10 = vpop.permute.xlu0 %3082  ;;  %14164 = vmatmul.mubr.msk.f32.vlgmr.msra.gmra.mxu1 %vm478_vm2, %v13482_v45  ;;  %13491 = vmatmul.mubr.msk.f32.vlgmr.msra.gmra.mxu0 %vm478_vm2, %v13482_v45 }
 0x103   : > { %5415 = vrot.lane.b32.xlu1 %v14868_v1, %s14714_s21  ;;  %v3098_v11 = vsel %vm3096_vm10, %v3083_v10, %v3085_v62  ;;  %3256 = vmatprep.mubr.f32.mxu1 %v17958_v0 }
 0x104   : > { %5413 = vrot.lane.b32.xlu0 %v14894_v6, %s14714_s21  ;;  %13495 = vmatprep.subr.msk.mxu0 %vm482_vm1, %v3098_v11 }
 0x105   : > { %3185 = vmatprep.mubr.f32.mxu0 %v17958_v0 }
 0x106   : > { %v3089_v12 = vpop.permute.xlu1 %3088  ;;  %v3087_v13 = vpop.permute.xlu0 %3086 }
 0x107   : > { %5419 = vrot.lane.b32.xlu1 %v14882_v4, %s14714_s21  ;;  %v3099_v16 = vsel %vm3096_vm10, %v3085_v62, %v3087_v13  ;;  %v3100_v25 = vsel %vm3096_vm10, %v3087_v13, %v3089_v12 }
 0x108   : > { %5417 = vrot.lane.b32.xlu0 %v14879_v3, %s14714_s21  ;;  %13498 = vmatprep.subr.msk.mxu1 %vm482_vm1, %v3100_v25 }
 0x109   : > { %13499 = vmatpush1.msk.msra.mxu1 %vm482_vm1, %v3099_v16 }
 0x10a   : > { %v3091_v28 = vpop.permute.xlu1 %3090  ;;  %v3081_v29 = vpop.permute.xlu0 %3080  ;;  %14166 = vmatprep.subr.mxu1 %v17958_v0  ;;  %13500 = vmatmul.mubr.msk.f32.vlgmr.msra.gmra.mxu1 %vm478_vm2, %v13494_v27 }
 0x10b   : > { %5421 = vrot.lane.b32.xlu1 %v14890_v5, %s14714_s21  ;;  %v3097_v31 = vsel %vm3096_vm10, %v3081_v29, %v3083_v10  ;;  %14168 = vmatprep.mubr.msk.f32.mxu1 %vm14708_vm3, %v17958_v0  ;;  %v3101_v40 = vsel %vm3096_vm10, %v3089_v12, %v3091_v28 }
 0x10c   : > { %5411 = vrot.lane.b32.xlu0 %v14871_v2, %s14714_s21  ;;  %13496 = vmatpush1.msk.msra.mxu0 %vm482_vm1, %v3097_v31 }
 0x10d   : > { %13497 = vmatmul.mubr.msk.f32.vlgmr.msra.gmra.mxu0 %vm478_vm2, %v13494_v27 }
 0x10e   : > { %v3095_v32 = vpop.permute.xlu1 %3094  ;;  %v3093_v33 = vpop.permute.xlu0 %3092  ;;  %3327 = vmatprep.mubr.f32.mxu0 %v17958_v0 }
 0x10f   : > { %5425 = vrot.lane.b32.xlu1 %v14905_v8, %s14714_s21  ;;  %v3103_v36 = vsel %vm3096_vm10, %v3093_v33, %v3095_v32  ;;  %v3102_v39 = vsel %vm3096_vm10, %v3091_v28, %v3093_v33  ;;  %v13518_v33 = vld [vmem:[%s17975_s1 + $0x50] sm:$0x3f]  ;;  %vm5427_vm10 = vcmask 261120  }
 0x110   : > { %5423 = vrot.lane.b32.xlu0 %v14897_v7, %s14714_s21  ;;  %13501 = vmatprep.subr.msk.mxu0 %vm482_vm1, %v3102_v39  ;;  %s14716_s21 = smov 30  }
 0x111   : > { %14167 = vmatpush3.msk.msra.mxu1 %vm482_vm1, %v3103_v36  ;;  %13502 = vmatpush1.msk.msra.mxu0 %vm482_vm1, %v3101_v40 }
 0x112   : > { %v3418_v41 = vpop.permute.xlu1 %3417  ;;  %14169 = vmatmul.mubr.msk.f32.vlgmr.msra.gmra.mxu1 %vm478_vm2, %v13494_v27  ;;  %13503 = vmatmul.mubr.msk.f32.vlgmr.msra.gmra.mxu0 %vm478_vm2, %v13494_v27 }
 0x113   : > { %5748 = vrot.lane.b32.xlu1 %v14868_v1, %s14715_s22  ;;  %v3416_v44 = vpop.permute.xlu0 %3415  ;;  %3589 = vmatprep.mubr.f32.mxu1 %v17958_v0 }
 0x114   : > { %5746 = vrot.lane.b32.xlu0 %v14894_v6, %s14715_s22  ;;  %v3431_v45 = vsel %vm3429_vm11, %v3416_v44, %v3418_v41  ;;  %3518 = vmatprep.mubr.f32.mxu0 %v17958_v0 }
 0x115   : > { %13507 = vmatprep.subr.msk.mxu0 %vm482_vm1, %v3431_v45 }
 0x117   : > { %5752 = vrot.lane.b32.xlu1 %v14882_v4, %s14715_s22  ;;  %v3422_v49 = vpop.permute.xlu1 %3421 }
 0x118   : > { %5750 = vrot.lane.b32.xlu0 %v14879_v3, %s14715_s22  ;;  %v3420_v50 = vpop.permute.xlu0 %3419 }
 0x119   : > { %v3432_v51 = vsel %vm3429_vm11, %v3418_v41, %v3420_v50  ;;  %v3433_v52 = vsel %vm3429_vm11, %v3420_v50, %v3422_v49 }
 0x11a   : > { %13510 = vmatprep.subr.msk.mxu1 %vm482_vm1, %v3433_v52 }
 0x11b   : > { %5754 = vrot.lane.b32.xlu1 %v14890_v5, %s14715_s22  ;;  %13511 = vmatpush1.msk.msra.mxu1 %vm482_vm1, %v3432_v51 }
 0x11c   : > { %5744 = vrot.lane.b32.xlu0 %v14871_v2, %s14715_s22  ;;  %v3424_v58 = vpop.permute.xlu1 %3423  ;;  %14171 = vmatprep.subr.mxu1 %v17958_v0 }
 0x11d   : > { %v3414_v59 = vpop.permute.xlu0 %3413  ;;  %13512 = vmatmul.mubr.msk.f32.vlgmr.msra.gmra.mxu1 %vm478_vm2, %v13506_v54  ;;  %v3434_v13 = vsel %vm3429_vm11, %v3422_v49, %v3424_v58 }
 0x11e   : > { %v3430_v61 = vsel %vm3429_vm11, %v3414_v59, %v3416_v44  ;;  %14173 = vmatprep.mubr.msk.f32.mxu1 %vm14708_vm3, %v17958_v0  ;;  %v14632_v59 = vld [vmem:[%s14863_s24] sm:$0x77] }
 0x11f   : > { %5758 = vrot.lane.b32.xlu1 %v14905_v8, %s14715_s22  ;;  %13508 = vmatpush1.msk.msra.mxu0 %vm482_vm1, %v3430_v61 }
 0x120   : > { %5756 = vrot.lane.b32.xlu0 %v14897_v7, %s14715_s22  ;;  %13509 = vmatmul.mubr.msk.f32.vlgmr.msra.gmra.mxu0 %vm478_vm2, %v13506_v54  ;;  %s14717_s22 = smov 29  }
 0x121   : > { %v3428_v62 = vpop.permute.xlu1 %3427  ;;  %3660 = vmatprep.mubr.f32.mxu0 %v17958_v0 }
 0x122   : > { %v3426_v10 = vpop.permute.xlu0 %3425 }
 0x123   : > { %v3436_v11 = vsel %vm3429_vm11, %v3426_v10, %v3428_v62  ;;  %6081 = vrot.lane.b32.xlu1 %v14868_v1, %s14716_s21  ;;  %v3435_v12 = vsel %vm3429_vm11, %v3424_v58, %v3426_v10  ;;  %v13530_v58 = vld [vmem:[%s17975_s1 + $0x58] sm:$0x3f]  ;;  %vm5760_vm11 = vcmask 252928  }
 0x124   : > { %6079 = vrot.lane.b32.xlu0 %v14894_v6, %s14716_s21  ;;  %13513 = vmatprep.subr.msk.mxu0 %vm482_vm1, %v3435_v12 }
 0x125   : > { %14172 = vmatpush3.msk.msra.mxu1 %vm482_vm1, %v3436_v11  ;;  %13514 = vmatpush1.msk.msra.mxu0 %vm482_vm1, %v3434_v13  ;;  %v3751_v16 = vpop.permute.xlu1 %3750  ;;  %v15545_v11 = vld [vmem:[%s14863_s24 + $0x18] sm:$0x77] }
 0x126   : > { %v3749_v25 = vpop.permute.xlu0 %3748  ;;  %14174 = vmatmul.mubr.msk.f32.vlgmr.msra.gmra.mxu1 %vm478_vm2, %v13506_v54  ;;  %13515 = vmatmul.mubr.msk.f32.vlgmr.msra.gmra.mxu0 %vm478_vm2, %v13506_v54 }
 0x127   : > { %6085 = vrot.lane.b32.xlu1 %v14882_v4, %s14716_s21  ;;  %v3764_v27 = vsel %vm3762_vm12, %v3749_v25, %v3751_v16  ;;  %3922 = vmatprep.mubr.f32.mxu1 %v17958_v0 }
 0x128   : > { %6083 = vrot.lane.b32.xlu0 %v14879_v3, %s14716_s21  ;;  %13519 = vmatprep.subr.msk.mxu0 %vm482_vm1, %v3764_v27 }
 0x129   : > { %v3755_v28 = vpop.permute.xlu1 %3754  ;;  %3851 = vmatprep.mubr.f32.mxu0 %v17958_v0 }
 0x12a   : > { %v3753_v29 = vpop.permute.xlu0 %3752 }
 0x12b   : > { %v3765_v31 = vsel %vm3762_vm12, %v3751_v16, %v3753_v29  ;;  %6087 = vrot.lane.b32.xlu1 %v14890_v5, %s14716_s21  ;;  %v3766_v32 = vsel %vm3762_vm12, %v3753_v29, %v3755_v28 }
 0x12c   : > { %6077 = vrot.lane.b32.xlu0 %v14871_v2, %s14716_s21  ;;  %13522 = vmatprep.subr.msk.mxu1 %vm482_vm1, %v3766_v32  ;;  %v15568_v32 = vld [vmem:[%s14863_s24 + $0x10] sm:$0x77] }
 0x12d   : > { %13523 = vmatpush1.msk.msra.mxu1 %vm482_vm1, %v3765_v31  ;;  %v3757_v36 = vpop.permute.xlu1 %3756 }
 0x12e   : > { %v3747_v39 = vpop.permute.xlu0 %3746  ;;  %14176 = vmatprep.subr.mxu1 %v17958_v0  ;;  %13524 = vmatmul.mubr.msk.f32.vlgmr.msra.gmra.mxu1 %vm478_vm2, %v13518_v33  ;;  %v3767_v49 = vsel %vm3762_vm12, %v3755_v28, %v3757_v36 }
 0x12f   : > { %v3763_v40 = vsel %vm3762_vm12, %v3747_v39, %v3749_v25  ;;  %6091 = vrot.lane.b32.xlu1 %v14905_v8, %s14716_s21  ;;  %14178 = vmatprep.mubr.msk.f32.mxu1 %vm14708_vm3, %v17958_v0  ;;  %v15554_v25 = vld [vmem:[%s14863_s24 + $0x8] sm:$0x77] }
 0x130   : > { %6089 = vrot.lane.b32.xlu0 %v14897_v7, %s14716_s21  ;;  %13520 = vmatpush1.msk.msra.mxu0 %vm482_vm1, %v3763_v40  ;;  %s14718_s21 = smov 28  }
 0x131   : > { %v3761_v2 = vpop.permute.xlu1 %3760  ;;  %13521 = vmatmul.mubr.msk.f32.vlgmr.msra.gmra.mxu0 %vm478_vm2, %v13518_v33 }
 0x132   : > { %v3759_v41 = vpop.permute.xlu0 %3758  ;;  %3993 = vmatprep.mubr.f32.mxu0 %v17958_v0 }
 0x133   : > { %v3769_v44 = vsel %vm3762_vm12, %v3759_v41, %v3761_v2  ;;  %6414 = vrot.lane.b32.xlu1 %v14868_v1, %s14717_s22  ;;  %v3768_v45 = vsel %vm3762_vm12, %v3757_v36, %v3759_v41  ;;  %v13542_v41 = vld [vmem:[%s17975_s1 + $0x60] sm:$0x3f]  ;;  %vm6093_vm12 = vcmask 244736  }
 0x134   : > { %6412 = vrot.lane.b32.xlu0 %v14894_v6, %s14717_s22  ;;  %13525 = vmatprep.subr.msk.mxu0 %vm482_vm1, %v3768_v45 }
 0x135   : > { %14177 = vmatpush3.msk.msra.mxu1 %vm482_vm1, %v3769_v44  ;;  %13526 = vmatpush1.msk.msra.mxu0 %vm482_vm1, %v3767_v49  ;;  %v4084_v7 = vpop.permute.xlu1 %4083 }
 0x136   : > { %v4082_v50 = vpop.permute.xlu0 %4081  ;;  %14179 = vmatmul.mubr.msk.f32.vlgmr.msra.gmra.mxu1 %vm478_vm2, %v13518_v33  ;;  %13527 = vmatmul.mubr.msk.f32.vlgmr.msra.gmra.mxu0 %vm478_vm2, %v13518_v33 }
 0x137   : > { %6418 = vrot.lane.b32.xlu1 %v14882_v4, %s14717_s22  ;;  %v4097_v1 = vsel %vm4095_vm13, %v4082_v50, %v4084_v7  ;;  %4255 = vmatprep.mubr.f32.mxu1 %v17958_v0 }
 0x138   : > { %6416 = vrot.lane.b32.xlu0 %v14879_v3, %s14717_s22  ;;  %13531 = vmatprep.subr.msk.mxu0 %vm482_vm1, %v4097_v1 }
 0x139   : > { %v4088_v51 = vpop.permute.xlu1 %4087  ;;  %4184 = vmatprep.mubr.f32.mxu0 %v17958_v0 }
 0x13a   : > { %v4086_v52 = vpop.permute.xlu0 %4085 }
 0x13b   : > { %v4098_v54 = vsel %vm4095_vm13, %v4084_v7, %v4086_v52  ;;  %6420 = vrot.lane.b32.xlu1 %v14890_v5, %s14717_s22  ;;  %v4099_v4 = vsel %vm4095_vm13, %v4086_v52, %v4088_v51  ;;  %v442_v7 = vld [vmem:[%s14863_s24 + $0x20] sm:$0x7]  ;;  %s14725_s24 = smov 100  }
 0x13c   : > { %6410 = vrot.lane.b32.xlu0 %v14632_v59, %s14717_s22  ;;  %13534 = vmatprep.subr.msk.mxu1 %vm482_vm1, %v4099_v4 }
 0x13d   : > { %13535 = vmatpush1.msk.msra.mxu1 %vm482_vm1, %v4098_v54  ;;  %v4090_v61 = vpop.permute.xlu1 %4089 }
 0x13e   : > { %13536 = vmatmul.mubr.msk.f32.vlgmr.msra.gmra.mxu1 %vm478_vm2, %v13530_v58  ;;  %v4080_v62 = vpop.permute.xlu0 %4079  ;;  %14181 = vmatprep.subr.mxu1 %v17958_v0  ;;  %v4100_v28 = vsel %vm4095_vm13, %v4088_v51, %v4090_v61 }
 0x13f   : > { %v4096_v10 = vsel %vm4095_vm13, %v4080_v62, %v4082_v50  ;;  %6424 = vrot.lane.b32.xlu1 %v14905_v8, %s14717_s22  ;;  %14183 = vmatprep.mubr.msk.f32.mxu1 %vm14708_vm3, %v17958_v0 }
 0x140   : > { %6422 = vrot.lane.b32.xlu0 %v15545_v11, %s14717_s22  ;;  %13532 = vmatpush1.msk.msra.mxu0 %vm482_vm1, %v4096_v10  ;;  %s14723_s22 = smov 111  }
 0x141   : > { %13533 = vmatmul.mubr.msk.f32.vlgmr.msra.gmra.mxu0 %vm478_vm2, %v13530_v58  ;;  %v4094_v12 = vpop.permute.xlu1 %4093 }
 0x142   : > { %v4092_v13 = vpop.permute.xlu0 %4091  ;;  %4326 = vmatprep.mubr.f32.mxu0 %v17958_v0 }
 0x143   : > { %v4102_v16 = vsel %vm4095_vm13, %v4092_v13, %v4094_v12  ;;  %6747 = vrot.lane.b32.xlu1 %v15554_v25, %s14718_s21  ;;  %v4101_v27 = vsel %vm4095_vm13, %v4090_v61, %v4092_v13  ;;  %v13554_v13 = vld [vmem:[%s17975_s1 + $0x68] sm:$0x3f]  ;;  %vm6426_vm13 = vcmask 236544  }
 0x144   : > { %6745 = vrot.lane.b32.xlu0 %v14894_v6, %s14718_s21  ;;  %13537 = vmatprep.subr.msk.mxu0 %vm482_vm1, %v4101_v27 }
 0x145   : > { %14182 = vmatpush3.msk.msra.mxu1 %vm482_vm1, %v4102_v16  ;;  %13538 = vmatpush1.msk.msra.mxu0 %vm482_vm1, %v4100_v28  ;;  %v4417_v29 = vpop.permute.xlu1 %4416 }
 0x146   : > { %14184 = vmatmul.mubr.msk.f32.vlgmr.msra.gmra.mxu1 %vm478_vm2, %v13530_v58  ;;  %13539 = vmatmul.mubr.msk.f32.vlgmr.msra.gmra.mxu0 %vm478_vm2, %v13530_v58  ;;  %v4415_v31 = vpop.permute.xlu0 %4414 }
 0x147   : > { %6751 = vrot.lane.b32.xlu1 %v15568_v32, %s14718_s21  ;;  %v4430_v33 = vsel %vm4428_vm14, %v4415_v31, %v4417_v29  ;;  %4588 = vmatprep.mubr.f32.mxu1 %v17958_v0 }
 0x148   : > { %6749 = vrot.lane.b32.xlu0 %v14879_v3, %s14718_s21  ;;  %13543 = vmatprep.subr.msk.mxu0 %vm482_vm1, %v4430_v33 }
 0x149   : > { %v4421_v36 = vpop.permute.xlu1 %4420  ;;  %4517 = vmatprep.mubr.f32.mxu0 %v17958_v0 }
 0x14a   : > { %v4419_v39 = vpop.permute.xlu0 %4418 }
 0x14b   : > { %v4431_v40 = vsel %vm4428_vm14, %v4417_v29, %v4419_v39  ;;  %6753 = vrot.lane.b32.xlu1 %v14890_v5, %s14718_s21  ;;  %v4432_v2 = vsel %vm4428_vm14, %v4419_v39, %v4421_v36 }
 0x14c   : > { %6743 = vrot.lane.b32.xlu0 %v14632_v59, %s14718_s21  ;;  %13546 = vmatprep.subr.msk.mxu1 %vm482_vm1, %v4432_v2 }
 0x14d   : > { %13547 = vmatpush1.msk.msra.mxu1 %vm482_vm1, %v4431_v40  ;;  %v4423_v44 = vpop.permute.xlu1 %4422 }
 0x14e   : > { %13548 = vmatmul.mubr.msk.f32.vlgmr.msra.gmra.mxu1 %vm478_vm2, %v13542_v41  ;;  %v4413_v45 = vpop.permute.xlu0 %4412  ;;  %14186 = vmatprep.subr.mxu1 %v17958_v0  ;;  %v4433_v54 = vsel %vm4428_vm14, %v4421_v36, %v4423_v44 }
 0x14f   : > { %v4429_v49 = vsel %vm4428_vm14, %v4413_v45, %v4415_v31  ;;  %6757 = vrot.lane.b32.xlu1 %v14905_v8, %s14718_s21  ;;  %14188 = vmatprep.mubr.msk.f32.mxu1 %vm14708_vm3, %v17958_v0 }
 0x150   : > { %6755 = vrot.lane.b32.xlu0 %v15545_v11, %s14718_s21  ;;  %13544 = vmatpush1.msk.msra.mxu0 %vm482_vm1, %v4429_v49  ;;  %s14726_s21 = smov 99  }
 0x151   : > { %13545 = vmatmul.mubr.msk.f32.vlgmr.msra.gmra.mxu0 %vm478_vm2, %v13542_v41  ;;  %v4427_v50 = vpop.permute.xlu1 %4426 }
 0x152   : > { %v4425_v1 = vpop.permute.xlu0 %4424  ;;  %4659 = vmatprep.mubr.f32.mxu0 %v17958_v0 }
 0x153   : > { %v4435_v51 = vsel %vm4428_vm14, %v4425_v1, %v4427_v50  ;;  %7674 = vrot.lane.b32.xlu1 %v442_v7, %s17964_s15  ;;  %v4434_v52 = vsel %vm4428_vm14, %v4423_v44, %v4425_v1  ;;  %vm6759_vm14 = vcmask 228352   ;;  %s18006_s15 = smov 124  }
 0x154   : > { %7374 = vrot.lane.b32.xlu0 %v442_v7, %s17966_s30  ;;  %13549 = vmatprep.subr.msk.mxu0 %vm482_vm1, %v4434_v52 }
 0x155   : > { %14187 = vmatpush3.msk.msra.mxu1 %vm482_vm1, %v4435_v51  ;;  %13550 = vmatpush1.msk.msra.mxu0 %vm482_vm1, %v4433_v54  ;;  %v4750_v4 = vpop.permute.xlu1 %4749 }
 0x156   : > { %14189 = vmatmul.mubr.msk.f32.vlgmr.msra.gmra.mxu1 %vm478_vm2, %v13542_v41  ;;  %13551 = vmatmul.mubr.msk.f32.vlgmr.msra.gmra.mxu0 %vm478_vm2, %v13542_v41  ;;  %v4748_v58 = vpop.permute.xlu0 %4747 }
 0x157   : > { %8274 = vrot.lane.b32.xlu1 %v442_v7, %s17960_s20  ;;  %v4763_v59 = vsel %vm4761_vm15, %v4748_v58, %v4750_v4  ;;  %4921 = vmatprep.mubr.f32.mxu1 %v17958_v0  ;;  %s14722_s20 = smov 112  }
 0x158   : > { %7974 = vrot.lane.b32.xlu0 %v442_v7, %s17962_s16  ;;  %13555 = vmatprep.subr.msk.mxu0 %vm482_vm1, %v4763_v59  ;;  %s18003_s16 = smov 96  }
 0x159   : > { %v4754_v61 = vpop.permute.xlu1 %4753  ;;  %4850 = vmatprep.mubr.f32.mxu0 %v17958_v0 }
 0x15a   : > { %v4752_v62 = vpop.permute.xlu0 %4751 }
 0x15b   : > { %v4764_v10 = vsel %vm4761_vm15, %v4750_v4, %v4752_v62  ;;  %v4765_v12 = vsel %vm4761_vm15, %v4752_v62, %v4754_v61 }
 0x15c   : > { %13558 = vmatprep.subr.msk.mxu1 %vm482_vm1, %v4765_v12 }
 0x15d   : > { %13559 = vmatpush1.msk.msra.mxu1 %vm482_vm1, %v4764_v10  ;;  %v4756_v16 = vpop.permute.xlu1 %4755  ;;  %v13566_v10 = vld [vmem:[%s17975_s1 + $0x70] sm:$0x3f] }
 0x15e   : > { %13560 = vmatmul.mubr.msk.f32.vlgmr.msra.gmra.mxu1 %vm478_vm2, %v13554_v13  ;;  %v4746_v27 = vpop.permute.xlu0 %4745  ;;  %14191 = vmatprep.subr.mxu1 %v17958_v0  ;;  %v4766_v41 = vsel %vm4761_vm15, %v4754_v61, %v4756_v16 }
 0x15f   : > { %v4762_v28 = vsel %vm4761_vm15, %v4746_v27, %v4748_v58  ;;  %14193 = vmatprep.mubr.msk.f32.mxu1 %vm14708_vm3, %v17958_v0  ;;  %v563_v29 = vpop.f32.mrf.mxu1 }
 0x160   : > { %13556 = vmatpush1.msk.msra.mxu0 %vm482_vm1, %v4762_v28 }
 0x161   : > { %13557 = vmatmul.mubr.msk.f32.vlgmr.msra.gmra.mxu0 %vm478_vm2, %v13554_v13  ;;  %v4760_v31 = vpop.permute.xlu1 %4759  ;;  %v15631_v33 = vpop.f32.mrf.mxu1 }
 0x162   : > { %v4758_v36 = vpop.permute.xlu0 %4757  ;;  %4992 = vmatprep.mubr.f32.mxu0 %v17958_v0 }
 0x163   : > { %v4768_v39 = vsel %vm4761_vm15, %v4758_v36, %v4760_v31  ;;  %v4767_v40 = vsel %vm4761_vm15, %v4756_v16, %v4758_v36  ;;  %v634_v2 = vpop.f32.mrf.mxu1  ;;  %vm9676_vm15 = vcmask 932864  }
 0x164   : > { %13561 = vmatprep.subr.msk.mxu0 %vm482_vm1, %v4767_v40  ;;  %14192 = vmatpush3.msk.msra.mxu1 %vm482_vm1, %v4768_v39  ;;  %v705_v44 = vpop.f32.mrf.mxu0 }
 0x165   : > { %13562 = vmatpush1.msk.msra.mxu0 %vm482_vm1, %v4766_v41  ;;  %14194 = vmatmul.mubr.msk.f32.vlgmr.msra.gmra.mxu1 %vm478_vm2, %v13554_v13  ;;  %v5083_v45 = vpop.permute.xlu1 %5082  ;;  %v15641_v49 = vpop.f32.mrf.mxu1 }
 0x166   : > { %17976 = vst [vmem:[#allocation6_spill] sm:$0xff] %v15641_v49  ;;  %13563 = vmatmul.mubr.msk.f32.vlgmr.msra.gmra.mxu0 %vm478_vm2, %v13554_v13  ;;  %v5081_v7 = vpop.permute.xlu0 %5080  ;;  %5254 = vmatprep.mubr.f32.mxu1 %v17958_v0  ;;  %v15645_v50 = vpop.f32.mrf.mxu0 }
 0x167   : > { %v5096_v1 = vsel %vm5094_vm9, %v5081_v7, %v5083_v45  ;;  %5183 = vmatprep.mubr.f32.mxu0 %v17958_v0 }
 0x168   : > { %13567 = vmatprep.subr.msk.mxu0 %vm482_vm1, %v5096_v1  ;;  %v776_v51 = vpop.f32.mrf.mxu1 }
 0x169   : > { %v5087_v52 = vpop.permute.xlu1 %5086  ;;  %v863_v54 = vpop.f32.mrf.mxu0 }
 0x16a   : > { %v5085_v4 = vpop.permute.xlu0 %5084  ;;  %v14130_v58 = vpop.f32.mrf.mxu1  ;;  %v864_v59 = vadd.f32 %v863_v54, %v563_v29 }
 0x16b   : > { %v5097_v61 = vsel %vm5094_vm9, %v5083_v45, %v5085_v4  ;;  %v5098_v62 = vsel %vm5094_vm9, %v5085_v4, %v5087_v52  ;;  %v15656_v12 = vpop.f32.mrf.mxu0 }
 0x16c   : > { %13570 = vmatprep.subr.msk.mxu1 %vm482_vm1, %v5098_v62 }
 0x16d   : > { %13571 = vmatpush1.msk.msra.mxu1 %vm482_vm1, %v5097_v61  ;;  %v5089_v13 = vpop.permute.xlu1 %5088  ;;  %v934_v16 = vpop.f32.mrf.mxu1 }
 0x16e   : > { %13572 = vmatmul.mubr.msk.f32.vlgmr.msra.gmra.mxu1 %vm478_vm2, %v13566_v10  ;;  %v5079_v27 = vpop.permute.xlu0 %5078  ;;  %14196 = vmatprep.subr.mxu1 %v17958_v0  ;;  %v935_v28 = vadd.f32 %v934_v16, %v634_v2  ;;  %v5099_v4 = vsel %vm5094_vm9, %v5087_v52, %v5089_v13 }
 0x16f   : > { %v5095_v29 = vsel %vm5094_vm9, %v5079_v27, %v5081_v7  ;;  %14198 = vmatprep.mubr.msk.f32.mxu1 %vm14708_vm3, %v17958_v0  ;;  %v15664_v31 = vpop.f32.mrf.mxu1 }
 0x170   : > { %17977 = vst [vmem:[#allocation7_spill] sm:$0xff] %v15664_v31  ;;  %13568 = vmatpush1.msk.msra.mxu0 %vm482_vm1, %v5095_v29  ;;  %v1005_v36 = vpop.f32.mrf.mxu0 }
 0x171   : > { %13569 = vmatmul.mubr.msk.f32.vlgmr.msra.gmra.mxu0 %vm478_vm2, %v13566_v10  ;;  %v5093_v39 = vpop.permute.xlu1 %5092  ;;  %v1006_v40 = vadd.f32 %v1005_v36, %v705_v44 }
 0x172   : > { %v5091_v41 = vpop.permute.xlu0 %5090  ;;  %5325 = vmatprep.mubr.f32.mxu0 %v17958_v0  ;;  %v1076_v45 = vpop.f32.mrf.mxu1 }
 0x173   : > { %v5101_v2 = vsel %vm5094_vm9, %v5091_v41, %v5093_v39  ;;  %v5100_v7 = vsel %vm5094_vm9, %v5089_v13, %v5091_v41  ;;  %v1077_v1 = vadd.f32 %v1076_v45, %v776_v51  ;;  %v15671_v54 = vpop.f32.mrf.mxu0  ;;  %vm9776_vm9 = vcmask 924672  }
 0x174   : > { %13573 = vmatprep.subr.msk.mxu0 %vm482_vm1, %v5100_v7  ;;  %14197 = vmatpush3.msk.msra.mxu1 %vm482_vm1, %v5101_v2  ;;  %v14135_v58 = vpop.f32.mrf.mxu1 }
 0x175   : > { %13574 = vmatpush1.msk.msra.mxu0 %vm482_vm1, %v5099_v4  ;;  %14199 = vmatmul.mubr.msk.f32.vlgmr.msra.gmra.mxu1 %vm478_vm2, %v13566_v10  ;;  %v5416_v44 = vpop.permute.xlu1 %5415  ;;  %v1189_v61 = vpop.f32.mrf.mxu0 }
 0x176   : > { %13575 = vmatmul.mubr.msk.f32.vlgmr.msra.gmra.mxu0 %vm478_vm2, %v13566_v10  ;;  %v5414_v62 = vpop.permute.xlu0 %5413  ;;  %5587 = vmatprep.mubr.f32.mxu1 %v17958_v0  ;;  %v1406_v51 = vadd.f32 %v1189_v61, %v864_v59  ;;  %v13578_v59 = vld [vmem:[%s17975_s1 + $0x78] sm:$0x3f] }
 0x177   : > { %v5429_v52 = vsel %vm5427_vm10, %v5414_v62, %v5416_v44  ;;  %5516 = vmatprep.mubr.f32.mxu0 %v17958_v0  ;;  %v1260_v13 = vpop.f32.mrf.mxu1  ;;  %v15683_v27 = vpop.f32.mrf.mxu0 }
 0x178   : > { %13579 = vmatprep.subr.msk.mxu0 %vm482_vm1, %v5429_v52  ;;  %v1408_v16 = vadd.f32 %v1260_v13, %v935_v28 }
 0x179   : > { %v5420_v29 = vpop.permute.xlu1 %5419  ;;  %v15685_v36 = vpop.f32.mrf.mxu1 }
 0x17a   : > { %17978 = vst [vmem:[#allocation8_spill] sm:$0xff] %v15685_v36  ;;  %v5418_v39 = vpop.permute.xlu0 %5417 }
 0x17b   : > { %v5430_v10 = vsel %vm5427_vm10, %v5416_v44, %v5418_v39  ;;  %v5431_v41 = vsel %vm5427_vm10, %v5418_v39, %v5420_v29  ;;  %v1402_v45 = vpop.f32.mrf.mxu1 }
 0x17c   : > { %13582 = vmatprep.subr.msk.mxu1 %vm482_vm1, %v5431_v41  ;;  %v1412_v2 = vadd.f32 %v1402_v45, %v1077_v1 }
 0x17d   : > { %13583 = vmatpush1.msk.msra.mxu1 %vm482_vm1, %v5430_v10  ;;  %v5422_v28 = vpop.permute.xlu1 %5421  ;;  %v1331_v7 = vpop.f32.mrf.mxu0 }
 0x17e   : > { %13584 = vmatmul.mubr.msk.f32.vlgmr.msra.gmra.mxu1 %vm478_vm2, %v13578_v59  ;;  %v5412_v4 = vpop.permute.xlu0 %5411  ;;  %14201 = vmatprep.subr.mxu1 %v17958_v0  ;;  %v1410_v58 = vadd.f32 %v1331_v7, %v1006_v40  ;;  %v14140_v44 = vpop.f32.mrf.mxu1 }
 0x17f   : > { %v5428_v61 = vsel %vm5427_vm10, %v5412_v4, %v5414_v62  ;;  %14203 = vmatprep.mubr.msk.f32.mxu1 %vm14708_vm3, %v17958_v0  ;;  %v15699_v52 = vpop.f32.mrf.mxu0  ;;  %v5432_v4 = vsel %vm5427_vm10, %v5420_v29, %v5422_v28 }
 0x180   : > { %13580 = vmatpush1.msk.msra.mxu0 %vm482_vm1, %v5428_v61  ;;  %v1593_v1 = vpop.f32.mrf.mxu1 }
 0x181   : > { %13581 = vmatmul.mubr.msk.f32.vlgmr.msra.gmra.mxu0 %vm478_vm2, %v13578_v59  ;;  %v5426_v13 = vpop.permute.xlu1 %5425  ;;  %v1741_v39 = vadd.f32 %v1593_v1, %v1408_v16 }
 0x182   : > { %v5424_v10 = vpop.permute.xlu0 %5423  ;;  %5658 = vmatprep.mubr.f32.mxu0 %v17958_v0  ;;  %v1522_v41 = vpop.f32.mrf.mxu0 }
 0x183   : > { %v5434_v40 = vsel %vm5427_vm10, %v5424_v10, %v5426_v13  ;;  %v5433_v62 = vsel %vm5427_vm10, %v5422_v28, %v5424_v10  ;;  %v1739_v45 = vadd.f32 %v1522_v41, %v1406_v51  ;;  %v15706_v7 = vpop.f32.mrf.mxu1  ;;  %vm10276_vm10 = vcmask 809984  }
 0x184   : > { %17979 = vst [vmem:[#allocation9_spill] sm:$0xff] %v15706_v7  ;;  %13585 = vmatprep.subr.msk.mxu0 %vm482_vm1, %v5433_v62  ;;  %14202 = vmatpush3.msk.msra.mxu1 %vm482_vm1, %v5434_v40  ;;  %v15711_v44 = vpop.f32.mrf.mxu0 }
 0x185   : > { %13586 = vmatpush1.msk.msra.mxu0 %vm482_vm1, %v5432_v4  ;;  %14204 = vmatmul.mubr.msk.f32.vlgmr.msra.gmra.mxu1 %vm478_vm2, %v13578_v59  ;;  %v5749_v16 = vpop.permute.xlu1 %5748  ;;  %v1735_v61 = vpop.f32.mrf.mxu1 }
 0x186   : > { %13587 = vmatmul.mubr.msk.f32.vlgmr.msra.gmra.mxu0 %vm478_vm2, %v13578_v59  ;;  %v5747_v51 = vpop.permute.xlu0 %5746  ;;  %5920 = vmatprep.mubr.f32.mxu1 %v17958_v0  ;;  %v1745_v1 = vadd.f32 %v1735_v61, %v1412_v2  ;;  %v1664_v29 = vpop.f32.mrf.mxu0  ;;  %v13590_v2 = vld [vmem:[%s17975_s1 + $0x80] sm:$0x3f] }
 0x187   : > { %v5762_v28 = vsel %vm5760_vm11, %v5747_v51, %v5749_v16  ;;  %5849 = vmatprep.mubr.f32.mxu0 %v17958_v0  ;;  %v1743_v13 = vadd.f32 %v1664_v29, %v1410_v58  ;;  %v14145_v10 = vpop.f32.mrf.mxu1 }
 0x188   : > { %13591 = vmatprep.subr.msk.mxu0 %vm482_vm1, %v5762_v28  ;;  %v15720_v40 = vpop.f32.mrf.mxu0 }
 0x189   : > { %v5753_v41 = vpop.permute.xlu1 %5752 }
 0x18a   : > { %v5751_v62 = vpop.permute.xlu0 %5750  ;;  %v1926_v4 = vpop.f32.mrf.mxu1 }
 0x18b   : > { %v5763_v59 = vsel %vm5760_vm11, %v5749_v16, %v5751_v62  ;;  %v5764_v7 = vsel %vm5760_vm11, %v5751_v62, %v5753_v41  ;;  %v2074_v61 = vadd.f32 %v1926_v4, %v1741_v39 }
 0x18c   : > { %13594 = vmatprep.subr.msk.mxu1 %vm482_vm1, %v5764_v7  ;;  %v15731_v16 = vpop.f32.mrf.mxu1 }
 0x18d   : > { %13595 = vmatpush1.msk.msra.mxu1 %vm482_vm1, %v5763_v59  ;;  %v5755_v58 = vpop.permute.xlu1 %5754  ;;  %v1855_v29 = vpop.f32.mrf.mxu0  ;;  %17980 = vst [vmem:[#allocation10_spill] sm:$0xff] %v15731_v16 }
 0x18e   : > { %13596 = vmatmul.mubr.msk.f32.vlgmr.msra.gmra.mxu1 %vm478_vm2, %v13590_v2  ;;  %v5745_v28 = vpop.permute.xlu0 %5744  ;;  %14206 = vmatprep.subr.mxu1 %v17958_v0  ;;  %v2072_v10 = vadd.f32 %v1855_v29, %v1739_v45 }
 0x18f   : > { %v5761_v62 = vsel %vm5760_vm11, %v5745_v28, %v5747_v51  ;;  %14208 = vmatprep.mubr.msk.f32.mxu1 %vm14708_vm3, %v17958_v0  ;;  %v15736_v39 = vpop.f32.mrf.mxu0  ;;  %v5765_v28 = vsel %vm5760_vm11, %v5753_v41, %v5755_v58 }
 0x190   : > { %13592 = vmatpush1.msk.msra.mxu0 %vm482_vm1, %v5761_v62 }
 0x191   : > { %13593 = vmatmul.mubr.msk.f32.vlgmr.msra.gmra.mxu0 %vm478_vm2, %v13590_v2  ;;  %v5759_v7 = vpop.permute.xlu1 %5758 }
 0x192   : > { %v5757_v4 = vpop.permute.xlu0 %5756  ;;  %5991 = vmatprep.mubr.f32.mxu0 %v17958_v0  ;;  %v2068_v59 = vpop.f32.mrf.mxu1 }
 0x193   : > { %v5766_v45 = vsel %vm5760_vm11, %v5755_v58, %v5757_v4  ;;  %v5767_v29 = vsel %vm5760_vm11, %v5757_v4, %v5759_v7  ;;  %v2078_v16 = vadd.f32 %v2068_v59, %v1745_v1  ;;  %v1997_v51 = vpop.f32.mrf.mxu0  ;;  %v17981_v7 = vmov 0.0  }
 0x194   : > { %13597 = vmatprep.subr.msk.mxu0 %vm482_vm1, %v5766_v45  ;;  %14207 = vmatpush3.msk.msra.mxu1 %vm482_vm1, %v5767_v29  ;;  %v2076_v62 = vadd.f32 %v1997_v51, %v1743_v13  ;;  %v14150_v36 = vpop.f32.mrf.mxu1  ;;  %vm9976_vm11 = vcmask 908288  }
 0x195   : > { %13598 = vmatpush1.msk.msra.mxu0 %vm482_vm1, %v5765_v28  ;;  %14209 = vmatmul.mubr.msk.f32.vlgmr.msra.gmra.mxu1 %vm478_vm2, %v13590_v2  ;;  %v6082_v0 = vpop.permute.xlu1 %6081  ;;  %v15753_v58 = vpop.f32.mrf.mxu0 }
 0x196   : > { %13599 = vmatmul.mubr.msk.f32.vlgmr.msra.gmra.mxu0 %vm478_vm2, %v13590_v2  ;;  %v6080_v31 = vpop.permute.xlu0 %6079  ;;  %6253 = vmatprep.mubr.f32.mxu1 %v17981_v7  ;;  %17982 = vst [vmem:[#allocation11_spill] sm:$0xff] %v15753_v58  ;;  %v13602_v2 = vld [vmem:[%s17975_s1 + $0x88] sm:$0x3f] }
 0x197   : > { %v6095_v1 = vsel %vm6093_vm12, %v6080_v31, %v6082_v0  ;;  %6182 = vmatprep.mubr.f32.mxu0 %v17981_v7 }
 0x198   : > { %13603 = vmatprep.subr.msk.mxu0 %vm482_vm1, %v6095_v1 }
 0x199   : > { %v6086_v41 = vpop.permute.xlu1 %6085 }
 0x19a   : > { %v6084_v36 = vpop.permute.xlu0 %6083  ;;  %v2259_v13 = vpop.f32.mrf.mxu1 }
 0x19b   : > { %v6096_v4 = vsel %vm6093_vm12, %v6082_v0, %v6084_v36  ;;  %v6097_v59 = vsel %vm6093_vm12, %v6084_v36, %v6086_v41  ;;  %v2407_v45 = vadd.f32 %v2259_v13, %v2074_v61 }
 0x19c   : > { %13606 = vmatprep.subr.msk.mxu1 %vm482_vm1, %v6097_v59  ;;  %v15764_v0 = vpop.f32.mrf.mxu1 }
 0x19d   : > { %13607 = vmatpush1.msk.msra.mxu1 %vm482_vm1, %v6096_v4  ;;  %v6088_v29 = vpop.permute.xlu1 %6087  ;;  %v2188_v51 = vpop.f32.mrf.mxu0  ;;  %17983 = vst [vmem:[#allocation12_spill] sm:$0xff] %v15764_v0 }
 0x19e   : > { %13608 = vmatmul.mubr.msk.f32.vlgmr.msra.gmra.mxu1 %vm478_vm2, %v13602_v2  ;;  %v6078_v28 = vpop.permute.xlu0 %6077  ;;  %14211 = vmatprep.subr.mxu1 %v17981_v7  ;;  %v2405_v1 = vadd.f32 %v2188_v51, %v2072_v10 }
 0x19f   : > { %v6094_v36 = vsel %vm6093_vm12, %v6078_v28, %v6080_v31  ;;  %14213 = vmatprep.mubr.msk.f32.mxu1 %vm14708_vm3, %v17981_v7  ;;  %v15769_v61 = vpop.f32.mrf.mxu0  ;;  %v6098_v28 = vsel %vm6093_vm12, %v6086_v41, %v6088_v29 }
 0x1a0   : > { %17984 = vst [vmem:[#allocation13_spill] sm:$0xff] %v15769_v61  ;;  %13604 = vmatpush1.msk.msra.mxu0 %vm482_vm1, %v6094_v36 }
 0x1a1   : > { %13605 = vmatmul.mubr.msk.f32.vlgmr.msra.gmra.mxu0 %vm478_vm2, %v13602_v2  ;;  %v6092_v13 = vpop.permute.xlu1 %6091 }
 0x1a2   : > { %v6090_v4 = vpop.permute.xlu0 %6089  ;;  %6324 = vmatprep.mubr.f32.mxu0 %v17981_v7  ;;  %v2401_v59 = vpop.f32.mrf.mxu1 }
 0x1a3   : > { %v6099_v10 = vsel %vm6093_vm12, %v6088_v29, %v6090_v4  ;;  %v6100_v51 = vsel %vm6093_vm12, %v6090_v4, %v6092_v13  ;;  %v2411_v0 = vadd.f32 %v2401_v59, %v2078_v16  ;;  %v2330_v31 = vpop.f32.mrf.mxu0  ;;  %vm10476_vm12 = vcmask 793600  }
 0x1a4   : > { %13609 = vmatprep.subr.msk.mxu0 %vm482_vm1, %v6099_v10  ;;  %14212 = vmatpush3.msk.msra.mxu1 %vm482_vm1, %v6100_v51  ;;  %v2409_v36 = vadd.f32 %v2330_v31, %v2076_v62  ;;  %v14155_v49 = vpop.f32.mrf.mxu1 }
 0x1a5   : > { %13610 = vmatpush1.msk.msra.mxu0 %vm482_vm1, %v6098_v28  ;;  %14214 = vmatmul.mubr.msk.f32.vlgmr.msra.gmra.mxu1 %vm478_vm2, %v13602_v2  ;;  %v6415_v58 = vpop.permute.xlu1 %6414  ;;  %v15786_v29 = vpop.f32.mrf.mxu0 }
 0x1a6   : > { %13611 = vmatmul.mubr.msk.f32.vlgmr.msra.gmra.mxu0 %vm478_vm2, %v13602_v2  ;;  %v6413_v61 = vpop.permute.xlu0 %6412  ;;  %6586 = vmatprep.mubr.f32.mxu1 %v17981_v7  ;;  %17985 = vst [vmem:[#allocation14_spill] sm:$0xff] %v15786_v29  ;;  %v13614_v2 = vld [vmem:[%s17975_s1 + $0x90] sm:$0x3f] }
 0x1a7   : > { %v6428_v16 = vsel %vm6426_vm13, %v6413_v61, %v6415_v58  ;;  %6515 = vmatprep.mubr.f32.mxu0 %v17981_v7 }
 0x1a8   : > { %13615 = vmatprep.subr.msk.mxu0 %vm482_vm1, %v6428_v16 }
 0x1a9   : > { %v6419_v41 = vpop.permute.xlu1 %6418 }
 0x1aa   : > { %v6417_v49 = vpop.permute.xlu0 %6416  ;;  %v2592_v62 = vpop.f32.mrf.mxu1 }
 0x1ab   : > { %v6429_v13 = vsel %vm6426_vm13, %v6415_v58, %v6417_v49  ;;  %v6430_v4 = vsel %vm6426_vm13, %v6417_v49, %v6419_v41  ;;  %v2740_v59 = vadd.f32 %v2592_v62, %v2407_v45  ;;  %v8572_v49 = vld [vmem:[%s17988_s2] sm:$0x3f]  ;;  %v14719_v62 = vmov 0   ;;  %s18002_s2 = smov 127  }
 0x1ac   : > { %13618 = vmatprep.subr.msk.mxu1 %vm482_vm1, %v6430_v4  ;;  %v15797_v58 = vpop.f32.mrf.mxu1  ;;  %14601 = vset.pattern.permute.xlu0 %v14719_v62 }
 0x1ad   : > { %13619 = vmatpush1.msk.msra.mxu1 %vm482_vm1, %v6429_v13  ;;  %v6421_v10 = vpop.permute.xlu1 %6420  ;;  %v2521_v51 = vpop.f32.mrf.mxu0  ;;  %17986 = vst [vmem:[#allocation15_spill] sm:$0xff] %v15797_v58  ;;  %8575 = vperm.xlu0 %14601, %v8572_v49  }
 0x1ae   : > { %13620 = vmatmul.mubr.msk.f32.vlgmr.msra.gmra.mxu1 %vm478_vm2, %v13614_v2  ;;  %v6411_v31 = vpop.permute.xlu0 %6410  ;;  %14216 = vmatprep.subr.mxu1 %v17981_v7  ;;  %v2738_v28 = vadd.f32 %v2521_v51, %v2405_v1  ;;  %v6431_v29 = vsel %vm6426_vm13, %v6419_v41, %v6421_v10 }
 0x1af   : > { %v6427_v16 = vsel %vm6426_vm13, %v6411_v31, %v6413_v61  ;;  %14218 = vmatprep.mubr.msk.f32.mxu1 %vm14708_vm3, %v17981_v7  ;;  %v15802_v45 = vpop.f32.mrf.mxu0  ;;  %14627 = vset.pattern.permute.xlu1 %v14719_v62 }
 0x1b0   : > { %17987 = vst [vmem:[#allocation16_spill] sm:$0xff] %v15802_v45  ;;  %13616 = vmatpush1.msk.msra.mxu0 %vm482_vm1, %v6427_v16 }
 0x1b1   : > { %13617 = vmatmul.mubr.msk.f32.vlgmr.msra.gmra.mxu0 %vm478_vm2, %v13614_v2  ;;  %v6425_v1 = vpop.permute.xlu1 %6424 }
 0x1b2   : > { %v6423_v13 = vpop.permute.xlu0 %6422  ;;  %6657 = vmatprep.mubr.f32.mxu0 %v17981_v7  ;;  %v2734_v61 = vpop.f32.mrf.mxu1 }
 0x1b3   : > { %v6432_v4 = vsel %vm6426_vm13, %v6421_v10, %v6423_v13  ;;  %v6433_v51 = vsel %vm6426_vm13, %v6423_v13, %v6425_v1  ;;  %v2744_v31 = vadd.f32 %v2734_v61, %v2411_v0  ;;  %v2663_v58 = vpop.f32.mrf.mxu0  ;;  %vm10176_vm13 = vcmask 818176  }
 0x1b4   : > { %13621 = vmatprep.subr.msk.mxu0 %vm482_vm1, %v6432_v4  ;;  %14217 = vmatpush3.msk.msra.mxu1 %vm482_vm1, %v6433_v51  ;;  %v2742_v16 = vadd.f32 %v2663_v58, %v2409_v36  ;;  %v14160_v49 = vpop.f32.mrf.mxu1 }
 0x1b5   : > { %13622 = vmatpush1.msk.msra.mxu0 %vm482_vm1, %v6431_v29  ;;  %14219 = vmatmul.mubr.msk.f32.vlgmr.msra.gmra.mxu1 %vm478_vm2, %v13614_v2  ;;  %v6748_v62 = vpop.permute.xlu1 %6747  ;;  %v15822_v10 = vpop.f32.mrf.mxu0 }
 0x1b6   : > { %13623 = vmatmul.mubr.msk.f32.vlgmr.msra.gmra.mxu0 %vm478_vm2, %v13614_v2  ;;  %v6746_v45 = vpop.permute.xlu0 %6745  ;;  %6919 = vmatprep.mubr.f32.mxu1 %v17981_v7  ;;  %v13626_v2 = vld [vmem:[%s17975_s1 + $0x98] sm:$0x3f] }
 0x1b7   : > { %v6761_v0 = vsel %vm6759_vm14, %v6746_v45, %v6748_v62  ;;  %6848 = vmatprep.mubr.f32.mxu0 %v17981_v7 }
 0x1b8   : > { %13627 = vmatprep.subr.msk.mxu0 %vm482_vm1, %v6761_v0 }
 0x1b9   : > { %v6752_v41 = vpop.permute.xlu1 %6751 }
 0x1ba   : > { %v6750_v36 = vpop.permute.xlu0 %6749  ;;  %v2925_v58 = vpop.f32.mrf.mxu1 }
 0x1bb   : > { %v6762_v29 = vsel %vm6759_vm14, %v6748_v62, %v6750_v36  ;;  %v6763_v1 = vsel %vm6759_vm14, %v6750_v36, %v6752_v41  ;;  %v3073_v13 = vadd.f32 %v2925_v58, %v2740_v59 }
 0x1bc   : > { %13630 = vmatprep.subr.msk.mxu1 %vm482_vm1, %v6763_v1  ;;  %v15833_v62 = vpop.f32.mrf.mxu1 }
 0x1bd   : > { %13631 = vmatpush1.msk.msra.mxu1 %vm482_vm1, %v6762_v29  ;;  %v6754_v61 = vpop.permute.xlu1 %6753  ;;  %v2854_v4 = vpop.f32.mrf.mxu0  ;;  %17989 = vst [vmem:[#allocation17_spill] sm:$0xff] %v15833_v62 }
 0x1be   : > { %13632 = vmatmul.mubr.msk.f32.vlgmr.msra.gmra.mxu1 %vm478_vm2, %v13626_v2  ;;  %v6744_v51 = vpop.permute.xlu0 %6743  ;;  %14221 = vmatprep.subr.mxu1 %v17981_v7  ;;  %v3071_v49 = vadd.f32 %v2854_v4, %v2738_v28 }
 0x1bf   : > { %v6760_v0 = vsel %vm6759_vm14, %v6744_v51, %v6746_v45  ;;  %14223 = vmatprep.mubr.msk.f32.mxu1 %vm14708_vm3, %v17981_v7  ;;  %v15838_v59 = vpop.f32.mrf.mxu0  ;;  %v6764_v51 = vsel %vm6759_vm14, %v6752_v41, %v6754_v61 }
 0x1c0   : > { %13628 = vmatpush1.msk.msra.mxu0 %vm482_vm1, %v6760_v0 }
 0x1c1   : > { %13629 = vmatmul.mubr.msk.f32.vlgmr.msra.gmra.mxu0 %vm478_vm2, %v13626_v2  ;;  %v6758_v36 = vpop.permute.xlu1 %6757 }
 0x1c2   : > { %v6756_v58 = vpop.permute.xlu0 %6755  ;;  %6990 = vmatprep.mubr.f32.mxu0 %v17981_v7  ;;  %v3067_v29 = vpop.f32.mrf.mxu1 }
 0x1c3   : > { %v6765_v28 = vsel %vm6759_vm14, %v6754_v61, %v6756_v58  ;;  %v6766_v1 = vsel %vm6759_vm14, %v6756_v58, %v6758_v36  ;;  %v3077_v4 = vadd.f32 %v3067_v29, %v2744_v31  ;;  %v2996_v45 = vpop.f32.mrf.mxu0  ;;  %v13638_v31 = vld [vmem:[%s17975_s1 + $0xa0] sm:$0x3f]  ;;  %vm10675_vm14 = vcmask 703488  }
 0x1c4   : > { %13633 = vmatprep.subr.msk.mxu0 %vm482_vm1, %v6765_v28  ;;  %14222 = vmatpush3.msk.msra.mxu1 %vm482_vm1, %v6766_v1  ;;  %v3075_v0 = vadd.f32 %v2996_v45, %v2742_v16  ;;  %v14165_v62 = vpop.f32.mrf.mxu1  ;;  %v866_v45 = vadd.f32 %v15656_v12, %v15631_v33 }
 0x1c5   : > { %13634 = vmatpush1.msk.msra.mxu0 %vm482_vm1, %v6764_v51  ;;  %14224 = vmatmul.mubr.msk.f32.vlgmr.msra.gmra.mxu1 %vm478_vm2, %v13626_v2 }
 0x1c6   : > { %13635 = vmatmul.mubr.msk.f32.vlgmr.msra.gmra.mxu0 %vm478_vm2, %v13626_v2  ;;  %13642 = vmatprep.subr.msk.mxu1 %vm482_vm1, %v15568_v32  ;;  %v15865_v32 = vpop.f32.mrf.mxu0  ;;  %v7375_v16 = vpop.permute.xlu0 %7374 }
 0x1c7   : > { %13639 = vmatprep.subr.msk.mxu0 %vm482_vm1, %v15554_v25  ;;  %13643 = vmatpush1.msk.msra.mxu1 %vm482_vm1, %v14879_v3 }
 0x1c8   : > { %13640 = vmatpush1.msk.msra.mxu0 %vm482_vm1, %v14894_v6  ;;  %7216 = vmatprep.mubr.f32.mxu1 %v17981_v7 }
 0x1c9   : > { %14226 = vmatprep.subr.mxu1 %v17981_v7  ;;  %7145 = vmatprep.mubr.f32.mxu0 %v17981_v7 }
 0x1ca   : > { %13644 = vmatmul.mubr.msk.f32.vlgmr.msra.gmra.mxu1 %vm478_vm2, %v13638_v31  ;;  %13645 = vmatprep.subr.msk.mxu0 %vm482_vm1, %v15545_v11  ;;  %v3258_v3 = vpop.f32.mrf.mxu1 }
 0x1cb   : > { %14227 = vmatpush3.msk.msra.mxu1 %vm482_vm1, %v14905_v8  ;;  %13641 = vmatmul.mubr.msk.f32.vlgmr.msra.gmra.mxu0 %vm478_vm2, %v13638_v31  ;;  %v3406_v6 = vadd.f32 %v3258_v3, %v3073_v13  ;;  %v1008_v3 = vadd.f32 %v15671_v54, %v15645_v50  ;;  %v17990_v50 = vld [vmem:[#allocation13_spill] sm:$0xff] }
 0x1cc   : > { %13646 = vmatpush1.msk.msra.mxu0 %vm482_vm1, %v14890_v5  ;;  %13654 = vmatprep.subr.msk.mxu1 %vm482_vm1, %v15032_v23  ;;  %v15883_v25 = vpop.f32.mrf.mxu1  ;;  %v13650_v5 = vld [vmem:[%s17975_s1 + $0xa8] sm:$0x3f] }
 0x1cd   : > { %13651 = vmatprep.subr.msk.mxu0 %vm482_vm1, %v15015_v21  ;;  %14228 = vmatprep.mubr.msk.f32.mxu1 %vm14708_vm3, %v17981_v7  ;;  %v3187_v11 = vpop.f32.mrf.mxu0 }
 0x1ce   : > { %7287 = vmatprep.mubr.f32.mxu0 %v17981_v7  ;;  %14229 = vmatmul.mubr.msk.f32.vlgmr.msra.gmra.mxu1 %vm478_vm2, %v13638_v31  ;;  %v3404_v8 = vadd.f32 %v3187_v11, %v3071_v49 }
 0x1cf   : > { %13655 = vmatpush1.msk.msra.mxu1 %vm482_vm1, %v15012_v19  ;;  %13647 = vmatmul.mubr.msk.f32.vlgmr.msra.gmra.mxu0 %vm478_vm2, %v13638_v31  ;;  %v15891_v21 = vpop.f32.mrf.mxu0  ;;  %v7376_v19 = vsel %vm470_vm0, %v15009_v18, %v7375_v16  ;;  %v7675_v18 = vpop.permute.xlu1 %7674 }
 0x1d0   : > { %13652 = vmatpush1.msk.msra.mxu0 %vm482_vm1, %v14998_v15  ;;  %7517 = vmatprep.mubr.f32.mxu1 %v17981_v7 }
 0x1d1   : > { %13657 = vmatprep.subr.msk.mxu0 %vm482_vm1, %v15039_v26  ;;  %14231 = vmatprep.subr.mxu1 %v17981_v7 }
 0x1d2   : > { %7446 = vmatprep.mubr.f32.mxu0 %v17981_v7  ;;  %13656 = vmatmul.mubr.msk.f32.vlgmr.msra.gmra.mxu1 %vm478_vm2, %v13650_v5  ;;  %v3400_v23 = vpop.f32.mrf.mxu1  ;;  %v3329_v41 = vpop.f32.mrf.mxu0 }
 0x1d3   : > { %14232 = vmatpush3.msk.msra.mxu1 %vm482_vm1, %v7376_v19  ;;  %13653 = vmatmul.mubr.msk.f32.vlgmr.msra.gmra.mxu0 %vm478_vm2, %v13650_v5  ;;  %v3410_v15 = vadd.f32 %v3400_v23, %v3077_v4  ;;  %v3408_v2 = vadd.f32 %v3329_v41, %v3075_v0  ;;  %v1407_v0 = vadd.f32 %v15683_v27, %v866_v45 }
 0x1d4   : > { %13658 = vmatpush1.msk.msra.mxu0 %vm482_vm1, %v15021_v22  ;;  %13666 = vmatprep.subr.msk.mxu1 %vm482_vm1, %v15121_v42  ;;  %v14170_v26 = vpop.f32.mrf.mxu1  ;;  %v13662_v22 = vld [vmem:[%s17975_s1 + $0xb0] sm:$0x3f]  ;;  %v7975_v42 = vpop.permute.xlu0 %7974 }
 0x1d5   : > { %13663 = vmatprep.subr.msk.mxu0 %vm482_vm1, %v15105_v38  ;;  %14233 = vmatprep.mubr.msk.f32.mxu1 %vm14708_vm3, %v17981_v7  ;;  %v7676_v38 = vsel %vm1098_vm4, %v15089_v35, %v7675_v18  ;;  %v17991_v18 = vld [vmem:[#allocation11_spill] sm:$0xff] }
 0x1d6   : > { %7588 = vmatprep.mubr.f32.mxu0 %v17981_v7  ;;  %14234 = vmatmul.mubr.msk.f32.vlgmr.msra.gmra.mxu1 %vm478_vm2, %v13650_v5 }
 0x1d7   : > { %13667 = vmatpush1.msk.msra.mxu1 %vm482_vm1, %v15087_v34  ;;  %13659 = vmatmul.mubr.msk.f32.vlgmr.msra.gmra.mxu0 %vm478_vm2, %v13650_v5  ;;  %v1411_v5 = vadd.f32 %v15699_v52, %v1008_v3  ;;  %v17993_v52 = vld [vmem:[#allocation14_spill] sm:$0xff] }
 0x1d8   : > { %13664 = vmatpush1.msk.msra.mxu0 %vm482_vm1, %v15069_v30  ;;  %7817 = vmatprep.mubr.f32.mxu1 %v17981_v7  ;;  %v15937_v30 = vpop.f32.mrf.mxu0 }
 0x1d9   : > { %13669 = vmatprep.subr.msk.mxu0 %vm482_vm1, %v15133_v46  ;;  %14236 = vmatprep.subr.mxu1 %v17981_v7  ;;  %v1744_v27 = vadd.f32 %v15720_v40, %v1411_v5 }
 0x1da   : > { %7746 = vmatprep.mubr.f32.mxu0 %v17981_v7  ;;  %13668 = vmatmul.mubr.msk.f32.vlgmr.msra.gmra.mxu1 %vm478_vm2, %v13662_v22 }
 0x1db   : > { %14237 = vmatpush3.msk.msra.mxu1 %vm482_vm1, %v7676_v38  ;;  %13665 = vmatmul.mubr.msk.f32.vlgmr.msra.gmra.mxu0 %vm478_vm2, %v13662_v22 }
 0x1dc   : > { %13670 = vmatpush1.msk.msra.mxu0 %vm482_vm1, %v15102_v37  ;;  %13678 = vmatprep.subr.msk.mxu1 %vm482_vm1, %v15190_v57  ;;  %v13674_v37 = vld [vmem:[%s17975_s1 + $0xb8] sm:$0x3f] }
 0x1dd   : > { %13675 = vmatprep.subr.msk.mxu0 %vm482_vm1, %v15148_v48  ;;  %14238 = vmatprep.mubr.msk.f32.mxu1 %vm14708_vm3, %v17981_v7  ;;  %v3591_v34 = vpop.f32.mrf.mxu1 }
 0x1de   : > { %7888 = vmatprep.mubr.f32.mxu0 %v17981_v7  ;;  %14239 = vmatmul.mubr.msk.f32.vlgmr.msra.gmra.mxu1 %vm478_vm2, %v13662_v22  ;;  %v3739_v35 = vadd.f32 %v3591_v34, %v3406_v6 }
 0x1df   : > { %13679 = vmatpush1.msk.msra.mxu1 %vm482_vm1, %v15139_v47  ;;  %13671 = vmatmul.mubr.msk.f32.vlgmr.msra.gmra.mxu0 %vm478_vm2, %v13662_v22  ;;  %v7976_v47 = vsel %vm1431_vm5, %v15169_v53, %v7975_v42  ;;  %v15961_v57 = vpop.f32.mrf.mxu1  ;;  %v2077_v22 = vadd.f32 %v17991_v18, %v1744_v27 }
 0x1e0   : > { %13676 = vmatpush1.msk.msra.mxu0 %vm482_vm1, %v15129_v43  ;;  %8117 = vmatprep.mubr.f32.mxu1 %v17981_v7  ;;  %v3520_v46 = vpop.f32.mrf.mxu0 }
 0x1e1   : > { %13681 = vmatprep.subr.msk.mxu0 %vm482_vm1, %v15176_v55  ;;  %14241 = vmatprep.subr.mxu1 %v17981_v7  ;;  %v3737_v48 = vadd.f32 %v3520_v46, %v3404_v8  ;;  %v8275_v55 = vpop.permute.xlu1 %8274  ;;  %v1740_v8 = vadd.f32 %v15711_v44, %v1407_v0  ;;  %v17992_v44 = vld [vmem:[#allocation16_spill] sm:$0xff] }
 0x1e2   : > { %8046 = vmatprep.mubr.f32.mxu0 %v17981_v7  ;;  %13680 = vmatmul.mubr.msk.f32.vlgmr.msra.gmra.mxu1 %vm478_vm2, %v13674_v37  ;;  %v15963_v13 = vpop.f32.mrf.mxu0 }
 0x1e3   : > { %14242 = vmatpush3.msk.msra.mxu1 %vm482_vm1, %v7976_v47  ;;  %13677 = vmatmul.mubr.msk.f32.vlgmr.msra.gmra.mxu0 %vm478_vm2, %v13674_v37  ;;  %v2073_v41 = vadd.f32 %v15736_v39, %v1740_v8 }
 0x1e4   : > { %13682 = vmatpush1.msk.msra.mxu0 %vm482_vm1, %v15180_v56  ;;  %13690 = vmatprep.subr.msk.mxu1 %vm482_vm1, %v15252_v24  ;;  %v13686_v56 = vld [vmem:[%s17975_s1 + $0xc0] sm:$0x3f]  ;;  %s14721_s1 = smov 113  }
 0x1e5   : > { %13687 = vmatprep.subr.msk.mxu0 %vm482_vm1, %v15213_v63  ;;  %14243 = vmatprep.mubr.msk.f32.mxu1 %vm14708_vm3, %v17981_v7  ;;  %v2406_v54 = vadd.f32 %v17990_v50, %v2073_v41 }
 0x1e6   : > { %8188 = vmatprep.mubr.f32.mxu0 %v17981_v7  ;;  %14244 = vmatmul.mubr.msk.f32.vlgmr.msra.gmra.mxu1 %vm478_vm2, %v13674_v37  ;;  %v3733_v43 = vpop.f32.mrf.mxu1  ;;  %v3662_v53 = vpop.f32.mrf.mxu0 }
 0x1e7   : > { %13691 = vmatpush1.msk.msra.mxu1 %vm482_vm1, %v15216_v9  ;;  %13683 = vmatmul.mubr.msk.f32.vlgmr.msra.gmra.mxu0 %vm478_vm2, %v13674_v37  ;;  %v3743_v63 = vadd.f32 %v3733_v43, %v3410_v15  ;;  %v3741_v24 = vadd.f32 %v3662_v53, %v3408_v2  ;;  %v8276_v9 = vsel %vm1764_vm6, %v15239_v14, %v8275_v55 }
 0x1e8   : > { %13688 = vmatpush1.msk.msra.mxu0 %vm482_vm1, %v15200_v60  ;;  %8417 = vmatprep.mubr.f32.mxu1 %v17981_v7  ;;  %v14175_v61 = vpop.f32.mrf.mxu1  ;;  %v3664_v60 = vpop.f32.mrf.mxu0  ;;  %v2739_v38 = vadd.f32 %v17992_v44, %v2406_v54 }
 0x1e9   : > { %13693 = vmatprep.subr.msk.mxu0 %vm482_vm1, %v15246_v17  ;;  %14246 = vmatprep.subr.mxu1 %v17981_v7 }
 0x1ea   : > { %8346 = vmatprep.mubr.f32.mxu0 %v17981_v7  ;;  %13692 = vmatmul.mubr.msk.f32.vlgmr.msra.gmra.mxu1 %vm478_vm2, %v13686_v56  ;;  %v3072_v39 = vadd.f32 %v15838_v59, %v2739_v38 }
 0x1eb   : > { %14247 = vmatpush3.msk.msra.mxu1 %vm482_vm1, %v8276_v9  ;;  %13689 = vmatmul.mubr.msk.f32.vlgmr.msra.gmra.mxu0 %vm478_vm2, %v13686_v56 }
 0x1ec   : > { %13694 = vmatpush1.msk.msra.mxu0 %vm482_vm1, %v15249_v20  ;;  %14248 = vmatprep.mubr.msk.f32.mxu1 %vm14708_vm3, %v17981_v7  ;;  %v3405_v53 = vadd.f32 %v15891_v21, %v3072_v39  ;;  %vm8893_vm1 = vcmask 1046528  }
 0x1ed   : > { %8488 = vmatprep.mubr.f32.mxu0 %v17981_v7 }
 0x1ee   : > { %14249 = vmatmul.mubr.msk.f32.vlgmr.msra.gmra.mxu1 %vm478_vm2, %v13686_v56  ;;  %v3924_v14 = vpop.f32.mrf.mxu1 }
 0x1ef   : > { %13695 = vmatmul.mubr.msk.f32.vlgmr.msra.gmra.mxu0 %vm478_vm2, %v13686_v56  ;;  %v4072_v17 = vadd.f32 %v3924_v14, %v3739_v35  ;;  %v2410_v35 = vadd.f32 %v17993_v52, %v2077_v22  ;;  %v3738_v14 = vadd.f32 %v15963_v13, %v3405_v53  ;;  %vm9203_vm2 = vcmask 1045504  }
 0x1f0   : > { %v16002_v36 = vpop.f32.mrf.mxu1 }
 0x1f1   : > { %v3853_v49 = vpop.f32.mrf.mxu0  ;;  %v2743_v40 = vadd.f32 %v15822_v10, %v2410_v35 }
 0x1f2   : > { %v4070_v62 = vadd.f32 %v3853_v49, %v3737_v48 }
 0x1f3   : > { %v3855_v58 = vpop.f32.mrf.mxu0 }
 0x1f4   : > { %v4071_v59 = vadd.f32 %v3855_v58, %v3738_v14 }
 0x1f6   : > { %v4066_v29 = vpop.f32.mrf.mxu1  ;;  %v3995_v28 = vpop.f32.mrf.mxu0 }
 0x1f7   : > { %v4076_v20 = vadd.f32 %v4066_v29, %v3743_v63  ;;  %v4074_v1 = vadd.f32 %v3995_v28, %v3741_v24  ;;  %v3076_v63 = vadd.f32 %v15865_v32, %v2743_v40 }
 0x1f8   : > { %v14180_v4 = vpop.f32.mrf.mxu1  ;;  %v3997_v51 = vpop.f32.mrf.mxu0 }
 0x1fe   : > { %v4257_v31 = vpop.f32.mrf.mxu1 }
 0x1ff   : > { %v4405_v6 = vadd.f32 %v4257_v31, %v4072_v17  ;;  %v3409_v17 = vadd.f32 %v15937_v30, %v3076_v63 }
 0x200   : > { %v16011_v23 = vpop.f32.mrf.mxu1 }
 0x201   : > { %v4186_v11 = vpop.f32.mrf.mxu0 }
 0x202   : > { %v4403_v16 = vadd.f32 %v4186_v11, %v4070_v62  ;;  %v3742_v62 = vadd.f32 %v3664_v60, %v3409_v17 }
 0x203   : > { %v4188_v19 = vpop.f32.mrf.mxu0 }
 0x204   : > { %v4404_v28 = vadd.f32 %v4188_v19, %v4071_v59  ;;  %v4075_v4 = vadd.f32 %v3997_v51, %v3742_v62  ;;  %v17994_v62 = vld [vmem:[#allocation6_spill] sm:$0xff] }
 0x206   : > { %v4399_v33 = vpop.f32.mrf.mxu1  ;;  %v4328_v12 = vpop.f32.mrf.mxu0 }
 0x207   : > { %v4409_v15 = vadd.f32 %v4399_v33, %v4076_v20  ;;  %v4407_v2 = vadd.f32 %v4328_v12, %v4074_v1 }
 0x208   : > { %v14185_v26 = vpop.f32.mrf.mxu1  ;;  %v4330_v42 = vpop.f32.mrf.mxu0 }
 0x209   : > { %v4408_v31 = vadd.f32 %v4330_v42, %v4075_v4 }
 0x20e   : > { %v4590_v34 = vpop.f32.mrf.mxu1 }
 0x20f   : > { %v4738_v37 = vadd.f32 %v4590_v34, %v4405_v6 }
 0x210   : > { %v16021_v43 = vpop.f32.mrf.mxu1 }
 0x211   : > { %v4519_v46 = vpop.f32.mrf.mxu0 }
 0x212   : > { %v4736_v48 = vadd.f32 %v4519_v46, %v4403_v16 }
 0x213   : > { %v4521_v47 = vpop.f32.mrf.mxu0 }
 0x214   : > { %v4737_v1 = vadd.f32 %v4521_v47, %v4404_v28 }
 0x216   : > { %v4732_v55 = vpop.f32.mrf.mxu1  ;;  %v4661_v56 = vpop.f32.mrf.mxu0 }
 0x217   : > { %v4742_v24 = vadd.f32 %v4732_v55, %v4409_v15  ;;  %v4740_v61 = vadd.f32 %v4661_v56, %v4407_v2 }
 0x218   : > { %v14190_v9 = vpop.f32.mrf.mxu1  ;;  %v4663_v10 = vpop.f32.mrf.mxu0 }
 0x219   : > { %v4741_v30 = vadd.f32 %v4663_v10, %v4408_v31  ;;  %v17995_v10 = vld [vmem:[#allocation7_spill] sm:$0xff] }
 0x21e   : > { %v4923_v49 = vpop.f32.mrf.mxu1 }
 0x21f   : > { %v5071_v29 = vadd.f32 %v4923_v49, %v4738_v37 }
 0x220   : > { %v16027_v45 = vpop.f32.mrf.mxu1 }
 0x221   : > { %v4852_v20 = vpop.f32.mrf.mxu0 }
 0x222   : > { %v5069_v21 = vadd.f32 %v4852_v20, %v4736_v48  ;;  %v17996_v20 = vld [vmem:[#allocation8_spill] sm:$0xff] }
 0x223   : > { %v4854_v32 = vpop.f32.mrf.mxu0 }
 0x224   : > { %v16029_v0 = vadd.f32 %v4854_v32, %v4737_v1  ;;  %v17997_v32 = vld [vmem:[#allocation9_spill] sm:$0xff] }
 0x225   : > { %v5065_v3 = vpop.f32.mrf.mxu1 }
 0x226   : > { %v5075_v13 = vadd.f32 %v5065_v3, %v4742_v24  ;;  %v4994_v6 = vpop.f32.mrf.mxu0 }
 0x227   : > { %v16031_v58 = vadd.f32 %v4994_v6, %v4740_v61  ;;  %v14195_v60 = vpop.f32.mrf.mxu1 }
 0x228   : > { %v4996_v11 = vpop.f32.mrf.mxu0  ;;  %v17998_v60 = vld [vmem:[#allocation10_spill] sm:$0xff] }
 0x229   : > { %v16033_v8 = vadd.f32 %v4996_v11, %v4741_v30 }
 0x22e   : > { %v5256_v16 = vpop.f32.mrf.mxu1 }
 0x22f   : > { %v5404_v5 = vadd.f32 %v5256_v16, %v5071_v29  ;;  %v937_v29 = vadd.f32 %v17995_v10, %v17994_v62 }
 0x230   : > { %v16037_v41 = vpop.f32.mrf.mxu1 }
 0x231   : > { %v5185_v19 = vpop.f32.mrf.mxu0  ;;  %v1409_v1 = vadd.f32 %v17996_v20, %v937_v29 }
 0x232   : > { %v16035_v51 = vadd.f32 %v5185_v19, %v5069_v21  ;;  %v17999_v19 = vld [vmem:[#allocation12_spill] sm:$0xff] }
 0x233   : > { %v16039_v2 = vpop.f32.mrf.mxu0  ;;  %v1742_v31 = vadd.f32 %v17997_v32, %v1409_v1 }
 0x235   : > { %v5398_v33 = vpop.f32.mrf.mxu1  ;;  %v2075_v11 = vadd.f32 %v17998_v60, %v1742_v31 }
 0x236   : > { %v5408_v12 = vadd.f32 %v5398_v33, %v5075_v13  ;;  %v16041_v50 = vpop.f32.mrf.mxu0 }
 0x237   : > { %v14200_v27 = vpop.f32.mrf.mxu1  ;;  %v2408_v33 = vadd.f32 %v17999_v19, %v2075_v11 }
 0x238   : > { %v16045_v44 = vpop.f32.mrf.mxu0  ;;  %v18000_v27 = vld [vmem:[#allocation15_spill] sm:$0xff] }
 0x23e   : > { %v5589_v15 = vpop.f32.mrf.mxu1 }
 0x23f   : > { %v5737_v26 = vadd.f32 %v5589_v15, %v5404_v5  ;;  %v2741_v15 = vadd.f32 %v18000_v27, %v2408_v33 }
 0x240   : > { %v16043_v54 = vpop.f32.mrf.mxu1 }
 0x241   : > { %v16047_v34 = vpop.f32.mrf.mxu0 }
 0x243   : > { %v16049_v52 = vpop.f32.mrf.mxu0 }
 0x245   : > { %v5731_v18 = vpop.f32.mrf.mxu1 }
 0x246   : > { %v5741_v22 = vadd.f32 %v5731_v18, %v5408_v12  ;;  %v16053_v37 = vpop.f32.mrf.mxu0 }
 0x247   : > { %v14205_v38 = vpop.f32.mrf.mxu1 }
 0x248   : > { %v16057_v39 = vpop.f32.mrf.mxu0  ;;  %v18001_v38 = vld [vmem:[#allocation17_spill] sm:$0xff] }
 0x24e   : > { %v5922_v35 = vpop.f32.mrf.mxu1 }
 0x24f   : > { %v16051_v42 = vadd.f32 %v5922_v35, %v5737_v26  ;;  %v3074_v35 = vadd.f32 %v18001_v38, %v2741_v15 }
 0x250   : > { %v16055_v46 = vpop.f32.mrf.mxu1 }
 0x251   : > { %v16059_v47 = vpop.f32.mrf.mxu0 }
 0x253   : > { %v16061_v55 = vpop.f32.mrf.mxu0 }
 0x255   : > { %v6064_v48 = vpop.f32.mrf.mxu1 }
 0x256   : > { %v6074_v40 = vadd.f32 %v6064_v48, %v5741_v22  ;;  %v16063_v56 = vpop.f32.mrf.mxu0 }
 0x257   : > { %v14210_v53 = vpop.f32.mrf.mxu1 }
 0x258   : > { %v16067_v24 = vpop.f32.mrf.mxu0 }
 0x25e   : > { %v16065_v63 = vpop.f32.mrf.mxu1 }
 0x260   : > { %v16069_v61 = vpop.f32.mrf.mxu1 }
 0x261   : > { %v16071_v9 = vpop.f32.mrf.mxu0 }
 0x263   : > { %v16073_v49 = vpop.f32.mrf.mxu0 }
 0x265   : > { %v6397_v14 = vpop.f32.mrf.mxu1 }
 0x266   : > { %v6407_v17 = vadd.f32 %v6397_v14, %v6074_v40  ;;  %v16077_v28 = vpop.f32.mrf.mxu0 }
 0x267   : > { %v14215_v59 = vpop.f32.mrf.mxu1 }
 0x268   : > { %v16082_v4 = vpop.f32.mrf.mxu0  ;;  %v3407_v59 = vadd.f32 %v15883_v25, %v3074_v35 }
 0x26a   : > { %v3740_v20 = vadd.f32 %v15961_v57, %v3407_v59 }
 0x26c   : > { %v4073_v60 = vadd.f32 %v16002_v36, %v3740_v20 }
 0x26e   : > { %v16080_v21 = vpop.f32.mrf.mxu1  ;;  %v4406_v33 = vadd.f32 %v16011_v23, %v4073_v60  ;;  %v5403_v23 = vadd.f32 %v16039_v2, %v16029_v0 }
 0x270   : > { %v16085_v3 = vpop.f32.mrf.mxu1  ;;  %v4739_v57 = vadd.f32 %v16021_v43, %v4406_v33 }
 0x271   : > { %v16087_v13 = vpop.f32.mrf.mxu0 }
 0x273   : > { %v16090_v16 = vpop.f32.mrf.mxu0 }
 0x275   : > { %v6730_v6 = vpop.f32.mrf.mxu1 }
 0x276   : > { %v6740_v30 = vadd.f32 %v6730_v6, %v6407_v17  ;;  %v16093_v12 = vpop.f32.mrf.mxu0 }
 0x277   : > { %v14220_v5 = vpop.f32.mrf.mxu1 }
 0x278   : > { %v16096_v26 = vpop.f32.mrf.mxu0 }
 0x27e   : > { %v16098_v18 = vpop.f32.mrf.mxu1 }
 0x280   : > { %v16103_v48 = vpop.f32.mrf.mxu1 }
 0x281   : > { %v16100_v22 = vpop.f32.mrf.mxu0 }
 0x283   : > { %v16105_v40 = vpop.f32.mrf.mxu0 }
 0x285   : > { %v7063_v53 = vpop.f32.mrf.mxu1 }
 0x286   : > { %v7073_v14 = vadd.f32 %v7063_v53, %v6740_v30  ;;  %v16107_v17 = vpop.f32.mrf.mxu0  ;;  %v5072_v53 = vadd.f32 %v16027_v45, %v4739_v57  ;;  %v5406_v45 = vadd.f32 %v16041_v50, %v16031_v58  ;;  %v5407_v57 = vadd.f32 %v16045_v44, %v16033_v8 }
 0x287   : > { %v14225_v62 = vpop.f32.mrf.mxu1 }
 0x288   : > { %v16110_v10 = vpop.f32.mrf.mxu0  ;;  %v5405_v62 = vadd.f32 %v16037_v41, %v5072_v53 }
 0x28a   : > { %v7218_v29 = vpop.f32.mrf.mxu1  ;;  %v5738_v60 = vadd.f32 %v16043_v54, %v5405_v62  ;;  %v5739_v54 = vadd.f32 %v16053_v37, %v5406_v45 }
 0x28b   : > { %v7147_v1 = vpop.f32.mrf.mxu0 }
 0x28c   : > { %v16113_v32 = vpop.f32.mrf.mxu1  ;;  %v6071_v0 = vadd.f32 %v16055_v46, %v5738_v60  ;;  %v6072_v46 = vadd.f32 %v16063_v56, %v5739_v54 }
 0x28d   : > { %v16115_v31 = vpop.f32.mrf.mxu0 }
 0x28e   : > { %v7360_v6 = vpop.f32.mrf.mxu1 }
 0x28f   : > { %v7370_v11 = vadd.f32 %v7360_v6, %v7073_v14  ;;  %v16118_v30 = vpop.f32.mrf.mxu0  ;;  %v5735_v6 = vadd.f32 %v16047_v34, %v16035_v51  ;;  %v6403_v51 = vadd.f32 %v16065_v63, %v16051_v42 }
 0x290   : > { %v14230_v5 = vpop.f32.mrf.mxu1 }
 0x291   : > { %v16120_v19 = vpop.f32.mrf.mxu0  ;;  %v6068_v33 = vadd.f32 %v16059_v47, %v5735_v6  ;;  %v6404_v47 = vadd.f32 %v16069_v61, %v6071_v0  ;;  %v6405_v61 = vadd.f32 %v16077_v28, %v6072_v46 }
 0x292   : > { %v7519_v25 = vpop.f32.mrf.mxu1 }
 0x293   : > { %v7448_v27 = vpop.f32.mrf.mxu0  ;;  %v6401_v58 = vadd.f32 %v16071_v9, %v6068_v33  ;;  %v6737_v9 = vadd.f32 %v16085_v3, %v6404_v47 }
 0x294   : > { %v7521_v15 = vpop.f32.mrf.mxu1 }
 0x295   : > { %v16124_v38 = vpop.f32.mrf.mxu0  ;;  %v6734_v63 = vadd.f32 %v16087_v13, %v6401_v58 }
 0x296   : > { %v7661_v35 = vpop.f32.mrf.mxu1 }
 0x297   : > { %v7671_v59 = vadd.f32 %v7661_v35, %v7370_v11  ;;  %v16127_v36 = vpop.f32.mrf.mxu0  ;;  %v5736_v11 = vadd.f32 %v16049_v52, %v5403_v23  ;;  %v5740_v52 = vadd.f32 %v16057_v39, %v5407_v57  ;;  %v6736_v35 = vadd.f32 %v16080_v21, %v6403_v51 }
 0x298   : > { %v14235_v14 = vpop.f32.mrf.mxu1 }
 0x299   : > { %v16130_v20 = vpop.f32.mrf.mxu0  ;;  %v6069_v34 = vadd.f32 %v16061_v55, %v5736_v11  ;;  %v6073_v55 = vadd.f32 %v16067_v24, %v5740_v52  ;;  %v7069_v53 = vadd.f32 %v16098_v18, %v6736_v35  ;;  %v6738_v24 = vadd.f32 %v16093_v12, %v6405_v61 }
 0x29a   : > { %v7819_v43 = vpop.f32.mrf.mxu1 }
 0x29b   : > { %v7748_v5 = vpop.f32.mrf.mxu0  ;;  %v6402_v42 = vadd.f32 %v16073_v49, %v6069_v34  ;;  %v6406_v56 = vadd.f32 %v16082_v4, %v6073_v55  ;;  %v7070_v49 = vadd.f32 %v16103_v48, %v6737_v9  ;;  %v7366_v13 = vadd.f32 %v7218_v29, %v7069_v53 }
 0x29c   : > { %v7821_v41 = vpop.f32.mrf.mxu1 }
 0x29d   : > { %v7750_v2 = vpop.f32.mrf.mxu0  ;;  %v6735_v21 = vadd.f32 %v16090_v16, %v6402_v42  ;;  %v6739_v6 = vadd.f32 %v16096_v26, %v6406_v56  ;;  %v7367_v28 = vadd.f32 %v16113_v32, %v7070_v49  ;;  %v7667_v16 = vadd.f32 %v7519_v25, %v7366_v13 }
 0x29e   : > { %v7961_v50 = vpop.f32.mrf.mxu1 }
 0x29f   : > { %v7971_v8 = vadd.f32 %v7961_v50, %v7671_v59  ;;  %v7890_v44 = vpop.f32.mrf.mxu0  ;;  %v7067_v59 = vadd.f32 %v16100_v22, %v6734_v63  ;;  %v7068_v3 = vadd.f32 %v16105_v40, %v6735_v21  ;;  %v7071_v22 = vadd.f32 %v16107_v17, %v6738_v24 }
 0x2a0   : > { %v14240_v37 = vpop.f32.mrf.mxu1  ;;  %v7072_v29 = vadd.f32 %v16110_v10, %v6739_v6  ;;  %v7668_v11 = vadd.f32 %v7521_v15, %v7367_v28  ;;  %v7967_v12 = vadd.f32 %v7819_v43, %v7667_v16  ;;  %v8704_v6 = vld [vmem:[%s17945_s3 + $0xf0] sm:$0xff]  ;;  %v8703_v28 = vld [vmem:[%s17945_s3 + $0xe8] sm:$0xff]  ;;  %v8769_v16 = vld [vmem:[%s17945_s3 + $0x2f8] sm:$0xff] }
 0x2a1   : > { %v7892_v39 = vpop.f32.mrf.mxu0  ;;  %v7364_v23 = vadd.f32 %v7147_v1, %v7067_v59  ;;  %v7365_v4 = vadd.f32 %v16115_v31, %v7068_v3  ;;  %v7368_v1 = vadd.f32 %v16118_v30, %v7071_v22  ;;  %v16175_v30 = vpop.permute.xlu0 %8575  ;;  %v8702_v22 = vld [vmem:[%s17945_s3 + $0xe0] sm:$0xff]  ;;  %8971 = vmatprep.subr.mxu1 %v8769_v16  ;;  %v8744_v16 = vld [vmem:[%s17945_s3 + $0x230] sm:$0xff] }
 0x2a2   : > { %v8119_v14 = vpop.f32.mrf.mxu1  ;;  %v7369_v25 = vadd.f32 %v16120_v19, %v7072_v29  ;;  %v7968_v0 = vadd.f32 %v7821_v41, %v7668_v11  ;;  %v8700_v29 = vld [vmem:[%s17945_s3 + $0xd0] sm:$0xff]  ;;  %v8765_v11 = vld [vmem:[%s17945_s3 + $0x2d8] sm:$0xff] }
 0x2a3   : > { %v8048_v62 = vpop.f32.mrf.mxu0  ;;  %v7665_v45 = vadd.f32 %v7448_v27, %v7364_v23  ;;  %v7666_v26 = vadd.f32 %v16124_v38, %v7365_v4  ;;  %v8267_v17 = vadd.f32 %v8119_v14, %v7967_v12  ;;  %v7669_v31 = vadd.f32 %v16127_v36, %v7368_v1  ;;  %v8767_v4 = vld [vmem:[%s17945_s3 + $0x2e8] sm:$0xff] }
 0x2a4   : > { %v8121_v18 = vpop.f32.mrf.mxu1  ;;  %v7670_v15 = vadd.f32 %v16130_v20, %v7369_v25  ;;  %v8699_v12 = vld [vmem:[%s17945_s3 + $0xc8] sm:$0xff]  ;;  %v8761_v25 = vld [vmem:[%s17945_s3 + $0x2b8] sm:$0xff] }
 0x2a5   : > { %v8050_v60 = vpop.f32.mrf.mxu0  ;;  %v7965_v57 = vadd.f32 %v7748_v5, %v7665_v45  ;;  %v7966_v27 = vadd.f32 %v7750_v2, %v7666_v26  ;;  %v8268_v43 = vadd.f32 %v8121_v18, %v7968_v0  ;;  %v7969_v38 = vadd.f32 %v7890_v44, %v7669_v31  ;;  %v8705_v18 = vld [vmem:[%s17945_s3 + $0xf8] sm:$0xff]  ;;  %v8763_v1 = vld [vmem:[%s17945_s3 + $0x2c8] sm:$0xff] }
 0x2a6   : > { %v8261_v48 = vpop.f32.mrf.mxu1  ;;  %v7970_v19 = vadd.f32 %v7892_v39, %v7670_v15  ;;  %8900 = vmatprep.subr.mxu0 %v8705_v18  ;;  %v8701_v45 = vld [vmem:[%s17945_s3 + $0xd8] sm:$0xff]  ;;  %v8695_v0 = vld [vmem:[%s17945_s3 + $0xa8] sm:$0xff]  ;;  %v8680_v18 = vld [vmem:[%s17945_s3 + $0x30] sm:$0xff] }
 0x2a7   : > { %v8271_v33 = vadd.f32 %v8261_v48, %v7971_v8  ;;  %v8190_v40 = vpop.f32.mrf.mxu0  ;;  %v8265_v54 = vadd.f32 %v8048_v62, %v7965_v57  ;;  %v8266_v5 = vadd.f32 %v8050_v60, %v7966_v27  ;;  %v8768_v60 = vld [vmem:[%s17945_s3 + $0x2f0] sm:$0xff]  ;;  %8901 = vmatpush1.msra.mxu0 %v8704_v6  ;;  %v8766_v48 = vld [vmem:[%s17945_s3 + $0x2e0] sm:$0xff]  ;;  %v8697_v26 = vld [vmem:[%s17945_s3 + $0xb8] sm:$0xff] }
 0x2a8   : > { %v14245_v32 = vpop.f32.mrf.mxu1  ;;  %v8269_v35 = vadd.f32 %v8190_v40, %v7969_v38  ;;  %8902 = vmatprep.subr.mxu0 %v8703_v28  ;;  %8972 = vmatpush1.msra.mxu1 %v8768_v60  ;;  %v8698_v40 = vld [vmem:[%s17945_s3 + $0xc0] sm:$0xff]  ;;  %v8759_v31 = vld [vmem:[%s17945_s3 + $0x2a8] sm:$0xff]  ;;  %v8693_v27 = vld [vmem:[%s17945_s3 + $0x98] sm:$0xff] }
 0x2a9   : > { %v8192_v51 = vpop.f32.mrf.mxu0  ;;  %8903 = vmatpush1.msra.mxu0 %v8702_v22  ;;  %8973 = vmatprep.subr.mxu1 %v8767_v4  ;;  %v8762_v57 = vld [vmem:[%s17945_s3 + $0x2c0] sm:$0xff]  ;;  %v8696_v32 = vld [vmem:[%s17945_s3 + $0xb0] sm:$0xff]  ;;  %v8757_v15 = vld [vmem:[%s17945_s3 + $0x298] sm:$0xff] }
 0x2aa   : > { %v8419_v10 = vpop.f32.mrf.mxu1  ;;  %v8270_v46 = vadd.f32 %v8192_v51, %v7970_v19  ;;  %8904 = vmatprep.subr.mxu0 %v8701_v45  ;;  %8974 = vmatpush1.msra.mxu1 %v8766_v48  ;;  %v8694_v51 = vld [vmem:[%s17945_s3 + $0xa0] sm:$0xff]  ;;  %v8755_v38 = vld [vmem:[%s17945_s3 + $0x288] sm:$0xff]  ;;  %v8753_v19 = vld [vmem:[%s17945_s3 + $0x278] sm:$0xff] }
 0x2ab   : > { %v8567_v34 = vadd.f32 %v8419_v10, %v8267_v17  ;;  %v8348_v58 = vpop.f32.mrf.mxu0  ;;  %8905 = vmatpush1.msra.mxu0 %v8700_v29  ;;  %8975 = vmatprep.subr.mxu1 %v8765_v11  ;;  %v8760_v17 = vld [vmem:[%s17945_s3 + $0x2b0] sm:$0xff]  ;;  %v8745_v6 = vld [vmem:[%s17945_s3 + $0x238] sm:$0xff]  ;;  %v8679_v28 = vld [vmem:[%s17945_s3 + $0x28] sm:$0xff] }
 0x2ac   : > { %v8565_v50 = vadd.f32 %v8348_v58, %v8265_v54  ;;  %v8421_v52 = vpop.f32.mrf.mxu1  ;;  %8906 = vmatprep.subr.mxu0 %v8699_v12  ;;  %v8758_v54 = vld [vmem:[%s17945_s3 + $0x2a0] sm:$0xff]  ;;  %v8692_v10 = vld [vmem:[%s17945_s3 + $0x90] sm:$0xff]  ;;  %v8743_v22 = vld [vmem:[%s17945_s3 + $0x228] sm:$0xff] }
 0x2ad   : > { %v8568_v41 = vadd.f32 %v8421_v52, %v8268_v43  ;;  %v8350_v47 = vpop.f32.mrf.mxu0  ;;  %v16178_v36 = vadd.f32 %v16175_v30, %v8567_v34  ;;  %8907 = vmatpush1.msra.mxu0 %v8698_v40  ;;  %v8691_v43 = vld [vmem:[%s17945_s3 + $0x88] sm:$0xff]  ;;  %v8756_v34 = vld [vmem:[%s17945_s3 + $0x290] sm:$0xff]  ;;  %v8690_v58 = vld [vmem:[%s17945_s3 + $0x80] sm:$0xff] }
 0x2ae   : > { %v8566_v8 = vadd.f32 %v8350_v47, %v8266_v5  ;;  %v8561_v2 = vpop.f32.mrf.mxu1  ;;  %v16186_v37 = vadd.f32 %v16175_v30, %v8565_v50  ;;  %8908 = vmatprep.subr.mxu0 %v8697_v26  ;;  %v8689_v5 = vld [vmem:[%s17945_s3 + $0x78] sm:$0xff]  ;;  %v8754_v50 = vld [vmem:[%s17945_s3 + $0x280] sm:$0xff]  ;;  %v8688_v52 = vld [vmem:[%s17945_s3 + $0x70] sm:$0xff] }
 0x2af   : > { %v16180_v20 = vadd.f32 %v8561_v2, %v8271_v33  ;;  %v8490_v42 = vpop.f32.mrf.mxu0  ;;  %v16189_v55 = vadd.f32 %v16175_v30, %v8568_v41  ;;  %v8587_v61 = vmax.f32 %v16178_v36, 0.0  ;;  %v8764_v33 = vld [vmem:[%s17945_s3 + $0x2d0] sm:$0xff]  ;;  %8909 = vmatpush1.msra.mxu0 %v8696_v32  ;;  %v8687_v41 = vld [vmem:[%s17945_s3 + $0x68] sm:$0xff]  ;;  %v8685_v2 = vld [vmem:[%s17945_s3 + $0x58] sm:$0xff] }
 0x2b0   : > { %v16183_v63 = vadd.f32 %v16175_v30, %v8566_v8  ;;  %v8569_v44 = vadd.f32 %v8490_v42, %v8269_v35  ;;  %v14250_v9 = vpop.f32.mrf.mxu1  ;;  %v8585_v49 = vmax.f32 %v16186_v37, 0.0  ;;  %8976 = vmatpush1.msra.mxu1 %v8764_v33  ;;  %8910 = vmatprep.subr.mxu0 %v8695_v0  ;;  %v8752_v47 = vld [vmem:[%s17945_s3 + $0x270] sm:$0xff]  ;;  %v8686_v35 = vld [vmem:[%s17945_s3 + $0x60] sm:$0xff]  ;;  %v8751_v8 = vld [vmem:[%s17945_s3 + $0x268] sm:$0xff] }
 0x2b1   : > { %v8492_v53 = vpop.f32.mrf.mxu0  ;;  %v8588_v13 = vmax.f32 %v16189_v55, 0.0  ;;  %8977 = vmatprep.subr.mxu1 %v8763_v1  ;;  %8911 = vmatpush1.msra.mxu0 %v8694_v51  ;;  %v8684_v42 = vld [vmem:[%s17945_s3 + $0x50] sm:$0xff]  ;;  %v8683_v9 = vld [vmem:[%s17945_s3 + $0x48] sm:$0xff]  ;;  %v8678_v60 = vld [vmem:[%s17945_s3 + $0x20] sm:$0xff] }
 0x2b2   : > { %v8586_v39 = vmax.f32 %v16183_v63, 0.0  ;;  %v16194_v21 = vadd.f32 %v16175_v30, %v8569_v44  ;;  %v8570_v59 = vadd.f32 %v8492_v53, %v8270_v46  ;;  %8978 = vmatpush1.msra.mxu1 %v8762_v57  ;;  %8912 = vmatprep.subr.mxu0 %v8693_v27  ;;  %v8750_v46 = vld [vmem:[%s17945_s3 + $0x260] sm:$0xff]  ;;  %v8749_v44 = vld [vmem:[%s17945_s3 + $0x258] sm:$0xff]  ;;  %v8748_v53 = vld [vmem:[%s17945_s3 + $0x250] sm:$0xff] }
 0x2b3   : > { %v14607_v23 = vpack.i.bf16 %v8585_v49, %v8588_v13  ;;  %8979 = vmatprep.subr.mxu1 %v8761_v25  ;;  %8913 = vmatpush1.msra.mxu0 %v8692_v10  ;;  %v8677_v4 = vld [vmem:[%s17945_s3 + $0x18] sm:$0xff]  ;;  %v8742_v45 = vld [vmem:[%s17945_s3 + $0x220] sm:$0xff]  ;;  %v8676_v48 = vld [vmem:[%s17945_s3 + $0x10] sm:$0xff] }
 0x2b4   : > { %v14602_v14 = vpack.i.bf16 %v8587_v61, %v8586_v39  ;;  %v16201_v56 = vadd.f32 %v16175_v30, %v8570_v59  ;;  %v8589_v62 = vmax.f32 %v16194_v21, 0.0  ;;  %8980 = vmatpush1.msra.mxu1 %v8760_v17  ;;  %8914 = vmatprep.subr.mxu0 %v8691_v43  ;;  %v8682_v59 = vld [vmem:[%s17945_s3 + $0x40] sm:$0xff]  ;;  %v8741_v29 = vld [vmem:[%s17945_s3 + $0x218] sm:$0xff]  ;;  %v8675_v11 = vld [vmem:[%s17945_s3 + $0x8] sm:$0xff] }
 0x2b5   : > { %8981 = vmatprep.subr.mxu1 %v8759_v31  ;;  %8915 = vmatpush1.msra.mxu0 %v8690_v58  ;;  %v8740_v12 = vld [vmem:[%s17945_s3 + $0x210] sm:$0xff]  ;;  %v8674_v33 = vld [vmem:[%s17945_s3] sm:$0xff]  ;;  %v8739_v40 = vld [vmem:[%s17945_s3 + $0x208] sm:$0xff] }
 0x2b6   : > { %v8590_v24 = vmax.f32 %v16201_v56, 0.0  ;;  %14603 = vrot.lane.b32.xlu1 %v14602_v14, %s17966_s30  ;;  %8982 = vmatpush1.msra.mxu1 %v8758_v54  ;;  %v8747_v14 = vld [vmem:[%s17945_s3 + $0x248] sm:$0xff]  ;;  %v8737_v1 = vld [vmem:[%s17945_s3 + $0x1f8] sm:$0xff]  ;;  %v8738_v26 = vld [vmem:[%s17945_s3 + $0x200] sm:$0xff]  ;;  %s18004_s30 = smov 126  }
 0x2b7   : > { %8983 = vmatprep.subr.mxu1 %v8757_v15  ;;  %8916 = vmatprep.subr.mxu0 %v8689_v5  ;;  %v8736_v57 = vld [vmem:[%s17945_s3 + $0x1f0] sm:$0xff]  ;;  %v8801_v32 = vld [vmem:[%s17945_s3 + $0x3f8] sm:$0xff]  ;;  %v8735_v25 = vld [vmem:[%s17945_s3 + $0x1e8] sm:$0xff] }
 0x2b8   : > { %v14612_v3 = vpack.i.bf16 %v8590_v24, %v8589_v62  ;;  %8984 = vmatpush1.msra.mxu1 %v8756_v34  ;;  %8917 = vmatpush1.msra.mxu0 %v8688_v52  ;;  %v8800_v0 = vld [vmem:[%s17945_s3 + $0x3f0] sm:$0xff]  ;;  %v8734_v17 = vld [vmem:[%s17945_s3 + $0x1e0] sm:$0xff]  ;;  %v8799_v51 = vld [vmem:[%s17945_s3 + $0x3e8] sm:$0xff] }
 0x2b9   : > { %8985 = vmatprep.subr.mxu1 %v8755_v38  ;;  %8918 = vmatprep.subr.mxu0 %v8687_v41  ;;  %v8733_v31 = vld [vmem:[%s17945_s3 + $0x1d8] sm:$0xff]  ;;  %v8798_v27 = vld [vmem:[%s17945_s3 + $0x3e0] sm:$0xff]  ;;  %v8732_v54 = vld [vmem:[%s17945_s3 + $0x1d0] sm:$0xff] }
 0x2ba   : > { %14613 = vrot.lane.b32.xlu0 %v14612_v3, %s18002_s2  ;;  %14608 = vrot.lane.b32.xlu1 %v14607_v23, %s18002_s2  ;;  %v8681_v3 = vld [vmem:[%s17945_s3 + $0x38] sm:$0xff]  ;;  %v8746_v23 = vld [vmem:[%s17945_s3 + $0x240] sm:$0xff] }
 0x2bb   : > { %8986 = vmatpush1.msra.mxu1 %v8754_v50  ;;  %8919 = vmatpush1.msra.mxu0 %v8686_v35  ;;  %v8797_v10 = vld [vmem:[%s17945_s3 + $0x3d8] sm:$0xff]  ;;  %v8731_v15 = vld [vmem:[%s17945_s3 + $0x1c8] sm:$0xff]  ;;  %v8796_v43 = vld [vmem:[%s17945_s3 + $0x3d0] sm:$0xff] }
 0x2bc   : > { %8987 = vmatprep.subr.mxu1 %v8753_v19  ;;  %8920 = vmatprep.subr.mxu0 %v8685_v2  ;;  %v8730_v34 = vld [vmem:[%s17945_s3 + $0x1c0] sm:$0xff]  ;;  %v8795_v58 = vld [vmem:[%s17945_s3 + $0x3c8] sm:$0xff]  ;;  %v8729_v38 = vld [vmem:[%s17945_s3 + $0x1b8] sm:$0xff] }
 0x2bd   : > { %8988 = vmatpush1.msra.mxu1 %v8752_v47  ;;  %8921 = vmatpush1.msra.mxu0 %v8684_v42  ;;  %v8794_v5 = vld [vmem:[%s17945_s3 + $0x3c0] sm:$0xff]  ;;  %v8728_v50 = vld [vmem:[%s17945_s3 + $0x1b0] sm:$0xff]  ;;  %v8793_v52 = vld [vmem:[%s17945_s3 + $0x3b8] sm:$0xff] }
 0x2be   : > { %8989 = vmatprep.subr.mxu1 %v8751_v8  ;;  %8922 = vmatprep.subr.mxu0 %v8683_v9  ;;  %v8727_v19 = vld [vmem:[%s17945_s3 + $0x1a8] sm:$0xff]  ;;  %v8792_v41 = vld [vmem:[%s17945_s3 + $0x3b0] sm:$0xff]  ;;  %v8726_v47 = vld [vmem:[%s17945_s3 + $0x1a0] sm:$0xff] }
 0x2bf   : > { %8990 = vmatpush1.msra.mxu1 %v8750_v46  ;;  %8923 = vmatpush1.msra.mxu0 %v8682_v59  ;;  %v8791_v35 = vld [vmem:[%s17945_s3 + $0x3a8] sm:$0xff]  ;;  %v8725_v8 = vld [vmem:[%s17945_s3 + $0x198] sm:$0xff]  ;;  %v8790_v2 = vld [vmem:[%s17945_s3 + $0x3a0] sm:$0xff] }
 0x2c0   : > { %8991 = vmatprep.subr.mxu1 %v8749_v44  ;;  %8924 = vmatprep.subr.mxu0 %v8681_v3  ;;  %v8724_v46 = vld [vmem:[%s17945_s3 + $0x190] sm:$0xff]  ;;  %v8789_v42 = vld [vmem:[%s17945_s3 + $0x398] sm:$0xff]  ;;  %v8723_v44 = vld [vmem:[%s17945_s3 + $0x188] sm:$0xff] }
 0x2c1   : > { %8992 = vmatpush1.msra.mxu1 %v8748_v53  ;;  %8925 = vmatpush1.msra.mxu0 %v8680_v18  ;;  %v8788_v9 = vld [vmem:[%s17945_s3 + $0x390] sm:$0xff]  ;;  %v8722_v53 = vld [vmem:[%s17945_s3 + $0x180] sm:$0xff]  ;;  %v8787_v59 = vld [vmem:[%s17945_s3 + $0x388] sm:$0xff] }
 0x2c2   : > { %8993 = vmatprep.subr.mxu1 %v8747_v14  ;;  %8926 = vmatprep.subr.mxu0 %v8679_v28  ;;  %v8721_v14 = vld [vmem:[%s17945_s3 + $0x178] sm:$0xff]  ;;  %v8786_v3 = vld [vmem:[%s17945_s3 + $0x380] sm:$0xff]  ;;  %v8784_v28 = vld [vmem:[%s17945_s3 + $0x370] sm:$0xff] }
 0x2c3   : > { %8994 = vmatpush1.msra.mxu1 %v8746_v23  ;;  %8927 = vmatpush1.msra.mxu0 %v8678_v60  ;;  %v8720_v23 = vld [vmem:[%s17945_s3 + $0x170] sm:$0xff]  ;;  %v8785_v18 = vld [vmem:[%s17945_s3 + $0x378] sm:$0xff]  ;;  %v8783_v60 = vld [vmem:[%s17945_s3 + $0x368] sm:$0xff] }
 0x2c4   : > { %8995 = vmatprep.subr.mxu1 %v8745_v6  ;;  %8928 = vmatprep.subr.mxu0 %v8677_v4  ;;  %v8719_v6 = vld [vmem:[%s17945_s3 + $0x168] sm:$0xff]  ;;  %v8782_v4 = vld [vmem:[%s17945_s3 + $0x360] sm:$0xff]  ;;  %v8889_v36 = vld [vmem:[%s17945_s3 + $0x6b8] sm:$0x7f] }
 0x2c5   : > { %8996 = vmatpush1.msra.mxu1 %v8744_v16  ;;  %8929 = vmatpush1.msra.mxu0 %v8676_v48  ;;  %v8718_v16 = vld [vmem:[%s17945_s3 + $0x160] sm:$0xff]  ;;  %v8781_v48 = vld [vmem:[%s17945_s3 + $0x358] sm:$0xff]  ;;  %v8888_v56 = vld [vmem:[%s17945_s3 + $0x6b0] sm:$0x7f] }
 0x2c6   : > { %8997 = vmatprep.subr.mxu1 %v8743_v22  ;;  %8930 = vmatprep.subr.mxu0 %v8675_v11  ;;  %v8717_v22 = vld [vmem:[%s17945_s3 + $0x158] sm:$0xff]  ;;  %v8780_v11 = vld [vmem:[%s17945_s3 + $0x350] sm:$0xff] }
 0x2c7   : > { %8998 = vmatpush1.msra.mxu1 %v8742_v45  ;;  %8931 = vmatpush1.msra.mxu0 %v8674_v33  ;;  %v8716_v45 = vld [vmem:[%s17945_s3 + $0x150] sm:$0xff]  ;;  %v8713_v33 = vld [vmem:[%s17945_s3 + $0x138] sm:$0xff] }
 0x2c8   : > { %8999 = vmatprep.subr.mxu1 %v8741_v29  ;;  %8932 = vmatprep.subr.mxu0 %v8737_v1  ;;  %v8715_v29 = vld [vmem:[%s17945_s3 + $0x148] sm:$0xff]  ;;  %v8712_v1 = vld [vmem:[%s17945_s3 + $0x130] sm:$0xff] }
 0x2c9   : > { %9000 = vmatpush1.msra.mxu1 %v8740_v12  ;;  %8933 = vmatpush2.msra.mxu0 %v8736_v57  ;;  %v8714_v12 = vld [vmem:[%s17945_s3 + $0x140] sm:$0xff]  ;;  %v8711_v57 = vld [vmem:[%s17945_s3 + $0x128] sm:$0xff] }
 0x2ca   : > { %9001 = vmatprep.subr.mxu1 %v8739_v40  ;;  %8934 = vmatprep.subr.mxu0 %v8735_v25  ;;  %v8779_v40 = vld [vmem:[%s17945_s3 + $0x348] sm:$0xff] }
 0x2cb   : > { %9002 = vmatpush1.msra.mxu1 %v8738_v26  ;;  %8935 = vmatpush2.msra.mxu0 %v8734_v17  ;;  %v8778_v26 = vld [vmem:[%s17945_s3 + $0x340] sm:$0xff]  ;;  %v8776_v17 = vld [vmem:[%s17945_s3 + $0x330] sm:$0xff] }
 0x2cc   : > { %9003 = vmatprep.subr.mxu1 %v8801_v32  ;;  %8936 = vmatprep.subr.mxu0 %v8733_v31  ;;  %v8777_v32 = vld [vmem:[%s17945_s3 + $0x338] sm:$0xff] }
 0x2cd   : > { %9004 = vmatpush2.msra.mxu1 %v8800_v0  ;;  %8937 = vmatpush2.msra.mxu0 %v8732_v54  ;;  %v8710_v0 = vld [vmem:[%s17945_s3 + $0x120] sm:$0xff]  ;;  %v8775_v54 = vld [vmem:[%s17945_s3 + $0x328] sm:$0xff] }
 0x2ce   : > { %9005 = vmatprep.subr.mxu1 %v8799_v51  ;;  %8938 = vmatprep.subr.mxu0 %v8731_v15  ;;  %v8774_v15 = vld [vmem:[%s17945_s3 + $0x320] sm:$0xff] }
 0x2cf   : > { %9006 = vmatpush2.msra.mxu1 %v8798_v27  ;;  %8939 = vmatpush2.msra.mxu0 %v8730_v34  ;;  %v8709_v27 = vld [vmem:[%s17945_s3 + $0x118] sm:$0xff]  ;;  %v8707_v34 = vld [vmem:[%s17945_s3 + $0x108] sm:$0xff] }
 0x2d0   : > { %9007 = vmatprep.subr.mxu1 %v8797_v10  ;;  %8940 = vmatprep.subr.mxu0 %v8729_v38  ;;  %v8708_v10 = vld [vmem:[%s17945_s3 + $0x110] sm:$0xff] }
 0x2d1   : > { %9008 = vmatpush2.msra.mxu1 %v8796_v43  ;;  %8941 = vmatpush2.msra.mxu0 %v8728_v50  ;;  %v8706_v50 = vld [vmem:[%s17945_s3 + $0x100] sm:$0xff] }
 0x2d2   : > { %9009 = vmatprep.subr.mxu1 %v8795_v58  ;;  %8942 = vmatprep.subr.mxu0 %v8727_v19  ;;  %v8773_v58 = vld [vmem:[%s17945_s3 + $0x318] sm:$0xff]  ;;  %v8771_v19 = vld [vmem:[%s17945_s3 + $0x308] sm:$0xff] }
 0x2d3   : > { %9010 = vmatpush2.msra.mxu1 %v8794_v5  ;;  %8943 = vmatpush2.msra.mxu0 %v8726_v47 }
 0x2d4   : > { %9011 = vmatprep.subr.mxu1 %v8793_v52  ;;  %8944 = vmatprep.subr.mxu0 %v8725_v8  ;;  %v8772_v52 = vld [vmem:[%s17945_s3 + $0x310] sm:$0xff] }
 0x2d5   : > { %9012 = vmatpush2.msra.mxu1 %v8792_v41  ;;  %8945 = vmatpush2.msra.mxu0 %v8724_v46 }
 0x2d6   : > { %9013 = vmatprep.subr.mxu1 %v8791_v35  ;;  %8946 = vmatprep.subr.mxu0 %v8723_v44 }
 0x2d7   : > { %9014 = vmatpush2.msra.mxu1 %v8790_v2  ;;  %8947 = vmatpush2.msra.mxu0 %v8722_v53  ;;  %v8770_v2 = vld [vmem:[%s17945_s3 + $0x300] sm:$0xff] }
 0x2d8   : > { %9015 = vmatprep.subr.mxu1 %v8789_v42  ;;  %8948 = vmatprep.subr.mxu0 %v8721_v14 }
 0x2d9   : > { %9016 = vmatpush2.msra.mxu1 %v8788_v9  ;;  %8949 = vmatpush2.msra.mxu0 %v8720_v23  ;;  %v8584_v23 = vadd.f32 %v16175_v30, %v16180_v20 }
 0x2da   : > { %9017 = vmatprep.subr.mxu1 %v8787_v59  ;;  %8950 = vmatprep.subr.mxu0 %v8719_v6  ;;  %v8833_v59 = vld [vmem:[%s17945_s3 + $0x4f8] sm:$0xff] }
 0x2db   : > { %9018 = vmatpush2.msra.mxu1 %v8786_v3  ;;  %8951 = vmatpush2.msra.mxu0 %v8718_v16 }
 0x2dc   : > { %9019 = vmatprep.subr.mxu1 %v8785_v18  ;;  %8952 = vmatprep.subr.mxu0 %v8717_v22 }
 0x2dd   : > { %9020 = vmatpush2.msra.mxu1 %v8784_v28  ;;  %8953 = vmatpush2.msra.mxu0 %v8716_v45 }
 0x2de   : > { %9021 = vmatprep.subr.mxu1 %v8783_v60  ;;  %8954 = vmatprep.subr.mxu0 %v8715_v29 }
 0x2df   : > { %9022 = vmatpush2.msra.mxu1 %v8782_v4  ;;  %8955 = vmatpush2.msra.mxu0 %v8714_v12 }
 0x2e0   : > { %9023 = vmatprep.subr.mxu1 %v8781_v48  ;;  %8956 = vmatprep.subr.mxu0 %v8713_v33 }
 0x2e1   : > { %9024 = vmatpush2.msra.mxu1 %v8780_v11  ;;  %8957 = vmatpush2.msra.mxu0 %v8712_v1  ;;  %v8831_v1 = vld [vmem:[%s17945_s3 + $0x4e8] sm:$0xff] }
 0x2e2   : > { %9025 = vmatprep.subr.mxu1 %v8779_v40  ;;  %8958 = vmatprep.subr.mxu0 %v8711_v57  ;;  %v8832_v40 = vld [vmem:[%s17945_s3 + $0x4f0] sm:$0xff]  ;;  %v8829_v57 = vld [vmem:[%s17945_s3 + $0x4d8] sm:$0xff] }
 0x2e3   : > { %9026 = vmatpush2.msra.mxu1 %v8778_v26  ;;  %8959 = vmatpush2.msra.mxu0 %v8710_v0  ;;  %v8887_v26 = vld [vmem:[%s17945_s3 + $0x6a8] sm:$0xff]  ;;  %v8885_v0 = vld [vmem:[%s17945_s3 + $0x698] sm:$0xff] }
 0x2e4   : > { %9027 = vmatprep.subr.mxu1 %v8777_v32  ;;  %8960 = vmatprep.subr.mxu0 %v8709_v27  ;;  %v8886_v32 = vld [vmem:[%s17945_s3 + $0x6a0] sm:$0xff]  ;;  %v8883_v27 = vld [vmem:[%s17945_s3 + $0x688] sm:$0xff] }
 0x2e5   : > { %9028 = vmatpush2.msra.mxu1 %v8776_v17  ;;  %8961 = vmatpush2.msra.mxu0 %v8708_v10  ;;  %v8827_v17 = vld [vmem:[%s17945_s3 + $0x4c8] sm:$0xff]  ;;  %v8882_v10 = vld [vmem:[%s17945_s3 + $0x680] sm:$0xff] }
 0x2e6   : > { %9029 = vmatprep.subr.mxu1 %v8775_v54  ;;  %8962 = vmatprep.subr.mxu0 %v8707_v34  ;;  %v8825_v54 = vld [vmem:[%s17945_s3 + $0x4b8] sm:$0xff]  ;;  %v8823_v34 = vld [vmem:[%s17945_s3 + $0x4a8] sm:$0xff] }
 0x2e7   : > { %9030 = vmatpush2.msra.mxu1 %v8774_v15  ;;  %8963 = vmatpush2.msra.mxu0 %v8706_v50  ;;  %v8824_v15 = vld [vmem:[%s17945_s3 + $0x4b0] sm:$0xff]  ;;  %v8821_v50 = vld [vmem:[%s17945_s3 + $0x498] sm:$0xff] }
 0x2e8   : > { %9031 = vmatprep.subr.mxu1 %v8773_v58  ;;  %9042 = vmatprep.subr.mxu0 %v8833_v59  ;;  %v8880_v58 = vld [vmem:[%s17945_s3 + $0x670] sm:$0xff] }
 0x2e9   : > { %9032 = vmatpush2.msra.mxu1 %v8772_v52  ;;  %v8878_v52 = vld [vmem:[%s17945_s3 + $0x660] sm:$0xff]  ;;  %v8872_v59 = vld [vmem:[%s17945_s3 + $0x630] sm:$0xff] }
 0x2ea   : > { %9033 = vmatprep.subr.mxu1 %v8771_v19  ;;  %v8820_v19 = vld [vmem:[%s17945_s3 + $0x490] sm:$0xff] }
 0x2eb   : > { %9034 = vmatpush2.msra.mxu1 %v8770_v2  ;;  %v8875_v2 = vld [vmem:[%s17945_s3 + $0x648] sm:$0xff] }
 0x2ec   : > { %13698 = vmatprep.subr.msk.mxu1 %vm8893_vm1, %v8889_v36  ;;  %v8868_v36 = vld [vmem:[%s17945_s3 + $0x610] sm:$0xff] }
 0x328   : > { %v14604_v25 = vpop.permute.xlu1 %14603 }
 0x329   : > { %v14606_v51 = vunpack.i.h.bf16 %v14604_v25  ;;  %v14605_v31 = vunpack.i.l.bf16 %v14604_v25  ;;  %v8828_v25 = vld [vmem:[%s17945_s3 + $0x4d0] sm:$0xff] }
 0x32b   : > { %v8614_v43 = vsel %vm470_vm0, %v14605_v31, %v14606_v51 }
 0x32c   : > { %v14614_v38 = vpop.permute.xlu0 %14613  ;;  %v14609_v5 = vpop.permute.xlu1 %14608  ;;  %v8627_v46 = vmax.f32 %v8586_v39, %v8614_v43  ;;  %v8881_v43 = vld [vmem:[%s17945_s3 + $0x678] sm:$0xff] }
 0x32d   : > { %v14616_v41 = vunpack.i.h.bf16 %v14614_v38  ;;  %v14615_v47 = vunpack.i.l.bf16 %v14614_v38  ;;  %v14611_v35 = vunpack.i.h.bf16 %v14609_v5  ;;  %v14610_v8 = vunpack.i.l.bf16 %v14609_v5  ;;  %v8822_v38 = vld [vmem:[%s17945_s3 + $0x4a0] sm:$0xff]  ;;  %v8879_v5 = vld [vmem:[%s17945_s3 + $0x668] sm:$0xff] }
 0x32f   : > { %v8617_v42 = vsel %vm470_vm0, %v14615_v47, %v14616_v41  ;;  %v8613_v44 = vsel %vm470_vm0, %v14611_v35, %v14605_v31  ;;  %v8615_v9 = vsel %vm470_vm0, %v14606_v51, %v14610_v8  ;;  %v8616_v53 = vsel %vm470_vm0, %v14610_v8, %v14615_v47  ;;  %v8884_v51 = vld [vmem:[%s17945_s3 + $0x690] sm:$0xff]  ;;  %v8826_v31 = vld [vmem:[%s17945_s3 + $0x4c0] sm:$0xff]  ;;  %v8819_v47 = vld [vmem:[%s17945_s3 + $0x488] sm:$0xff] }
 0x330   : > { %v16614_v14 = vmax.f32 %v8589_v62, %v8617_v42  ;;  %v8626_v63 = vmax.f32 %v8585_v49, %v8613_v44  ;;  %v8628_v39 = vmax.f32 %v8587_v61, %v8615_v9  ;;  %v8629_v3 = vmax.f32 %v8588_v13, %v8616_v53  ;;  %v8876_v35 = vld [vmem:[%s17945_s3 + $0x650] sm:$0xff]  ;;  %v8818_v8 = vld [vmem:[%s17945_s3 + $0x480] sm:$0xff]  ;;  %v8873_v9 = vld [vmem:[%s17945_s3 + $0x638] sm:$0xff] }
 0x331   : > { %v8591_v62 = vmax.f32 %v8584_v23, 0.0  ;;  %v8874_v42 = vld [vmem:[%s17945_s3 + $0x640] sm:$0xff]  ;;  %v8816_v44 = vld [vmem:[%s17945_s3 + $0x470] sm:$0xff]  ;;  %v8815_v53 = vld [vmem:[%s17945_s3 + $0x468] sm:$0xff] }
 0x332   : > { %8640 = vrot.lane.b32.xlu0 %v8626_v63, %s18003_s16  ;;  %v14617_v18 = vpack.i.bf16 %v8628_v39, %v8627_v46  ;;  %v14622_v21 = vpack.i.bf16 %v16614_v14, %v8629_v3  ;;  %v8870_v23 = vld [vmem:[%s17945_s3 + $0x620] sm:$0xff] }
 0x334   : > { %14618 = vrot.lane.b32.xlu1 %v14617_v18, %s18003_s16  ;;  %v8812_v18 = vld [vmem:[%s17945_s3 + $0x450] sm:$0xff] }
 0x336   : > { %14623 = vrot.lane.b32.xlu0 %v14622_v21, %s18003_s16  ;;  %v8869_v21 = vld [vmem:[%s17945_s3 + $0x618] sm:$0xff] }
 0x338   : > { %8611 = vrot.lane.b32.xlu1 %v8591_v62, %s18002_s2 }
 0x3a4   : > { %v8641_v30 = vpop.permute.xlu0 %8640 }
 0x3a6   : > { %v14619_v20 = vpop.permute.xlu1 %14618 }
 0x3a7   : > { %v14621_v37 = vunpack.i.h.bf16 %v14619_v20  ;;  %v14620_v55 = vunpack.i.l.bf16 %v14619_v20  ;;  %v8867_v20 = vld [vmem:[%s17945_s3 + $0x608] sm:$0xff] }
 0x3a8   : > { %v16633_v61 = vpop.permute.xlu0 %14623 }
 0x3a9   : > { %v8654_v49 = vsel %vm2097_vm7, %v8641_v30, %v14620_v55  ;;  %v14626_v13 = vunpack.i.h.bf16 %v16633_v61  ;;  %v14625_v6 = vunpack.i.l.bf16 %v16633_v61  ;;  %v8655_v28 = vsel %vm2097_vm7, %v14620_v55, %v14621_v37  ;;  %v8810_v30 = vld [vmem:[%s17945_s3 + $0x440] sm:$0xff] }
 0x3aa   : > { %v8667_v16 = vmax.f32 %v8626_v63, %v8654_v49  ;;  %v8612_v60 = vpop.permute.xlu1 %8611  ;;  %v8668_v22 = vmax.f32 %v8627_v46, %v8655_v28  ;;  %v8817_v46 = vld [vmem:[%s17945_s3 + $0x478] sm:$0xff]  ;;  %v8814_v63 = vld [vmem:[%s17945_s3 + $0x460] sm:$0xff]  ;;  %v8808_v49 = vld [vmem:[%s17945_s3 + $0x430] sm:$0xff] }
 0x3ab   : > { %v8656_v4 = vsel %vm2097_vm7, %v14621_v37, %v14625_v6  ;;  %v8618_v45 = vsel %vm470_vm0, %v14616_v41, %v8612_v60  ;;  %v16641_v48 = vmax.f32 %v8591_v62, %v8612_v60  ;;  %v8657_v29 = vsel %vm2097_vm7, %v14625_v6, %v14626_v13  ;;  %v8877_v41 = vld [vmem:[%s17945_s3 + $0x658] sm:$0xff]  ;;  %v8811_v62 = vld [vmem:[%s17945_s3 + $0x448] sm:$0xff]  ;;  %v8866_v55 = vld [vmem:[%s17945_s3 + $0x600] sm:$0xff] }
 0x3ac   : > { %v8669_v11 = vmax.f32 %v8628_v39, %v8656_v4  ;;  %v16648_v12 = vmax.f32 %v8590_v24, %v8618_v45  ;;  %8964 = vmatprep.mubr.f32.mxu0 %v8668_v22  ;;  %v8670_v33 = vmax.f32 %v8629_v3, %v8657_v29  ;;  %v8830_v24 = vld [vmem:[%s17945_s3 + $0x4e0] sm:$0xff]  ;;  %v8871_v39 = vld [vmem:[%s17945_s3 + $0x628] sm:$0xff]  ;;  %v8813_v3 = vld [vmem:[%s17945_s3 + $0x458] sm:$0xff] }
 0x3ad   : > { %8652 = vrot.lane.b32.xlu0 %v16641_v48, %s18003_s16  ;;  %8965 = vmatmul.mubr.f32.vlgmr.msra.gmra.mxu0 %v8667_v16  ;;  %v8809_v37 = vld [vmem:[%s17945_s3 + $0x438] sm:$0xff]  ;;  %v8807_v6 = vld [vmem:[%s17945_s3 + $0x428] sm:$0xff]  ;;  %v8806_v28 = vld [vmem:[%s17945_s3 + $0x420] sm:$0xff] }
 0x3ae   : > { %9035 = vmatprep.mubr.f32.mxu1 %v8670_v33  ;;  %8650 = vrot.lane.b32.xlu1 %v16648_v12, %s18003_s16  ;;  %v8805_v16 = vld [vmem:[%s17945_s3 + $0x418] sm:$0xff]  ;;  %v8804_v60 = vld [vmem:[%s17945_s3 + $0x410] sm:$0xff]  ;;  %v8803_v22 = vld [vmem:[%s17945_s3 + $0x408] sm:$0xff] }
 0x3af   : > { %9036 = vmatmul.mubr.f32.vlgmr.msra.gmra.mxu1 %v8669_v11  ;;  %9043 = vmatpush1.msra.mxu0 %v8832_v40  ;;  %v8802_v4 = vld [vmem:[%s17945_s3 + $0x400] sm:$0xff]  ;;  %v8865_v45 = vld [vmem:[%s17945_s3 + $0x5f8] sm:$0xff]  ;;  %v8864_v29 = vld [vmem:[%s17945_s3 + $0x5f0] sm:$0xff] }
 0x3b0   : > { %9044 = vmatprep.subr.mxu0 %v8831_v1  ;;  %13699 = vmatpush1.msk.msra.mxu1 %vm8893_vm1, %v8888_v56  ;;  %v8863_v11 = vld [vmem:[%s17945_s3 + $0x5e8] sm:$0xff]  ;;  %v8862_v33 = vld [vmem:[%s17945_s3 + $0x5e0] sm:$0xff]  ;;  %v8861_v40 = vld [vmem:[%s17945_s3 + $0x5d8] sm:$0xff]  ;;  %vm10376_vm1 = vcmask 801792  }
 0x3b1   : > { %9045 = vmatpush1.msra.mxu0 %v8830_v24  ;;  %9123 = vmatprep.subr.mxu1 %v8887_v26  ;;  %v8860_v1 = vld [vmem:[%s17945_s3 + $0x5d0] sm:$0xff]  ;;  %v8859_v56 = vld [vmem:[%s17945_s3 + $0x5c8] sm:$0xff]  ;;  %v8858_v24 = vld [vmem:[%s17945_s3 + $0x5c0] sm:$0xff] }
 0x3b2   : > { %9046 = vmatprep.subr.mxu0 %v8829_v57  ;;  %9124 = vmatpush1.msra.mxu1 %v8886_v32  ;;  %v8857_v26 = vld [vmem:[%s17945_s3 + $0x5b8] sm:$0xff]  ;;  %v8856_v57 = vld [vmem:[%s17945_s3 + $0x5b0] sm:$0xff]  ;;  %v8855_v32 = vld [vmem:[%s17945_s3 + $0x5a8] sm:$0xff] }
 0x3b3   : > { %9047 = vmatpush1.msra.mxu0 %v8828_v25  ;;  %9125 = vmatprep.subr.mxu1 %v8885_v0  ;;  %v8854_v25 = vld [vmem:[%s17945_s3 + $0x5a0] sm:$0xff]  ;;  %v8853_v0 = vld [vmem:[%s17945_s3 + $0x598] sm:$0xff] }
 0x3b4   : > { %9048 = vmatprep.subr.mxu0 %v8827_v17  ;;  %9126 = vmatpush1.msra.mxu1 %v8884_v51  ;;  %v8852_v17 = vld [vmem:[%s17945_s3 + $0x590] sm:$0xff]  ;;  %v8851_v51 = vld [vmem:[%s17945_s3 + $0x588] sm:$0xff] }
 0x3b5   : > { %9049 = vmatpush1.msra.mxu0 %v8826_v31  ;;  %9127 = vmatprep.subr.mxu1 %v8883_v27  ;;  %v8850_v31 = vld [vmem:[%s17945_s3 + $0x580] sm:$0xff]  ;;  %v8849_v27 = vld [vmem:[%s17945_s3 + $0x578] sm:$0xff] }
 0x3b6   : > { %9050 = vmatprep.subr.mxu0 %v8825_v54  ;;  %9128 = vmatpush1.msra.mxu1 %v8882_v10  ;;  %v8848_v54 = vld [vmem:[%s17945_s3 + $0x570] sm:$0xff]  ;;  %v8847_v10 = vld [vmem:[%s17945_s3 + $0x568] sm:$0xff] }
 0x3b7   : > { %9051 = vmatpush1.msra.mxu0 %v8824_v15  ;;  %9129 = vmatprep.subr.mxu1 %v8881_v43  ;;  %v8846_v15 = vld [vmem:[%s17945_s3 + $0x560] sm:$0xff]  ;;  %v8845_v43 = vld [vmem:[%s17945_s3 + $0x558] sm:$0xff] }
 0x3b8   : > { %9052 = vmatprep.subr.mxu0 %v8823_v34  ;;  %9130 = vmatpush1.msra.mxu1 %v8880_v58  ;;  %v8844_v34 = vld [vmem:[%s17945_s3 + $0x550] sm:$0xff]  ;;  %v8843_v58 = vld [vmem:[%s17945_s3 + $0x548] sm:$0xff] }
 0x3b9   : > { %9053 = vmatpush1.msra.mxu0 %v8822_v38  ;;  %9131 = vmatprep.subr.mxu1 %v8879_v5  ;;  %v8842_v38 = vld [vmem:[%s17945_s3 + $0x540] sm:$0xff]  ;;  %v8841_v5 = vld [vmem:[%s17945_s3 + $0x538] sm:$0xff] }
 0x3ba   : > { %9054 = vmatprep.subr.mxu0 %v8821_v50  ;;  %9132 = vmatpush1.msra.mxu1 %v8878_v52  ;;  %v8840_v50 = vld [vmem:[%s17945_s3 + $0x530] sm:$0xff]  ;;  %v8839_v52 = vld [vmem:[%s17945_s3 + $0x528] sm:$0xff] }
 0x3bb   : > { %9055 = vmatpush1.msra.mxu0 %v8820_v19  ;;  %9133 = vmatprep.subr.mxu1 %v8877_v41  ;;  %v8838_v19 = vld [vmem:[%s17945_s3 + $0x520] sm:$0xff]  ;;  %v8837_v41 = vld [vmem:[%s17945_s3 + $0x518] sm:$0xff] }
 0x3bc   : > { %9056 = vmatprep.subr.mxu0 %v8819_v47  ;;  %9134 = vmatpush1.msra.mxu1 %v8876_v35  ;;  %v8836_v47 = vld [vmem:[%s17945_s3 + $0x510] sm:$0xff]  ;;  %v8835_v35 = vld [vmem:[%s17945_s3 + $0x508] sm:$0xff] }
 0x3bd   : > { %9057 = vmatpush1.msra.mxu0 %v8818_v8  ;;  %9135 = vmatprep.subr.mxu1 %v8875_v2  ;;  %v8834_v8 = vld [vmem:[%s17945_s3 + $0x500] sm:$0xff] }
 0x3be   : > { %9058 = vmatprep.subr.mxu0 %v8817_v46  ;;  %9136 = vmatpush1.msra.mxu1 %v8874_v42 }
 0x3bf   : > { %9059 = vmatpush1.msra.mxu0 %v8816_v44  ;;  %9137 = vmatprep.subr.mxu1 %v8873_v9 }
 0x3c0   : > { %9060 = vmatprep.subr.mxu0 %v8815_v53  ;;  %9138 = vmatpush1.msra.mxu1 %v8872_v59 }
 0x3c1   : > { %9061 = vmatpush1.msra.mxu0 %v8814_v63  ;;  %9139 = vmatprep.subr.mxu1 %v8871_v39 }
 0x3c2   : > { %9062 = vmatprep.subr.mxu0 %v8813_v3  ;;  %9140 = vmatpush1.msra.mxu1 %v8870_v23 }
 0x3c3   : > { %9063 = vmatpush1.msra.mxu0 %v8812_v18  ;;  %9141 = vmatprep.subr.mxu1 %v8869_v21 }
 0x3c4   : > { %9064 = vmatprep.subr.mxu0 %v8811_v62  ;;  %9142 = vmatpush1.msra.mxu1 %v8868_v36 }
 0x3c5   : > { %9065 = vmatpush1.msra.mxu0 %v8810_v30  ;;  %9143 = vmatprep.subr.mxu1 %v8867_v20  ;;  %v11669_v20 = vld [vmem:[%s17947_s5 + $0x8] sm:$0xff] }
 0x3c6   : > { %9066 = vmatprep.subr.mxu0 %v8809_v37  ;;  %9144 = vmatpush1.msra.mxu1 %v8866_v55  ;;  %v11668_v37 = vld [vmem:[%s17947_s5] sm:$0xff] }
 0x3c7   : > { %9067 = vmatpush1.msra.mxu0 %v8808_v49  ;;  %9177 = vmatprep.mubr.f32.mxu1 %v17981_v7 }
 0x3c8   : > { %9068 = vmatprep.subr.mxu0 %v8807_v6  ;;  %v13701_v6 = vld [vmem:[%s17946_s4 + $0x10] sm:$0xff] }
 0x3c9   : > { %9069 = vmatpush1.msra.mxu0 %v8806_v28 }
 0x3ca   : > { %9070 = vmatprep.subr.mxu0 %v8805_v16 }
 0x3cb   : > { %9071 = vmatpush1.msra.mxu0 %v8804_v60 }
 0x3cc   : > { %9072 = vmatprep.subr.mxu0 %v8803_v22  ;;  %v13702_v22 = vld [vmem:[%s17946_s4 + $0x18] sm:$0xff] }
 0x3cd   : > { %9073 = vmatpush1.msra.mxu0 %v8802_v4 }
 0x3ce   : > { %9074 = vmatprep.subr.mxu0 %v8865_v45 }
 0x3cf   : > { %9075 = vmatpush2.msra.mxu0 %v8864_v29  ;;  %v9184_v29 = vld [vmem:[%s17946_s4] sm:$0xff] }
 0x3d0   : > { %9076 = vmatprep.subr.mxu0 %v8863_v11 }
 0x3d1   : > { %9077 = vmatpush2.msra.mxu0 %v8862_v33 }
 0x3d2   : > { %9078 = vmatprep.subr.mxu0 %v8861_v40 }
 0x3d3   : > { %9079 = vmatpush2.msra.mxu0 %v8860_v1  ;;  %v9185_v1 = vld [vmem:[%s17946_s4 + $0x8] sm:$0xff] }
 0x3d4   : > { %9080 = vmatprep.subr.mxu0 %v8859_v56 }
 0x3d5   : > { %9081 = vmatpush2.msra.mxu0 %v8858_v24 }
 0x3d6   : > { %9082 = vmatprep.subr.mxu0 %v8857_v26  ;;  %v13711_v26 = vld [vmem:[%s17946_s4 + $0x20] sm:$0xff] }
 0x3d7   : > { %9083 = vmatpush2.msra.mxu0 %v8856_v57  ;;  %v13729_v57 = vld [vmem:[%s17946_s4 + $0x50] sm:$0xff] }
 0x3d8   : > { %9084 = vmatprep.subr.mxu0 %v8855_v32 }
 0x3d9   : > { %9085 = vmatpush2.msra.mxu0 %v8854_v25 }
 0x3da   : > { %9086 = vmatprep.subr.mxu0 %v8853_v0 }
 0x3db   : > { %9087 = vmatpush2.msra.mxu0 %v8852_v17 }
 0x3dc   : > { %9088 = vmatprep.subr.mxu0 %v8851_v51  ;;  %v13712_v51 = vld [vmem:[%s17946_s4 + $0x28] sm:$0xff] }
 0x3dd   : > { %9089 = vmatpush2.msra.mxu0 %v8850_v31  ;;  %v13730_v31 = vld [vmem:[%s17946_s4 + $0x58] sm:$0xff] }
 0x3de   : > { %9090 = vmatprep.subr.mxu0 %v8849_v27 }
 0x3df   : > { %9091 = vmatpush2.msra.mxu0 %v8848_v54 }
 0x3e0   : > { %9092 = vmatprep.subr.mxu0 %v8847_v10  ;;  %v13717_v10 = vld [vmem:[%s17946_s4 + $0x30] sm:$0xff] }
 0x3e1   : > { %9093 = vmatpush2.msra.mxu0 %v8846_v15  ;;  %v13741_v15 = vld [vmem:[%s17946_s4 + $0x70] sm:$0xff] }
 0x3e2   : > { %9094 = vmatprep.subr.mxu0 %v8845_v43 }
 0x3e3   : > { %9095 = vmatpush2.msra.mxu0 %v8844_v34 }
 0x3e4   : > { %9096 = vmatprep.subr.mxu0 %v8843_v58 }
 0x3e5   : > { %9097 = vmatpush2.msra.mxu0 %v8842_v38 }
 0x3e6   : > { %9098 = vmatprep.subr.mxu0 %v8841_v5  ;;  %v13718_v5 = vld [vmem:[%s17946_s4 + $0x38] sm:$0xff] }
 0x3e7   : > { %9099 = vmatpush2.msra.mxu0 %v8840_v50  ;;  %v13742_v50 = vld [vmem:[%s17946_s4 + $0x78] sm:$0xff] }
 0x3e8   : > { %9100 = vmatprep.subr.mxu0 %v8839_v52 }
 0x3e9   : > { %9101 = vmatpush2.msra.mxu0 %v8838_v19 }
 0x3ea   : > { %9102 = vmatprep.subr.mxu0 %v8837_v41  ;;  %v13723_v41 = vld [vmem:[%s17946_s4 + $0x40] sm:$0xff] }
 0x3eb   : > { %9103 = vmatpush2.msra.mxu0 %v8836_v47  ;;  %v13753_v47 = vld [vmem:[%s17946_s4 + $0x90] sm:$0xff] }
 0x3ec   : > { %9104 = vmatprep.subr.mxu0 %v8835_v35 }
 0x3ed   : > { %9105 = vmatpush2.msra.mxu0 %v8834_v8 }
 0x41f   : > { %v8653_v2 = vpop.permute.xlu0 %8652 }
 0x420   : > { %v8673_v46 = vmax.f32 %v16641_v48, %v8653_v2  ;;  %v8651_v42 = vpop.permute.xlu1 %8650 }
 0x421   : > { %v8658_v44 = vsel %vm2097_vm7, %v14626_v13, %v8651_v42  ;;  %v8659_v9 = vsel %vm2097_vm7, %v8651_v42, %v8653_v2  ;;  %v13724_v42 = vld [vmem:[%s17946_s4 + $0x48] sm:$0xff] }
 0x422   : > { %v8671_v53 = vmax.f32 %v16614_v14, %v8658_v44  ;;  %v8672_v59 = vmax.f32 %v16648_v12, %v8659_v9  ;;  %13700 = vmatmul.mubr.msk.f32.vlgmr.msra.gmra.mxu1 %vm2430_vm8, %v8673_v46  ;;  %vm9196_vm8 = vcmask 48128   ;;  %v13754_v44 = vld [vmem:[%s17946_s4 + $0x98] sm:$0xff] }
 0x423   : > { %9272 = vmatprep.mubr.f32.mxu1 %v17981_v7 }
 0x424   : > { %9106 = vmatprep.mubr.f32.mxu0 %v8672_v59  ;;  %v13735_v59 = vld [vmem:[%s17946_s4 + $0x60] sm:$0xff] }
 0x425   : > { %9107 = vmatmul.mubr.f32.vlgmr.msra.gmra.mxu0 %v8671_v53 }
 0x426   : > { %9752 = vmatprep.mubr.f32.mxu0 %v17981_v7 }
 0x46d   : > { %v8966_v48 = vpop.f32.mrf.mxu0 }
 0x46f   : > { %v9037_v63 = vpop.f32.mrf.mxu1  ;;  %v8968_v39 = vpop.f32.mrf.mxu0 }
 0x470   : > { %v9038_v3 = vadd.f32 %v9037_v63, %v8966_v48  ;;  %v13765_v48 = vld [vmem:[%s17946_s4 + $0xb0] sm:$0xff] }
 0x471   : > { %v9039_v61 = vpop.f32.mrf.mxu1 }
 0x472   : > { %v9040_v18 = vadd.f32 %v9039_v61, %v8968_v39 }
 0x4e2   : > { %v9179_v13 = vpop.f32.mrf.mxu1 }
 0x4e4   : > { %v9181_v36 = vpop.f32.mrf.mxu1 }
 0x4e5   : > { %v9108_v23 = vpop.f32.mrf.mxu0 }
 0x4e6   : > { %v9109_v21 = vadd.f32 %v9108_v23, %v9038_v3  ;;  %v13766_v23 = vld [vmem:[%s17946_s4 + $0xb8] sm:$0xff] }
 0x4e7   : > { %v9110_v14 = vpop.f32.mrf.mxu0 }
 0x4e8   : > { %v16924_v62 = vadd.f32 %v9179_v13, %v9109_v21  ;;  %v9111_v12 = vadd.f32 %v9110_v14, %v9040_v18  ;;  %v13736_v13 = vld [vmem:[%s17946_s4 + $0x68] sm:$0xff]  ;;  %v13747_v14 = vld [vmem:[%s17946_s4 + $0x80] sm:$0xff] }
 0x4ea   : > { %v16926_v30 = vadd.f32 %v9181_v36, %v9111_v12  ;;  %9191 = vrot.lane.b32.xlu1 %v16924_v62, %s18002_s2 }
 0x4ec   : > { %9193 = vrot.lane.b32.xlu0 %v16926_v30, %s18002_s2 }
 0x4ee   : > { %9375 = vrot.lane.b32.xlu1 %v16924_v62, %s18004_s30 }
 0x4f0   : > { %9377 = vrot.lane.b32.xlu0 %v16926_v30, %s18004_s30  ;;  %s14727_s30 = smov 98  }
 0x4f2   : > { %9474 = vrot.lane.b32.xlu1 %v16924_v62, %s18005_s17 }
 0x4f4   : > { %9476 = vrot.lane.b32.xlu0 %v16926_v30, %s18005_s17  ;;  %s14728_s17 = smov 97  }
 0x4f6   : > { %9573 = vrot.lane.b32.xlu1 %v16924_v62, %s18006_s15 }
 0x4f8   : > { %9575 = vrot.lane.b32.xlu0 %v16926_v30, %s18006_s15  ;;  %s14729_s15 = smov 86  }
 0x4fa   : > { %9672 = vrot.lane.b32.xlu1 %v16924_v62, %s14720_s0 }
 0x4fc   : > { %9674 = vrot.lane.b32.xlu0 %v16926_v30, %s14720_s0 }
 0x4fe   : > { %9772 = vrot.lane.b32.xlu1 %v16924_v62, %s14721_s1 }
 0x500   : > { %9774 = vrot.lane.b32.xlu0 %v16926_v30, %s14721_s1  ;;  %s14730_s1 = smov 85  }
 0x502   : > { %9872 = vrot.lane.b32.xlu1 %v16924_v62, %s14722_s20 }
 0x504   : > { %9874 = vrot.lane.b32.xlu0 %v16926_v30, %s14722_s20  ;;  %s14731_s20 = smov 84  }
 0x506   : > { %9972 = vrot.lane.b32.xlu1 %v16924_v62, %s14723_s22 }
 0x508   : > { %9974 = vrot.lane.b32.xlu0 %v16926_v30, %s14723_s22  ;;  %s14732_s22 = smov 83  }
 0x50a   : > { %10072 = vrot.lane.b32.xlu1 %v16924_v62, %s14724_s23 }
 0x50c   : > { %10074 = vrot.lane.b32.xlu0 %v16926_v30, %s14724_s23  ;;  %s14734_s23 = smov 72  }
 0x50e   : > { %10172 = vrot.lane.b32.xlu1 %v16924_v62, %s14725_s24 }
 0x510   : > { %10174 = vrot.lane.b32.xlu0 %v16926_v30, %s14725_s24  ;;  %s14735_s24 = smov 71  }
 0x512   : > { %10272 = vrot.lane.b32.xlu1 %v16924_v62, %s14726_s21 }
 0x514   : > { %10274 = vrot.lane.b32.xlu0 %v16926_v30, %s14726_s21  ;;  %s14736_s21 = smov 70  }
 0x516   : > { %10372 = vrot.lane.b32.xlu1 %v16924_v62, %s14727_s30 }
 0x518   : > { %10374 = vrot.lane.b32.xlu0 %v16926_v30, %s14727_s30  ;;  %s14737_s30 = smov 69  }
 0x51a   : > { %10472 = vrot.lane.b32.xlu1 %v16924_v62, %s14728_s17 }
 0x51c   : > { %10474 = vrot.lane.b32.xlu0 %v16926_v30, %s14728_s17  ;;  %s14738_s17 = smov 68  }
 0x51e   : > { %10572 = vrot.lane.b32.xlu1 %v16924_v62, %s18003_s16 }
 0x520   : > { %10574 = vrot.lane.b32.xlu0 %v16926_v30, %s18003_s16  ;;  %s14733_s16 = smov 82  }
 0x522   : > { %10671 = vrot.lane.b32.xlu1 %v16924_v62, %s14729_s15 }
 0x524   : > { %10673 = vrot.lane.b32.xlu0 %v16926_v30, %s14729_s15 }
 0x526   : > { %10771 = vrot.lane.b32.xlu1 %v16924_v62, %s14730_s1 }
 0x528   : > { %10773 = vrot.lane.b32.xlu0 %v16926_v30, %s14730_s1  ;;  %s13947_s1 = sshll.u32 %s14831_s29, 4  ;;  %s14739_s29 = smov [#allocation2]  }
 0x52a   : > { %10871 = vrot.lane.b32.xlu1 %v16924_v62, %s14731_s20 }
 0x52c   : > { %10873 = vrot.lane.b32.xlu0 %v16926_v30, %s14731_s20 }
 0x52e   : > { %10971 = vrot.lane.b32.xlu1 %v16924_v62, %s14732_s22 }
 0x530   : > { %10973 = vrot.lane.b32.xlu0 %v16926_v30, %s14732_s22 }
 0x532   : > { %11071 = vrot.lane.b32.xlu1 %v16924_v62, %s14733_s16 }
 0x534   : > { %11073 = vrot.lane.b32.xlu0 %v16926_v30, %s14733_s16  ;;  %s17907_s16 = scalar_lea.hbm %s17955_s13, %s13947_s1 }
 0x536   : > { %11171 = vrot.lane.b32.xlu1 %v16924_v62, %s14734_s23 }
 0x538   : > { %11173 = vrot.lane.b32.xlu0 %v16926_v30, %s14734_s23 }
 0x53a   : > { %11271 = vrot.lane.b32.xlu1 %v16924_v62, %s14735_s24 }
 0x53c   : > { %11273 = vrot.lane.b32.xlu0 %v16926_v30, %s14735_s24 }
 0x53e   : > { %11371 = vrot.lane.b32.xlu1 %v16924_v62, %s14736_s21 }
 0x540   : > { %11373 = vrot.lane.b32.xlu0 %v16926_v30, %s14736_s21  ;;  %s14640_s21 = sshll.u32 %s14739_s29, 4  ;;  %s14641_s21 = int_to_ptr.vmem [resolvable:$false] %s14640_s21 }
 0x542   : > { %11471 = vrot.lane.b32.xlu1 %v16924_v62, %s14737_s30 }
 0x544   : > { %11473 = vrot.lane.b32.xlu0 %v16926_v30, %s14737_s30  ;;  %s431_s30 = sand.u32 1, %s14688_s26  }
 0x545   : > { %s13327_s23 = scalar_lea.sflag [#allocation3], %s431_s30 }
 0x546   : > { %11571 = vrot.lane.b32.xlu1 %v16924_v62, %s14738_s17 }
 0x548   : > { %11573 = vrot.lane.b32.xlu0 %v16926_v30, %s14738_s17  ;;  %s14642_s17 = scalar_lea.vmem %s14641_s21, 32 }
 0x54a   : > { %11672 = vperm.xlu1 %14627, %v11668_v37   ;;  %v13748_v37 = vld [vmem:[%s17946_s4 + $0x88] sm:$0xff] }
 0x54c   : > { %11677 = vperm.xlu0 %14601, %v11669_v20  }
 0x55c   : > { %v9192_v55 = vpop.permute.xlu1 %9191 }
 0x55e   : > { %v9194_v49 = vpop.permute.xlu0 %9193 }
 0x55f   : > { %v9195_v28 = vsel %vm470_vm0, %v9192_v55, %v9194_v49  ;;  %13703 = vmatprep.subr.msk.mxu1 %vm9203_vm2, %v9194_v49  ;;  %v13778_v55 = vld [vmem:[%s17946_s4 + $0xd8] sm:$0xff] }
 0x560   : > { %v9376_v16 = vpop.permute.xlu1 %9375  ;;  %13704 = vmatpush1.msk.msra.mxu1 %vm9203_vm2, %v9195_v28  ;;  %v13759_v28 = vld [vmem:[%s17946_s4 + $0xa0] sm:$0xff] }
 0x561   : > { %13705 = vmatmul.mubr.msk.f32.vlgmr.msra.gmra.mxu1 %vm9196_vm8, %v13701_v6  ;;  %13707 = vmatprep.subr.msk.mxu1 %vm9203_vm2, %v16926_v30 }
 0x562   : > { %13708 = vmatpush1.msk.msra.mxu1 %vm9203_vm2, %v16924_v62  ;;  %v9378_v60 = vpop.permute.xlu0 %9377  ;;  %9278 = vmatprep.mubr.f32.mxu1 %v17981_v7  ;;  %v13777_v62 = vld [vmem:[%s17946_s4 + $0xd0] sm:$0xff] }
 0x563   : > { %13713 = vmatprep.subr.msk.mxu1 %vm9203_vm2, %v9378_v60  ;;  %v9379_v33 = vsel %vm1098_vm4, %v9376_v16, %v9378_v60  ;;  %vm9876_vm4 = vcmask 916480   ;;  %v13789_v16 = vld [vmem:[%s17946_s4 + $0xf0] sm:$0xff] }
 0x564   : > { %v9475_v4 = vpop.permute.xlu1 %9474 }
 0x565   : > { %13706 = vmatmul.mubr.msk.f32.gmra.mxu1 %vm9196_vm8, %v13702_v22 }
 0x566   : > { %v9477_v45 = vpop.permute.xlu0 %9476  ;;  %9359 = vmatprep.mubr.f32.mxu1 %v17981_v7 }
 0x567   : > { %v9478_v0 = vsel %vm1431_vm5, %v9475_v4, %v9477_v45 }
 0x568   : > { %v9574_v11 = vpop.permute.xlu1 %9573 }
 0x569   : > { %13709 = vmatmul.mubr.msk.f32.vlgmr.msra.gmra.mxu1 %vm9196_vm8, %v9184_v29  ;;  %v13760_v29 = vld [vmem:[%s17946_s4 + $0xa8] sm:$0xff] }
 0x56a   : > { %13714 = vmatpush1.msk.msra.mxu1 %vm9203_vm2, %v9379_v33  ;;  %v9576_v40 = vpop.permute.xlu0 %9575  ;;  %9365 = vmatprep.mubr.f32.mxu1 %v17981_v7 }
 0x56b   : > { %13719 = vmatprep.subr.msk.mxu1 %vm9203_vm2, %v9477_v45  ;;  %v9577_v58 = vsel %vm1764_vm6, %v9574_v11, %v9576_v40  ;;  %vm10076_vm6 = vcmask 900096   ;;  %v13790_v11 = vld [vmem:[%s17946_s4 + $0xf8] sm:$0xff] }
 0x56c   : > { %v9673_v56 = vpop.permute.xlu1 %9672 }
 0x56d   : > { %13710 = vmatmul.mubr.msk.f32.gmra.mxu1 %vm9196_vm8, %v9185_v1  ;;  %v13771_v1 = vld [vmem:[%s17946_s4 + $0xc0] sm:$0xff] }
 0x56e   : > { %v9675_v24 = vpop.permute.xlu0 %9674  ;;  %9454 = vmatprep.mubr.f32.mxu1 %v17981_v7 }
 0x56f   : > { %v9677_v32 = vsel %vm9676_vm15, %v9673_v56, %v9675_v24  ;;  %13731 = vmatprep.subr.msk.mxu0 %vm9203_vm2, %v9675_v24  ;;  %v13801_v56 = vld [vmem:[%s17946_s4 + $0x110] sm:$0xff] }
 0x570   : > { %v9773_v25 = vpop.permute.xlu1 %9772  ;;  %13732 = vmatpush1.msk.msra.mxu0 %vm9203_vm2, %v9677_v32 }
 0x571   : > { %13715 = vmatmul.mubr.msk.f32.vlgmr.msra.gmra.mxu1 %vm9196_vm8, %v13711_v26  ;;  %13733 = vmatmul.mubr.msk.f32.vlgmr.msra.gmra.mxu0 %vm9196_vm8, %v13729_v57 }
 0x572   : > { %13720 = vmatpush1.msk.msra.mxu1 %vm9203_vm2, %v9478_v0  ;;  %v9775_v17 = vpop.permute.xlu0 %9774  ;;  %9460 = vmatprep.mubr.f32.mxu1 %v17981_v7  ;;  %v13802_v0 = vld [vmem:[%s17946_s4 + $0x118] sm:$0xff] }
 0x573   : > { %13725 = vmatprep.subr.msk.mxu1 %vm9203_vm2, %v9576_v40  ;;  %9758 = vmatprep.mubr.f32.mxu0 %v17981_v7  ;;  %v9777_v2 = vsel %vm9776_vm9, %v9773_v25, %v9775_v17  ;;  %v13772_v25 = vld [vmem:[%s17946_s4 + $0xc8] sm:$0xff]  ;;  %vm11275_vm9 = vcmask 580608  }
 0x574   : > { %v9873_v27 = vpop.permute.xlu1 %9872 }
 0x575   : > { %13716 = vmatmul.mubr.msk.f32.gmra.mxu1 %vm9196_vm8, %v13712_v51  ;;  %13734 = vmatmul.mubr.msk.f32.gmra.mxu0 %vm9196_vm8, %v13730_v31  ;;  %v13783_v31 = vld [vmem:[%s17946_s4 + $0xe0] sm:$0xff] }
 0x576   : > { %v9875_v54 = vpop.permute.xlu0 %9874  ;;  %9553 = vmatprep.mubr.f32.mxu1 %v17981_v7  ;;  %9952 = vmatprep.mubr.f32.mxu0 %v17981_v7 }
 0x577   : > { %v9877_v43 = vsel %vm9876_vm4, %v9873_v27, %v9875_v54  ;;  %13743 = vmatprep.subr.msk.mxu0 %vm9203_vm2, %v9875_v54  ;;  %vm10875_vm4 = vcmask 687104   ;;  %v13813_v27 = vld [vmem:[%s17946_s4 + $0x130] sm:$0xff] }
 0x578   : > { %v9973_v34 = vpop.permute.xlu1 %9972  ;;  %13744 = vmatpush1.msk.msra.mxu0 %vm9203_vm2, %v9877_v43 }
 0x579   : > { %13721 = vmatmul.mubr.msk.f32.vlgmr.msra.gmra.mxu1 %vm9196_vm8, %v13717_v10  ;;  %13745 = vmatmul.mubr.msk.f32.vlgmr.msra.gmra.mxu0 %vm9196_vm8, %v13741_v15 }
 0x57a   : > { %13726 = vmatpush1.msk.msra.mxu1 %vm9203_vm2, %v9577_v58  ;;  %v9975_v38 = vpop.permute.xlu0 %9974  ;;  %9559 = vmatprep.mubr.f32.mxu1 %v17981_v7  ;;  %v13814_v58 = vld [vmem:[%s17946_s4 + $0x138] sm:$0xff] }
 0x57b   : > { %13737 = vmatprep.subr.msk.mxu1 %vm9203_vm2, %v9775_v17  ;;  %9958 = vmatprep.mubr.f32.mxu0 %v17981_v7  ;;  %v9977_v61 = vsel %vm9976_vm11, %v9973_v34, %v9975_v38  ;;  %v13784_v34 = vld [vmem:[%s17946_s4 + $0xe8] sm:$0xff]  ;;  %vm11475_vm11 = vcmask 564224  }
 0x57c   : > { %v10073_v52 = vpop.permute.xlu1 %10072 }
 0x57d   : > { %13722 = vmatmul.mubr.msk.f32.gmra.mxu1 %vm9196_vm8, %v13718_v5  ;;  %13746 = vmatmul.mubr.msk.f32.gmra.mxu0 %vm9196_vm8, %v13742_v50  ;;  %v13795_v50 = vld [vmem:[%s17946_s4 + $0x100] sm:$0xff] }
 0x57e   : > { %v10075_v19 = vpop.permute.xlu0 %10074  ;;  %9652 = vmatprep.mubr.f32.mxu1 %v17981_v7  ;;  %10152 = vmatprep.mubr.f32.mxu0 %v17981_v7 }
 0x57f   : > { %v10077_v35 = vsel %vm10076_vm6, %v10073_v52, %v10075_v19  ;;  %13755 = vmatprep.subr.msk.mxu0 %vm9203_vm2, %v10075_v19  ;;  %vm10775_vm6 = vcmask 695296   ;;  %v13825_v52 = vld [vmem:[%s17946_s4 + $0x150] sm:$0xff] }
 0x580   : > { %v10173_v8 = vpop.permute.xlu1 %10172  ;;  %13756 = vmatpush1.msk.msra.mxu0 %vm9203_vm2, %v10077_v35 }
 0x581   : > { %13727 = vmatmul.mubr.msk.f32.vlgmr.msra.gmra.mxu1 %vm9196_vm8, %v13723_v41  ;;  %13757 = vmatmul.mubr.msk.f32.vlgmr.msra.gmra.mxu0 %vm9196_vm8, %v13753_v47 }
 0x582   : > { %13738 = vmatpush1.msk.msra.mxu1 %vm9203_vm2, %v9777_v2  ;;  %v10175_v46 = vpop.permute.xlu0 %10174  ;;  %9658 = vmatprep.mubr.f32.mxu1 %v17981_v7  ;;  %v13826_v2 = vld [vmem:[%s17946_s4 + $0x158] sm:$0xff] }
 0x583   : > { %13749 = vmatprep.subr.msk.mxu1 %vm9203_vm2, %v9975_v38  ;;  %10158 = vmatprep.mubr.f32.mxu0 %v17981_v7  ;;  %v10177_v30 = vsel %vm10176_vm13, %v10173_v8, %v10175_v46  ;;  %v13796_v8 = vld [vmem:[%s17946_s4 + $0x108] sm:$0xff]  ;;  %vm11375_vm13 = vcmask 572416  }
 0x584   : > { %v10273_v9 = vpop.permute.xlu1 %10272 }
 0x585   : > { %13728 = vmatmul.mubr.msk.f32.gmra.mxu1 %vm9196_vm8, %v13724_v42  ;;  %13758 = vmatmul.mubr.msk.f32.gmra.mxu0 %vm9196_vm8, %v13754_v44  ;;  %v13807_v44 = vld [vmem:[%s17946_s4 + $0x120] sm:$0xff] }
 0x586   : > { %v10275_v53 = vpop.permute.xlu0 %10274  ;;  %9852 = vmatprep.mubr.f32.mxu1 %v17981_v7  ;;  %10352 = vmatprep.mubr.f32.mxu0 %v17981_v7 }
 0x587   : > { %v10277_v63 = vsel %vm10276_vm10, %v10273_v9, %v10275_v53  ;;  %13767 = vmatprep.subr.msk.mxu0 %vm9203_vm2, %v10275_v53  ;;  %vm10975_vm10 = vcmask 678912   ;;  %v13837_v9 = vld [vmem:[%s17946_s4 + $0x170] sm:$0xff] }
 0x588   : > { %v10373_v39 = vpop.permute.xlu1 %10372  ;;  %13768 = vmatpush1.msk.msra.mxu0 %vm9203_vm2, %v10277_v63  ;;  %v13838_v63 = vld [vmem:[%s17946_s4 + $0x178] sm:$0xff] }
 0x589   : > { %13739 = vmatmul.mubr.msk.f32.vlgmr.msra.gmra.mxu1 %vm9196_vm8, %v13735_v59  ;;  %13769 = vmatmul.mubr.msk.f32.vlgmr.msra.gmra.mxu0 %vm9196_vm8, %v13765_v48  ;;  %v13808_v48 = vld [vmem:[%s17946_s4 + $0x128] sm:$0xff] }
 0x58a   : > { %13750 = vmatpush1.msk.msra.mxu1 %vm9203_vm2, %v9977_v61  ;;  %v10375_v3 = vpop.permute.xlu0 %10374  ;;  %9858 = vmatprep.mubr.f32.mxu1 %v17981_v7 }
 0x58b   : > { %13761 = vmatprep.subr.msk.mxu1 %vm9203_vm2, %v10175_v46  ;;  %10358 = vmatprep.mubr.f32.mxu0 %v17981_v7  ;;  %v10377_v4 = vsel %vm10376_vm1, %v10373_v39, %v10375_v3  ;;  %v13819_v39 = vld [vmem:[%s17946_s4 + $0x140] sm:$0xff] }
 0x58c   : > { %v10473_v18 = vpop.permute.xlu1 %10472 }
 0x58d   : > { %13740 = vmatmul.mubr.msk.f32.gmra.mxu1 %vm9196_vm8, %v13736_v13  ;;  %13770 = vmatmul.mubr.msk.f32.gmra.mxu0 %vm9196_vm8, %v13766_v23  ;;  %v13820_v13 = vld [vmem:[%s17946_s4 + $0x148] sm:$0xff]  ;;  %v13831_v23 = vld [vmem:[%s17946_s4 + $0x160] sm:$0xff] }
 0x58e   : > { %v10475_v21 = vpop.permute.xlu0 %10474  ;;  %10052 = vmatprep.mubr.f32.mxu1 %v17981_v7  ;;  %10552 = vmatprep.mubr.f32.mxu0 %v17981_v7 }
 0x58f   : > { %v10477_v12 = vsel %vm10476_vm12, %v10473_v18, %v10475_v21  ;;  %13779 = vmatprep.subr.msk.mxu0 %vm9203_vm2, %v10475_v21  ;;  %vm11175_vm12 = vcmask 588800  }
 0x590   : > { %v10573_v36 = vpop.permute.xlu1 %10572  ;;  %13780 = vmatpush1.msk.msra.mxu0 %vm9203_vm2, %v10477_v12  ;;  %v13844_v12 = vld [vmem:[%s17946_s4 + $0x188] sm:$0xff] }
 0x591   : > { %13751 = vmatmul.mubr.msk.f32.vlgmr.msra.gmra.mxu1 %vm9196_vm8, %v13747_v14  ;;  %13781 = vmatmul.mubr.msk.f32.vlgmr.msra.gmra.mxu0 %vm9196_vm8, %v13777_v62  ;;  %v13832_v14 = vld [vmem:[%s17946_s4 + $0x168] sm:$0xff]  ;;  %v13843_v62 = vld [vmem:[%s17946_s4 + $0x180] sm:$0xff] }
 0x592   : > { %13762 = vmatpush1.msk.msra.mxu1 %vm9203_vm2, %v10177_v30  ;;  %v10575_v20 = vpop.permute.xlu0 %10574  ;;  %10058 = vmatprep.mubr.f32.mxu1 %v17981_v7 }
 0x593   : > { %13773 = vmatprep.subr.msk.mxu1 %vm9203_vm2, %v10375_v3  ;;  %10558 = vmatprep.mubr.f32.mxu0 %v17981_v7  ;;  %v10576_v57 = vsel %vm2097_vm7, %v10573_v36, %v10575_v20  ;;  %vm11075_vm7 = vcmask 670720  }
 0x594   : > { %v10672_v49 = vpop.permute.xlu1 %10671 }
 0x595   : > { %13752 = vmatmul.mubr.msk.f32.gmra.mxu1 %vm9196_vm8, %v13748_v37  ;;  %13782 = vmatmul.mubr.msk.f32.gmra.mxu0 %vm9196_vm8, %v13778_v55 }
 0x596   : > { %v10674_v6 = vpop.permute.xlu0 %10673  ;;  %10252 = vmatprep.mubr.f32.mxu1 %v17981_v7  ;;  %10751 = vmatprep.mubr.f32.mxu0 %v17981_v7 }
 0x597   : > { %v10676_v60 = vsel %vm10675_vm14, %v10672_v49, %v10674_v6  ;;  %13791 = vmatprep.subr.msk.mxu0 %vm9203_vm2, %v10674_v6  ;;  %vm11575_vm14 = vcmask 556032  }
 0x598   : > { %v10772_v22 = vpop.permute.xlu1 %10771  ;;  %13792 = vmatpush1.msk.msra.mxu0 %vm9203_vm2, %v10676_v60 }
 0x599   : > { %13763 = vmatmul.mubr.msk.f32.vlgmr.msra.gmra.mxu1 %vm9196_vm8, %v13759_v28  ;;  %13793 = vmatmul.mubr.msk.f32.vlgmr.msra.gmra.mxu0 %vm9196_vm8, %v13789_v16 }
 0x59a   : > { %13774 = vmatpush1.msk.msra.mxu1 %vm9203_vm2, %v10377_v4  ;;  %v10774_v45 = vpop.permute.xlu0 %10773  ;;  %10258 = vmatprep.mubr.f32.mxu1 %v17981_v7 }
 0x59b   : > { %13785 = vmatprep.subr.msk.mxu1 %vm9203_vm2, %v10575_v20  ;;  %10757 = vmatprep.mubr.f32.mxu0 %v17981_v7  ;;  %v10776_v15 = vsel %vm10775_vm6, %v10772_v22, %v10774_v45 }
 0x59c   : > { %v10872_v33 = vpop.permute.xlu1 %10871 }
 0x59d   : > { %13764 = vmatmul.mubr.msk.f32.gmra.mxu1 %vm9196_vm8, %v13760_v29  ;;  %13794 = vmatmul.mubr.msk.f32.gmra.mxu0 %vm9196_vm8, %v13790_v11 }
 0x59e   : > { %v10874_v40 = vpop.permute.xlu0 %10873  ;;  %10452 = vmatprep.mubr.f32.mxu1 %v17981_v7  ;;  %10951 = vmatprep.mubr.f32.mxu0 %v17981_v7 }
 0x59f   : > { %v10876_v24 = vsel %vm10875_vm4, %v10872_v33, %v10874_v40  ;;  %13803 = vmatprep.subr.msk.mxu0 %vm9203_vm2, %v10874_v40 }
 0x5a0   : > { %v10972_v26 = vpop.permute.xlu1 %10971  ;;  %13804 = vmatpush1.msk.msra.mxu0 %vm9203_vm2, %v10876_v24 }
 0x5a1   : > { %13775 = vmatmul.mubr.msk.f32.vlgmr.msra.gmra.mxu1 %vm9196_vm8, %v13771_v1  ;;  %13805 = vmatmul.mubr.msk.f32.vlgmr.msra.gmra.mxu0 %vm9196_vm8, %v13801_v56 }
 0x5a2   : > { %13786 = vmatpush1.msk.msra.mxu1 %vm9203_vm2, %v10576_v57  ;;  %v10974_v32 = vpop.permute.xlu0 %10973  ;;  %10458 = vmatprep.mubr.f32.mxu1 %v17981_v7 }
 0x5a3   : > { %13797 = vmatprep.subr.msk.mxu1 %vm9203_vm2, %v10774_v45  ;;  %10957 = vmatprep.mubr.f32.mxu0 %v17981_v7  ;;  %v10976_v47 = vsel %vm10975_vm10, %v10972_v26, %v10974_v32 }
 0x5a4   : > { %v11072_v17 = vpop.permute.xlu1 %11071 }
 0x5a5   : > { %13776 = vmatmul.mubr.msk.f32.gmra.mxu1 %vm9196_vm8, %v13772_v25  ;;  %13806 = vmatmul.mubr.msk.f32.gmra.mxu0 %vm9196_vm8, %v13802_v0 }
 0x5a6   : > { %v11074_v51 = vpop.permute.xlu0 %11073  ;;  %10651 = vmatprep.mubr.f32.mxu1 %v17981_v7  ;;  %11151 = vmatprep.mubr.f32.mxu0 %v17981_v7 }
 0x5a7   : > { %v11076_v54 = vsel %vm11075_vm7, %v11072_v17, %v11074_v51  ;;  %13815 = vmatprep.subr.msk.mxu0 %vm9203_vm2, %v11074_v51 }
 0x5a8   : > { %v11172_v10 = vpop.permute.xlu1 %11171  ;;  %13816 = vmatpush1.msk.msra.mxu0 %vm9203_vm2, %v11076_v54 }
 0x5a9   : > { %13787 = vmatmul.mubr.msk.f32.vlgmr.msra.gmra.mxu1 %vm9196_vm8, %v13783_v31  ;;  %13817 = vmatmul.mubr.msk.f32.vlgmr.msra.gmra.mxu0 %vm9196_vm8, %v13813_v27 }
 0x5aa   : > { %13798 = vmatpush1.msk.msra.mxu1 %vm9203_vm2, %v10776_v15  ;;  %v11174_v43 = vpop.permute.xlu0 %11173  ;;  %10657 = vmatprep.mubr.f32.mxu1 %v17981_v7 }
 0x5ab   : > { %13809 = vmatprep.subr.msk.mxu1 %vm9203_vm2, %v10974_v32  ;;  %11157 = vmatprep.mubr.f32.mxu0 %v17981_v7  ;;  %v11176_v59 = vsel %vm11175_vm12, %v11172_v10, %v11174_v43 }
 0x5ac   : > { %v11272_v38 = vpop.permute.xlu1 %11271 }
 0x5ad   : > { %13788 = vmatmul.mubr.msk.f32.gmra.mxu1 %vm9196_vm8, %v13784_v34  ;;  %13818 = vmatmul.mubr.msk.f32.gmra.mxu0 %vm9196_vm8, %v13814_v58 }
 0x5ae   : > { %v11274_v5 = vpop.permute.xlu0 %11273  ;;  %10851 = vmatprep.mubr.f32.mxu1 %v17981_v7  ;;  %11351 = vmatprep.mubr.f32.mxu0 %v17981_v7 }
 0x5af   : > { %v11276_v19 = vsel %vm11275_vm9, %v11272_v38, %v11274_v5  ;;  %13827 = vmatprep.subr.msk.mxu0 %vm9203_vm2, %v11274_v5 }
 0x5b0   : > { %v11372_v41 = vpop.permute.xlu1 %11371  ;;  %13828 = vmatpush1.msk.msra.mxu0 %vm9203_vm2, %v11276_v19 }
 0x5b1   : > { %13799 = vmatmul.mubr.msk.f32.vlgmr.msra.gmra.mxu1 %vm9196_vm8, %v13795_v50  ;;  %13829 = vmatmul.mubr.msk.f32.vlgmr.msra.gmra.mxu0 %vm9196_vm8, %v13825_v52 }
 0x5b2   : > { %13810 = vmatpush1.msk.msra.mxu1 %vm9203_vm2, %v10976_v47  ;;  %v11374_v35 = vpop.permute.xlu0 %11373  ;;  %10857 = vmatprep.mubr.f32.mxu1 %v17981_v7 }
 0x5b3   : > { %13821 = vmatprep.subr.msk.mxu1 %vm9203_vm2, %v11174_v43  ;;  %11357 = vmatprep.mubr.f32.mxu0 %v17981_v7  ;;  %v11376_v61 = vsel %vm11375_vm13, %v11372_v41, %v11374_v35 }
 0x5b4   : > { %v11472_v46 = vpop.permute.xlu1 %11471 }
 0x5b5   : > { %13800 = vmatmul.mubr.msk.f32.gmra.mxu1 %vm9196_vm8, %v13796_v8  ;;  %13830 = vmatmul.mubr.msk.f32.gmra.mxu0 %vm9196_vm8, %v13826_v2 }
 0x5b6   : > { %v11474_v42 = vpop.permute.xlu0 %11473  ;;  %11051 = vmatprep.mubr.f32.mxu1 %v17981_v7  ;;  %11551 = vmatprep.mubr.f32.mxu0 %v17981_v7 }
 0x5b7   : > { %v11476_v53 = vsel %vm11475_vm11, %v11472_v46, %v11474_v42  ;;  %13839 = vmatprep.subr.msk.mxu0 %vm9203_vm2, %v11474_v42 }
 0x5b8   : > { %13840 = vmatpush1.msk.msra.mxu0 %vm9203_vm2, %v11476_v53  ;;  %v11572_v18 = vpop.permute.xlu1 %11571 }
 0x5b9   : > { %13811 = vmatmul.mubr.msk.f32.vlgmr.msra.gmra.mxu1 %vm9196_vm8, %v13807_v44  ;;  %13841 = vmatmul.mubr.msk.f32.vlgmr.msra.gmra.mxu0 %vm9196_vm8, %v13837_v9 }
 0x5ba   : > { %13822 = vmatpush1.msk.msra.mxu1 %vm9203_vm2, %v11176_v59  ;;  %11057 = vmatprep.mubr.f32.mxu1 %v17981_v7  ;;  %v11574_v3 = vpop.permute.xlu0 %11573 }
 0x5bb   : > { %13833 = vmatprep.subr.msk.mxu1 %vm9203_vm2, %v11374_v35  ;;  %11557 = vmatprep.mubr.f32.mxu0 %v17981_v7  ;;  %v11576_v21 = vsel %vm11575_vm14, %v11572_v18, %v11574_v3 }
 0x5bd   : > { %13812 = vmatmul.mubr.msk.f32.gmra.mxu1 %vm9196_vm8, %v13808_v48  ;;  %13842 = vmatmul.mubr.msk.f32.gmra.mxu0 %vm9196_vm8, %v13838_v63 }
 0x5be   : > { %11251 = vmatprep.mubr.f32.mxu1 %v17981_v7 }
 0x5c1   : > { %13823 = vmatmul.mubr.msk.f32.vlgmr.msra.gmra.mxu1 %vm9196_vm8, %v13819_v39 }
 0x5c2   : > { %13834 = vmatpush1.msk.msra.mxu1 %vm9203_vm2, %v11376_v61  ;;  %11257 = vmatprep.mubr.f32.mxu1 %v17981_v7 }
 0x5c3   : > { %13845 = vmatprep.subr.msk.mxu1 %vm9203_vm2, %v11574_v3 }
 0x5c5   : > { %13824 = vmatmul.mubr.msk.f32.gmra.mxu1 %vm9196_vm8, %v13820_v13 }
 0x5c6   : > { %11451 = vmatprep.mubr.f32.mxu1 %v17981_v7 }
 0x5c9   : > { %13835 = vmatmul.mubr.msk.f32.vlgmr.msra.gmra.mxu1 %vm9196_vm8, %v13831_v23 }
 0x5ca   : > { %13846 = vmatpush1.msk.msra.mxu1 %vm9203_vm2, %v11576_v21  ;;  %11457 = vmatprep.mubr.f32.mxu1 %v17981_v7  ;;  %vm11750_vm2 = vcmask 1044480  }
 0x5cb   : > { %14286 = vmatprep.subr.mxu1 %v17981_v7 }
 0x5cd   : > { %13836 = vmatmul.mubr.msk.f32.gmra.mxu1 %vm9196_vm8, %v13832_v14 }
 0x5ce   : > { %11651 = vmatprep.mubr.f32.mxu1 %v17981_v7 }
 0x5d1   : > { %13847 = vmatmul.mubr.msk.f32.vlgmr.msra.gmra.mxu1 %vm9196_vm8, %v13843_v62 }
 0x5d2   : > { %11657 = vmatprep.mubr.f32.mxu1 %v17981_v7 }
 0x5d5   : > { %13848 = vmatmul.mubr.msk.f32.gmra.mxu1 %vm9196_vm8, %v13844_v12  ;;  %vm11838_vm8 = vcmask 1040384  }
 0x5d6   : > { %14294 = vmatprep.mubr.msk.f32.mxu1 %vm14708_vm3, %v17981_v7 }
 0x621   : > { %v9274_v36 = vpop.f32.mrf.mxu1 }
 0x623   : > { %v9276_v30 = vpop.f32.mrf.mxu1 }
 0x625   : > { %v9280_v20 = vpop.f32.mrf.mxu1 }
 0x627   : > { %v9282_v37 = vpop.f32.mrf.mxu1 }
 0x629   : > { %v9361_v55 = vpop.f32.mrf.mxu1 }
 0x62a   : > { %v9362_v41 = vadd.f32 %v9361_v55, %v9274_v36 }
 0x62b   : > { %v9363_v49 = vpop.f32.mrf.mxu1 }
 0x62c   : > { %v9364_v8 = vadd.f32 %v9363_v49, %v9276_v30 }
 0x62d   : > { %v9367_v6 = vpop.f32.mrf.mxu1 }
 0x62e   : > { %v9368_v44 = vadd.f32 %v9367_v6, %v9280_v20 }
 0x62f   : > { %v9369_v28 = vpop.f32.mrf.mxu1 }
 0x630   : > { %v9370_v63 = vadd.f32 %v9369_v28, %v9282_v37 }
 0x631   : > { %v9456_v16 = vpop.f32.mrf.mxu1  ;;  %v9754_v60 = vpop.f32.mrf.mxu0 }
 0x632   : > { %v9467_v2 = vadd.f32 %v9456_v16, %v9362_v41 }
 0x633   : > { %v9458_v22 = vpop.f32.mrf.mxu1  ;;  %v9756_v4 = vpop.f32.mrf.mxu0 }
 0x634   : > { %v9468_v9 = vadd.f32 %v9458_v22, %v9364_v8 }
 0x635   : > { %v9462_v45 = vpop.f32.mrf.mxu1  ;;  %v9760_v29 = vpop.f32.mrf.mxu0 }
 0x636   : > { %v9469_v39 = vadd.f32 %v9462_v45, %v9368_v44 }
 0x637   : > { %v9464_v11 = vpop.f32.mrf.mxu1  ;;  %v9762_v33 = vpop.f32.mrf.mxu0 }
 0x638   : > { %v9470_v18 = vadd.f32 %v9464_v11, %v9370_v63 }
 0x639   : > { %v9555_v40 = vpop.f32.mrf.mxu1  ;;  %v9954_v1 = vpop.f32.mrf.mxu0 }
 0x63a   : > { %v9566_v53 = vadd.f32 %v9555_v40, %v9467_v2 }
 0x63b   : > { %v9557_v56 = vpop.f32.mrf.mxu1  ;;  %v17304_v24 = vpop.f32.mrf.mxu0 }
 0x63c   : > { %v9567_v61 = vadd.f32 %v9557_v56, %v9468_v9 }
 0x63d   : > { %v9561_v26 = vpop.f32.mrf.mxu1  ;;  %v17306_v57 = vpop.f32.mrf.mxu0 }
 0x63e   : > { %v9568_v21 = vadd.f32 %v9561_v26, %v9469_v39 }
 0x63f   : > { %v9563_v32 = vpop.f32.mrf.mxu1  ;;  %v17308_v25 = vpop.f32.mrf.mxu0 }
 0x640   : > { %v9569_v36 = vadd.f32 %v9563_v32, %v9470_v18 }
 0x641   : > { %v9654_v0 = vpop.f32.mrf.mxu1  ;;  %v17310_v17 = vpop.f32.mrf.mxu0 }
 0x642   : > { %v9665_v3 = vadd.f32 %v9654_v0, %v9566_v53 }
 0x643   : > { %v9656_v51 = vpop.f32.mrf.mxu1  ;;  %v17312_v31 = vpop.f32.mrf.mxu0 }
 0x644   : > { %v9666_v14 = vadd.f32 %v9656_v51, %v9567_v61  ;;  %v9765_v30 = vadd.f32 %v9754_v60, %v9665_v3 }
 0x645   : > { %v9660_v27 = vpop.f32.mrf.mxu1  ;;  %v17314_v54 = vpop.f32.mrf.mxu0 }
 0x646   : > { %v9667_v20 = vadd.f32 %v9660_v27, %v9568_v21  ;;  %v9766_v6 = vadd.f32 %v9756_v4, %v9666_v14 }
 0x647   : > { %v9662_v10 = vpop.f32.mrf.mxu1  ;;  %v17316_v15 = vpop.f32.mrf.mxu0 }
 0x648   : > { %v9668_v37 = vadd.f32 %v9662_v10, %v9569_v36  ;;  %v9767_v45 = vadd.f32 %v9760_v29, %v9667_v20 }
 0x649   : > { %v9854_v43 = vpop.f32.mrf.mxu1  ;;  %v17318_v34 = vpop.f32.mrf.mxu0 }
 0x64a   : > { %v9865_v28 = vadd.f32 %v9854_v43, %v9765_v30  ;;  %v9768_v26 = vadd.f32 %v9762_v33, %v9668_v37 }
 0x64b   : > { %v9856_v58 = vpop.f32.mrf.mxu1  ;;  %v17320_v38 = vpop.f32.mrf.mxu0 }
 0x64c   : > { %v9866_v40 = vadd.f32 %v9856_v58, %v9766_v6  ;;  %v9965_v0 = vadd.f32 %v9954_v1, %v9865_v28 }
 0x64d   : > { %v9860_v5 = vpop.f32.mrf.mxu1  ;;  %v17322_v50 = vpop.f32.mrf.mxu0 }
 0x64e   : > { %v9867_v51 = vadd.f32 %v9860_v5, %v9767_v45  ;;  %v9966_v27 = vadd.f32 %v17304_v24, %v9866_v40 }
 0x64f   : > { %v9862_v52 = vpop.f32.mrf.mxu1  ;;  %v17324_v19 = vpop.f32.mrf.mxu0 }
 0x650   : > { %v9868_v41 = vadd.f32 %v9862_v52, %v9768_v26  ;;  %v9967_v43 = vadd.f32 %v17306_v57, %v9867_v51 }
 0x651   : > { %v10054_v47 = vpop.f32.mrf.mxu1  ;;  %v17326_v35 = vpop.f32.mrf.mxu0 }
 0x652   : > { %v10065_v8 = vadd.f32 %v10054_v47, %v9965_v0  ;;  %v9968_v58 = vadd.f32 %v17308_v25, %v9868_v41 }
 0x653   : > { %v10056_v46 = vpop.f32.mrf.mxu1  ;;  %v17328_v42 = vpop.f32.mrf.mxu0 }
 0x654   : > { %v10066_v2 = vadd.f32 %v10056_v46, %v9966_v27  ;;  %v10165_v9 = vadd.f32 %v17310_v17, %v10065_v8 }
 0x655   : > { %v10060_v59 = vpop.f32.mrf.mxu1  ;;  %v17330_v48 = vpop.f32.mrf.mxu0 }
 0x656   : > { %v10067_v33 = vadd.f32 %v10060_v59, %v9967_v43  ;;  %v10166_v53 = vadd.f32 %v17312_v31, %v10066_v2 }
 0x657   : > { %v10062_v13 = vpop.f32.mrf.mxu1  ;;  %v17332_v23 = vpop.f32.mrf.mxu0 }
 0x658   : > { %v10068_v63 = vadd.f32 %v10062_v13, %v9968_v58  ;;  %v10167_v39 = vadd.f32 %v17314_v54, %v10067_v33 }
 0x659   : > { %v10254_v62 = vpop.f32.mrf.mxu1  ;;  %v17334_v12 = vpop.f32.mrf.mxu0 }
 0x65a   : > { %v10265_v24 = vadd.f32 %v10254_v62, %v10165_v9  ;;  %v10168_v3 = vadd.f32 %v17316_v15, %v10068_v63 }
 0x65b   : > { %v10256_v55 = vpop.f32.mrf.mxu1  ;;  %v17336_v49 = vpop.f32.mrf.mxu0 }
 0x65c   : > { %v10266_v61 = vadd.f32 %v10256_v55, %v10166_v53  ;;  %v10365_v25 = vadd.f32 %v17318_v34, %v10265_v24 }
 0x65d   : > { %v10260_v16 = vpop.f32.mrf.mxu1  ;;  %v17338_v22 = vpop.f32.mrf.mxu0 }
 0x65e   : > { %v10267_v18 = vadd.f32 %v10260_v16, %v10167_v39  ;;  %v10366_v59 = vadd.f32 %v17320_v38, %v10266_v61 }
 0x65f   : > { %v10262_v11 = vpop.f32.mrf.mxu1  ;;  %v17340_v56 = vpop.f32.mrf.mxu0 }
 0x660   : > { %v10268_v21 = vadd.f32 %v10262_v11, %v10168_v3  ;;  %v10367_v62 = vadd.f32 %v17322_v50, %v10267_v18 }
 0x661   : > { %v10454_v32 = vpop.f32.mrf.mxu1  ;;  %v10953_v60 = vpop.f32.mrf.mxu0 }
 0x662   : > { %v10465_v14 = vadd.f32 %v10454_v32, %v10365_v25  ;;  %v10368_v54 = vadd.f32 %v17324_v19, %v10268_v21 }
 0x663   : > { %v10456_v4 = vpop.f32.mrf.mxu1  ;;  %v10955_v10 = vpop.f32.mrf.mxu0 }
 0x664   : > { %v10466_v36 = vadd.f32 %v10456_v4, %v10366_v59  ;;  %v10565_v20 = vadd.f32 %v17326_v35, %v10465_v14 }
 0x665   : > { %v10460_v44 = vpop.f32.mrf.mxu1  ;;  %v10959_v29 = vpop.f32.mrf.mxu0 }
 0x666   : > { %v10467_v55 = vadd.f32 %v10460_v44, %v10367_v62  ;;  %v10566_v34 = vadd.f32 %v17328_v42, %v10466_v36 }
 0x667   : > { %v10462_v1 = vpop.f32.mrf.mxu1  ;;  %v10961_v5 = vpop.f32.mrf.mxu0 }
 0x668   : > { %v10468_v37 = vadd.f32 %v10462_v1, %v10368_v54  ;;  %v10567_v16 = vadd.f32 %v17330_v48, %v10467_v55 }
 0x669   : > { %v10653_v52 = vpop.f32.mrf.mxu1  ;;  %v11153_v47 = vpop.f32.mrf.mxu0 }
 0x66a   : > { %v10664_v28 = vadd.f32 %v10653_v52, %v10565_v20  ;;  %v10568_v50 = vadd.f32 %v17332_v23, %v10468_v37 }
 0x66b   : > { %v10655_v57 = vpop.f32.mrf.mxu1  ;;  %v11155_v46 = vpop.f32.mrf.mxu0 }
 0x66c   : > { %v10665_v45 = vadd.f32 %v10655_v57, %v10566_v34  ;;  %v10764_v26 = vadd.f32 %v17334_v12, %v10664_v28 }
 0x66d   : > { %v10659_v17 = vpop.f32.mrf.mxu1  ;;  %v11159_v13 = vpop.f32.mrf.mxu0 }
 0x66e   : > { %v10666_v19 = vadd.f32 %v10659_v17, %v10567_v16  ;;  %v10765_v35 = vadd.f32 %v17336_v49, %v10665_v45 }
 0x66f   : > { %v10661_v31 = vpop.f32.mrf.mxu1  ;;  %v11161_v6 = vpop.f32.mrf.mxu0 }
 0x670   : > { %v10667_v51 = vadd.f32 %v10661_v31, %v10568_v50  ;;  %v10766_v41 = vadd.f32 %v17338_v22, %v10666_v19  ;;  %v11743_v50 = vld [vmem:[%s17948_s6 + $0x78] sm:$0x1f] }
 0x671   : > { %v10853_v30 = vpop.f32.mrf.mxu1  ;;  %v11353_v11 = vpop.f32.mrf.mxu0  ;;  %14251 = vmatprep.subr.msk.mxu0 %vm11750_vm2, %v11743_v50 }
 0x672   : > { %v10864_v32 = vadd.f32 %v10853_v30, %v10764_v26  ;;  %v10767_v48 = vadd.f32 %v17340_v56, %v10667_v51  ;;  %v11742_v26 = vld [vmem:[%s17948_s6 + $0x70] sm:$0xff]  ;;  %14252 = vmatpush3.msk.msra.mxu0 %vm11750_vm2, %v11743_v50  ;;  %v13854_v50 = vld [vmem:[%s17949_s7 + $0x20] sm:$0xff] }
 0x673   : > { %v10855_v15 = vpop.f32.mrf.mxu1  ;;  %v11355_v42 = vpop.f32.mrf.mxu0  ;;  %14253 = vmatprep.subr.mxu0 %v11742_v26 }
 0x674   : > { %v10865_v8 = vadd.f32 %v10855_v15, %v10765_v35  ;;  %v10964_v43 = vadd.f32 %v10953_v60, %v10864_v32  ;;  %14254 = vmatpush3.msra.mxu0 %v11742_v26  ;;  %v13885_v26 = vld [vmem:[%s17949_s7 + $0xc8] sm:$0xff] }
 0x675   : > { %v10859_v38 = vpop.f32.mrf.mxu1  ;;  %v11359_v23 = vpop.f32.mrf.mxu0 }
 0x676   : > { %v10866_v2 = vadd.f32 %v10859_v38, %v10766_v41  ;;  %v10965_v58 = vadd.f32 %v10955_v10, %v10865_v8 }
 0x677   : > { %v10861_v40 = vpop.f32.mrf.mxu1  ;;  %v11361_v63 = vpop.f32.mrf.mxu0 }
 0x678   : > { %v10867_v12 = vadd.f32 %v10861_v40, %v10767_v48  ;;  %v10966_v1 = vadd.f32 %v10959_v29, %v10866_v2 }
 0x679   : > { %v11053_v0 = vpop.f32.mrf.mxu1  ;;  %v11553_v60 = vpop.f32.mrf.mxu0 }
 0x67a   : > { %v11064_v9 = vadd.f32 %v11053_v0, %v10964_v43  ;;  %v10967_v24 = vadd.f32 %v10961_v5, %v10867_v12  ;;  %v11740_v43 = vld [vmem:[%s17948_s6 + $0x60] sm:$0xff]  ;;  %v11738_v12 = vld [vmem:[%s17948_s6 + $0x50] sm:$0xff] }
 0x67b   : > { %v11055_v27 = vpop.f32.mrf.mxu1  ;;  %v11555_v29 = vpop.f32.mrf.mxu0 }
 0x67c   : > { %v11065_v49 = vadd.f32 %v11055_v27, %v10965_v58  ;;  %v11164_v52 = vadd.f32 %v11153_v47, %v11064_v9  ;;  %v11741_v27 = vld [vmem:[%s17948_s6 + $0x68] sm:$0xff] }
 0x67d   : > { %v11059_v4 = vpop.f32.mrf.mxu1  ;;  %14255 = vmatprep.subr.mxu0 %v11741_v27  ;;  %v11737_v9 = vld [vmem:[%s17948_s6 + $0x48] sm:$0xff] }
 0x67e   : > { %v11066_v39 = vadd.f32 %v11059_v4, %v10966_v1  ;;  %v11165_v61 = vadd.f32 %v11155_v46, %v11065_v49  ;;  %v11559_v46 = vpop.f32.mrf.mxu0  ;;  %14256 = vmatpush3.msra.mxu0 %v11741_v27  ;;  %v11735_v1 = vld [vmem:[%s17948_s6 + $0x38] sm:$0xff]  ;;  %v11734_v49 = vld [vmem:[%s17948_s6 + $0x30] sm:$0xff] }
 0x67f   : > { %v11061_v44 = vpop.f32.mrf.mxu1  ;;  %14257 = vmatprep.subr.mxu0 %v11740_v43  ;;  %v13899_v27 = vld [vmem:[%s17949_s7 + $0x118] sm:$0x1] }
 0x680   : > { %v11067_v57 = vadd.f32 %v11061_v44, %v10967_v24  ;;  %v11166_v25 = vadd.f32 %v11159_v13, %v11066_v39  ;;  %v11673_v13 = vpop.permute.xlu1 %11672  ;;  %v11561_v38 = vpop.f32.mrf.mxu0  ;;  %14258 = vmatpush3.msra.mxu0 %v11740_v43  ;;  %v11731_v24 = vld [vmem:[%s17948_s6 + $0x18] sm:$0xff]  ;;  %v11729_v39 = vld [vmem:[%s17948_s6 + $0x8] sm:$0xff] }
 0x681   : > { %v11253_v33 = vpop.f32.mrf.mxu1  ;;  %v13869_v43 = vld [vmem:[%s17949_s7 + $0x78] sm:$0x1] }
 0x682   : > { %v11264_v3 = vadd.f32 %v11253_v33, %v11164_v52  ;;  %v11167_v10 = vadd.f32 %v11161_v6, %v11067_v57  ;;  %v11736_v33 = vld [vmem:[%s17948_s6 + $0x40] sm:$0xff]  ;;  %v11730_v52 = vld [vmem:[%s17948_s6 + $0x10] sm:$0xff]  ;;  %v11833_v57 = vld [vmem:[%s17949_s7 + $0x18] sm:$0x1] }
 0x683   : > { %v11255_v53 = vpop.f32.mrf.mxu1  ;;  %14287 = vmatpush3.msk.msra.mxu1 %vm11838_vm8, %v11833_v57  ;;  %v13921_v57 = vld [vmem:[%s17949_s7 + $0x188] sm:$0xff] }
 0x684   : > { %v11265_v18 = vadd.f32 %v11255_v53, %v11165_v61  ;;  %v11364_v59 = vadd.f32 %v11353_v11, %v11264_v3  ;;  %v11733_v53 = vld [vmem:[%s17948_s6 + $0x28] sm:$0xff]  ;;  %v11832_v3 = vld [vmem:[%s17949_s7 + $0x10] sm:$0xff]  ;;  %14288 = vmatprep.subr.mxu1 %v17981_v7 }
 0x685   : > { %v11259_v22 = vpop.f32.mrf.mxu1  ;;  %14289 = vmatpush3.msra.mxu1 %v11832_v3 }
 0x686   : > { %v11266_v21 = vadd.f32 %v11259_v22, %v11166_v25  ;;  %v11365_v31 = vadd.f32 %v11355_v42, %v11265_v18  ;;  %v11678_v42 = vpop.permute.xlu0 %11677  ;;  %v11728_v22 = vld [vmem:[%s17948_s6] sm:$0xff]  ;;  %14290 = vmatprep.subr.mxu1 %v17981_v7 }
 0x687   : > { %v11261_v56 = vpop.f32.mrf.mxu1 }
 0x688   : > { %v11267_v62 = vadd.f32 %v11261_v56, %v11167_v10  ;;  %v11366_v47 = vadd.f32 %v11359_v23, %v11266_v21  ;;  %v11739_v23 = vld [vmem:[%s17948_s6 + $0x58] sm:$0xff] }
 0x689   : > { %v11453_v17 = vpop.f32.mrf.mxu1  ;;  %14259 = vmatprep.subr.mxu0 %v11739_v23 }
 0x68a   : > { %v11464_v36 = vadd.f32 %v11453_v17, %v11364_v59  ;;  %v11367_v20 = vadd.f32 %v11361_v63, %v11267_v62  ;;  %14260 = vmatpush3.msra.mxu0 %v11739_v23  ;;  %v11732_v63 = vld [vmem:[%s17948_s6 + $0x20] sm:$0xff]  ;;  %v13911_v23 = vld [vmem:[%s17949_s7 + $0x158] sm:$0x1] }
 0x68b   : > { %v11455_v14 = vpop.f32.mrf.mxu1  ;;  %14261 = vmatprep.subr.mxu0 %v11738_v12 }
 0x68c   : > { %v11465_v30 = vadd.f32 %v11455_v14, %v11365_v31  ;;  %v11564_v55 = vadd.f32 %v11553_v60, %v11464_v36  ;;  %14262 = vmatpush3.msra.mxu0 %v11738_v12  ;;  %v11831_v60 = vld [vmem:[%s17949_s7 + $0x8] sm:$0xff]  ;;  %v13910_v12 = vld [vmem:[%s17949_s7 + $0x150] sm:$0xff] }
 0x68d   : > { %v11459_v5 = vpop.f32.mrf.mxu1  ;;  %14263 = vmatprep.subr.mxu0 %v11737_v9  ;;  %14291 = vmatpush3.msra.mxu1 %v11831_v60  ;;  %v13920_v60 = vld [vmem:[%s17949_s7 + $0x180] sm:$0xff] }
 0x68e   : > { %v11466_v15 = vadd.f32 %v11459_v5, %v11366_v47  ;;  %v11565_v37 = vadd.f32 %v11555_v29, %v11465_v30  ;;  %14264 = vmatpush3.msra.mxu0 %v11737_v9  ;;  %14292 = vmatprep.subr.mxu1 %v17981_v7  ;;  %v13866_v9 = vld [vmem:[%s17949_s7 + $0x60] sm:$0xff] }
 0x68f   : > { %v11461_v54 = vpop.f32.mrf.mxu1  ;;  %14265 = vmatprep.subr.mxu0 %v11736_v33 }
 0x690   : > { %v11467_v28 = vadd.f32 %v11461_v54, %v11367_v20  ;;  %v11566_v45 = vadd.f32 %v11559_v46, %v11466_v15  ;;  %14266 = vmatpush3.msra.mxu0 %v11736_v33  ;;  %v13875_v20 = vld [vmem:[%s17949_s7 + $0x98] sm:$0x1]  ;;  %v11830_v15 = vld [vmem:[%s17949_s7] sm:$0xff]  ;;  %v13909_v33 = vld [vmem:[%s17949_s7 + $0x148] sm:$0xff] }
 0x691   : > { %v11653_v34 = vpop.f32.mrf.mxu1  ;;  %14267 = vmatprep.subr.mxu0 %v11735_v1  ;;  %14293 = vmatpush3.msra.mxu1 %v11830_v15  ;;  %v13914_v15 = vld [vmem:[%s17949_s7 + $0x160] sm:$0xff] }
 0x692   : > { %v11664_v6 = vadd.f32 %v11653_v34, %v11564_v55  ;;  %v11567_v0 = vadd.f32 %v11561_v38, %v11467_v28  ;;  %14268 = vmatpush3.msra.mxu0 %v11735_v1  ;;  %v13874_v55 = vld [vmem:[%s17949_s7 + $0x90] sm:$0xff]  ;;  %v13873_v34 = vld [vmem:[%s17949_s7 + $0x88] sm:$0xff]  ;;  %14297 = vmatprep.subr.mxu1 %v17981_v7  ;;  %v13857_v28 = vld [vmem:[%s17949_s7 + $0x38] sm:$0x1] }
 0x693   : > { %v11655_v16 = vpop.f32.mrf.mxu1  ;;  %14269 = vmatprep.subr.mxu0 %v11734_v49  ;;  %v13856_v38 = vld [vmem:[%s17949_s7 + $0x30] sm:$0xff] }
 0x694   : > { %v17361_v40 = vadd.f32 %v11673_v13, %v11664_v6  ;;  %v11665_v11 = vadd.f32 %v11655_v16, %v11565_v37  ;;  %14270 = vmatpush3.msra.mxu0 %v11734_v49  ;;  %v13881_v49 = vld [vmem:[%s17949_s7 + $0xb8] sm:$0x1] }
 0x695   : > { %v11659_v19 = vpop.f32.mrf.mxu1  ;;  %14271 = vmatprep.subr.mxu0 %v11733_v53 }
 0x696   : > { %v11684_v35 = vmax.f32 %v17361_v40, 0.0  ;;  %v17370_v51 = vadd.f32 %v11673_v13, %v11665_v11  ;;  %v11666_v32 = vadd.f32 %v11659_v19, %v11566_v45  ;;  %14272 = vmatpush3.msra.mxu0 %v11733_v53  ;;  %v13872_v13 = vld [vmem:[%s17949_s7 + $0x80] sm:$0xff]  ;;  %v13887_v45 = vld [vmem:[%s17949_s7 + $0xd8] sm:$0x1]  ;;  %v13855_v40 = vld [vmem:[%s17949_s7 + $0x28] sm:$0xff] }
 0x697   : > { %v11661_v41 = vpop.f32.mrf.mxu1  ;;  %14273 = vmatprep.subr.mxu0 %v11732_v63  ;;  %v13886_v11 = vld [vmem:[%s17949_s7 + $0xd0] sm:$0xff]  ;;  %v13908_v53 = vld [vmem:[%s17949_s7 + $0x140] sm:$0xff] }
 0x698   : > { %v11685_v8 = vmax.f32 %v17370_v51, 0.0  ;;  %v17376_v4 = vadd.f32 %v11678_v42, %v11666_v32  ;;  %v11667_v48 = vadd.f32 %v11661_v41, %v11567_v0  ;;  %11692 = vrot.lane.b32.xlu1 %v11684_v35, %s18002_s2  ;;  %14274 = vmatpush3.msra.mxu0 %v11732_v63  ;;  %v13863_v0 = vld [vmem:[%s17949_s7 + $0x58] sm:$0x1]  ;;  %v13862_v32 = vld [vmem:[%s17949_s7 + $0x50] sm:$0xff] }
 0x699   : > { %14275 = vmatprep.subr.mxu0 %v11731_v24  ;;  %v13898_v41 = vld [vmem:[%s17949_s7 + $0x110] sm:$0xff] }
 0x69a   : > { %v11686_v2 = vmax.f32 %v17376_v4, 0.0  ;;  %v17385_v44 = vadd.f32 %v11678_v42, %v11667_v48  ;;  %11694 = vrot.lane.b32.xlu0 %v11685_v8, %s18002_s2  ;;  %14276 = vmatpush3.msra.mxu0 %v11731_v24  ;;  %v13861_v42 = vld [vmem:[%s17949_s7 + $0x48] sm:$0xff]  ;;  %v13880_v24 = vld [vmem:[%s17949_s7 + $0xb0] sm:$0xff] }
 0x69b   : > { %14277 = vmatprep.subr.mxu0 %v11730_v52  ;;  %v13897_v4 = vld [vmem:[%s17949_s7 + $0x108] sm:$0xff] }
 0x69c   : > { %v11687_v58 = vmax.f32 %v17385_v44, 0.0  ;;  %11696 = vrot.lane.b32.xlu1 %v11686_v2, %s18002_s2  ;;  %14278 = vmatpush3.msra.mxu0 %v11730_v52  ;;  %v13868_v44 = vld [vmem:[%s17949_s7 + $0x70] sm:$0xff]  ;;  %v13923_v52 = vld [vmem:[%s17949_s7 + $0x198] sm:$0x1] }
 0x69d   : > { %14279 = vmatprep.subr.mxu0 %v11729_v39 }
 0x69e   : > { %11698 = vrot.lane.b32.xlu0 %v11687_v58, %s18002_s2  ;;  %14280 = vmatpush3.msra.mxu0 %v11729_v39  ;;  %v13879_v39 = vld [vmem:[%s17949_s7 + $0xa8] sm:$0xff]  ;;  %s432_s2 = scalar_lea.vmem [#allocation2], %s431_s30 }
 0x69f   : > { %14281 = vmatprep.subr.mxu0 %v11728_v22 }
 0x6a0   : > { %14282 = vmatpush3.msra.mxu0 %v11728_v22  ;;  %v13922_v22 = vld [vmem:[%s17949_s7 + $0x190] sm:$0xff] }
 0x6a1   : > { %14330 = vmatprep.subr.mxu0 %v17981_v7 }
 0x70a   : > { %v11693_v61 = vpop.permute.xlu1 %11692 }
 0x70c   : > { %v11695_v56 = vpop.permute.xlu0 %11694 }
 0x70d   : > { %v11700_v25 = vsel %vm470_vm0, %v11693_v61, %v11695_v56  ;;  %v11707_v18 = vmax.f32 %v11685_v8, %v11695_v56  ;;  %v13860_v8 = vld [vmem:[%s17949_s7 + $0x40] sm:$0xff]  ;;  %v13893_v56 = vld [vmem:[%s17949_s7 + $0xf8] sm:$0x1] }
 0x70e   : > { %v11706_v17 = vmax.f32 %v11684_v35, %v11700_v25  ;;  %v11697_v10 = vpop.permute.xlu1 %11696  ;;  %v13884_v35 = vld [vmem:[%s17949_s7 + $0xc0] sm:$0xff] }
 0x70f   : > { %11716 = vrot.lane.b32.xlu0 %v11707_v18, %s14720_s0  ;;  %v13878_v61 = vld [vmem:[%s17949_s7 + $0xa0] sm:$0xff]  ;;  %v13892_v18 = vld [vmem:[%s17949_s7 + $0xf0] sm:$0xff] }
 0x710   : > { %11714 = vrot.lane.b32.xlu1 %v11706_v17, %s14720_s0  ;;  %v11699_v59 = vpop.permute.xlu0 %11698 }
 0x711   : > { %v11701_v21 = vsel %vm470_vm0, %v11697_v10, %v11699_v59  ;;  %v11709_v14 = vmax.f32 %v11687_v58, %v11699_v59  ;;  %vm11834_vm0 = vcmask 203776   ;;  %v13867_v58 = vld [vmem:[%s17949_s7 + $0x68] sm:$0xff]  ;;  %v13934_v59 = vld [vmem:[%s17949_s7 + $0x1d0] sm:$0xff] }
 0x712   : > { %v11708_v29 = vmax.f32 %v11686_v2, %v11701_v21  ;;  %v13896_v2 = vld [vmem:[%s17949_s7 + $0x100] sm:$0xff]  ;;  %v13891_v10 = vld [vmem:[%s17949_s7 + $0xe8] sm:$0xff] }
 0x713   : > { %11720 = vrot.lane.b32.xlu0 %v11709_v14, %s14720_s0  ;;  %v13890_v21 = vld [vmem:[%s17949_s7 + $0xe0] sm:$0xff]  ;;  %v13933_v14 = vld [vmem:[%s17949_s7 + $0x1c8] sm:$0xff] }
 0x714   : > { %11718 = vrot.lane.b32.xlu1 %v11708_v29, %s14720_s0  ;;  %s13339_s0 = sshll.u32 %s432_s2, 4  ;;  %s13340_s0 = int_to_ptr.vmem [resolvable:$true] %s13339_s0 }
 0x715   : > { %s14636_s24 = scalar_lea.vmem %s13340_s0, 16  ;;  %p14643_p0 = scmp.lt.s32.totalorder %s13340_s0, %s14641_s21 }
 0x716   : > { %p14637_p11 = scmp.ne.s32.totalorder %s13340_s0, %s14636_s24  ;;  %p14644_p1 = scmp.lt.s32.totalorder %s14642_s17, %s14636_s24 }
 0x718   : > { %p14638_p12 = pnand %p14637_p11, %p14848_p5  ;;  %p14645_p2 = por %p14644_p1, %p14643_p0 }
 0x71a   : > { %p14639_p13 = pneg %p14638_p12 }
 0x71c   : > { %p14646_p3 = pnand %p14645_p2, %p14639_p13 }
 0x781   : > { %v11717_v31 = vpop.permute.xlu0 %11716 }
 0x782   : > { %v11715_v62 = vpop.permute.xlu1 %11714 }
 0x783   : > { %v11722_v36 = vsel %vm9676_vm15, %v11715_v62, %v11717_v31  ;;  %v13905_v31 = vld [vmem:[%s17949_s7 + $0x138] sm:$0x1]  ;;  %v13932_v62 = vld [vmem:[%s17949_s7 + $0x1c0] sm:$0xff] }
 0x784   : > { %v11726_v5 = vmax.f32 %v11706_v17, %v11722_v36  ;;  %v13935_v17 = vld [vmem:[%s17949_s7 + $0x1d8] sm:$0x1] }
 0x785   : > { %v11721_v47 = vpop.permute.xlu0 %11720 }
 0x786   : > { %v11719_v30 = vpop.permute.xlu1 %11718  ;;  %14283 = vmatprep.mubr.msk.f32.mxu0 %vm1431_vm5, %v11726_v5  ;;  %v13904_v5 = vld [vmem:[%s17949_s7 + $0x130] sm:$0xff] }
 0x787   : > { %v11723_v54 = vsel %vm9676_vm15, %v11719_v30, %v11721_v47  ;;  %v13903_v47 = vld [vmem:[%s17949_s7 + $0x128] sm:$0xff]  ;;  %v13902_v30 = vld [vmem:[%s17949_s7 + $0x120] sm:$0xff]  ;;  %vm13324_vm15 = vcmask 73728  }
 0x788   : > { %v11727_v46 = vmax.f32 %v11708_v29, %v11723_v54 }
 0x78a   : > { %14284 = vmatmul.mubr.msk.f32.vlgmr.msra.gmra.mxu0 %vm1431_vm5, %v11727_v46  ;;  %v13917_v46 = vld [vmem:[%s17949_s7 + $0x178] sm:$0x1]  ;;  %vm13160_vm5 = vcmask 982016  }
 0x78b   : > { %14331 = vmatpush3.msk.msra.mxu0 %vm11838_vm8, %v13875_v20  ;;  %14338 = vmatprep.mubr.msk.f32.mxu0 %vm14708_vm3, %v17981_v7  ;;  %v13916_v20 = vld [vmem:[%s17949_s7 + $0x170] sm:$0xff] }
 0x78c   : > { %14332 = vmatprep.subr.mxu0 %v17981_v7 }
 0x78d   : > { %14333 = vmatpush3.msra.mxu0 %v13874_v55  ;;  %v13915_v55 = vld [vmem:[%s17949_s7 + $0x168] sm:$0xff] }
 0x78e   : > { %14334 = vmatprep.subr.mxu0 %v17981_v7 }
 0x78f   : > { %14335 = vmatpush3.msra.mxu0 %v13873_v34 }
 0x790   : > { %14336 = vmatprep.subr.mxu0 %v17981_v7 }
 0x791   : > { %14337 = vmatpush3.msra.mxu0 %v13872_v13  ;;  %v13929_v13 = vld [vmem:[%s17949_s7 + $0x1b8] sm:$0x1] }
 0x792   : > { %14352 = vmatprep.subr.mxu0 %v17981_v7 }
 0x84a   : > { %v17484_v37 = vpop.f32.mrf.mxu0 }
 0x84b   : > { %v12656_v63 = vrot.slane %v17484_v37, 2  ;;  %v12820_v25 = vrot.slane %v17484_v37, 4  ;;  %v12984_v36 = vrot.slane %v17484_v37, 6  ;;  %v12574_v54 = vrot.slane %v17484_v37, 1 }
 0x84c   : > { %v17489_v6 = vpop.f32.mrf.mxu0  ;;  %v12738_v34 = vrot.slane %v17484_v37, 3 }
 0x84d   : > { %14295 = vmatmul.mubr.msk.f32.vlgmr.msra.gmra.mxu1 %vm11834_vm0, %v17489_v6  ;;  %v12164_v16 = vrot.slane %v17489_v6, 4  ;;  %v11918_v19 = vrot.slane %v17489_v6, 1  ;;  %v12328_v51 = vrot.slane %v17489_v6, 6  ;;  %v12000_v48 = vrot.slane %v17489_v6, 2 }
 0x84e   : > { %14298 = vmatpush3.msk.msra.mxu1 %vm11838_vm8, %v13857_v28  ;;  %14305 = vmatprep.mubr.msk.f32.mxu1 %vm14708_vm3, %v17981_v7  ;;  %v12082_v1 = vrot.slane %v17489_v6, 3  ;;  %v12246_v3 = vrot.slane %v17489_v6, 5  ;;  %v12410_v29 = vrot.slane %v17489_v6, 7  ;;  %v13928_v28 = vld [vmem:[%s17949_s7 + $0x1b0] sm:$0xff]  ;;  %v13927_v6 = vld [vmem:[%s17949_s7 + $0x1a8] sm:$0xff] }
 0x84f   : > { %14299 = vmatprep.subr.mxu1 %v17981_v7  ;;  %14339 = vmatmul.mubr.msk.f32.vlgmr.msra.gmra.mxu0 %vm11834_vm0, %v12164_v16  ;;  %v12902_v16 = vrot.slane %v17484_v37, 5 }
 0x850   : > { %14300 = vmatpush3.msra.mxu1 %v13856_v38  ;;  %14353 = vmatpush3.msk.msra.mxu0 %vm11838_vm8, %v13887_v45  ;;  %v13926_v38 = vld [vmem:[%s17949_s7 + $0x1a0] sm:$0xff]  ;;  %v13941_v45 = vld [vmem:[%s17949_s7 + $0x1f8] sm:$0x1] }
 0x851   : > { %14301 = vmatprep.subr.mxu1 %v17981_v7  ;;  %14354 = vmatprep.subr.mxu0 %v17981_v7 }
 0x852   : > { %14302 = vmatpush3.msra.mxu1 %v13855_v40  ;;  %14355 = vmatpush3.msra.mxu0 %v13886_v11  ;;  %v13940_v40 = vld [vmem:[%s17949_s7 + $0x1f0] sm:$0xff]  ;;  %v13939_v11 = vld [vmem:[%s17949_s7 + $0x1e8] sm:$0xff] }
 0x853   : > { %14303 = vmatprep.subr.mxu1 %v17981_v7  ;;  %14356 = vmatprep.subr.mxu0 %v17981_v7 }
 0x854   : > { %14304 = vmatpush3.msra.mxu1 %v13854_v50  ;;  %14357 = vmatpush3.msra.mxu0 %v13885_v26  ;;  %v13938_v50 = vld [vmem:[%s17949_s7 + $0x1e0] sm:$0xff]  ;;  %v13066_v26 = vrot.slane %v17484_v37, 7 }
 0x855   : > { %14306 = vmatmul.mubr.msk.f32.vlgmr.msra.gmra.mxu1 %vm11834_vm0, %v11918_v19  ;;  %14308 = vmatprep.subr.mxu1 %v17981_v7  ;;  %v13158_v19 = vld [vmem:[%s17951_s9 + $0x70] sm:$0xff] }
 0x856   : > { %14358 = vmatprep.subr.mxu0 %v17981_v7  ;;  %14309 = vmatpush3.msk.msra.mxu1 %vm11838_vm8, %v13863_v0  ;;  %v13157_v0 = vld [vmem:[%s17951_s9 + $0x68] sm:$0xff] }
 0x857   : > { %14359 = vmatpush3.msra.mxu0 %v13884_v35  ;;  %14360 = vmatprep.mubr.msk.f32.mxu0 %vm14708_vm3, %v17981_v7  ;;  %v13155_v35 = vld [vmem:[%s17951_s9 + $0x58] sm:$0xff] }
 0x858   : > { %14310 = vmatprep.subr.mxu1 %v17981_v7  ;;  %14361 = vmatmul.mubr.msk.f32.vlgmr.msra.gmra.mxu0 %vm11834_vm0, %v12328_v51  ;;  %v13154_v51 = vld [vmem:[%s17951_s9 + $0x50] sm:$0xff] }
 0x859   : > { %14374 = vmatprep.subr.mxu0 %v17981_v7  ;;  %14311 = vmatpush3.msra.mxu1 %v13862_v32  ;;  %v13153_v32 = vld [vmem:[%s17951_s9 + $0x48] sm:$0xff] }
 0x85a   : > { %14375 = vmatpush3.msk.msra.mxu0 %vm11838_vm8, %v13899_v27  ;;  %14312 = vmatprep.subr.mxu1 %v17981_v7  ;;  %v13152_v27 = vld [vmem:[%s17951_s9 + $0x40] sm:$0xff] }
 0x85b   : > { %14376 = vmatprep.subr.mxu0 %v17981_v7  ;;  %14313 = vmatpush3.msra.mxu1 %v13861_v42  ;;  %v13151_v42 = vld [vmem:[%s17951_s9 + $0x38] sm:$0xff] }
 0x85c   : > { %14377 = vmatpush3.msra.mxu0 %v13898_v41  ;;  %14314 = vmatprep.subr.mxu1 %v17981_v7  ;;  %v13150_v41 = vld [vmem:[%s17951_s9 + $0x30] sm:$0xff] }
 0x85d   : > { %14378 = vmatprep.subr.mxu0 %v17981_v7  ;;  %14315 = vmatpush3.msra.mxu1 %v13860_v8  ;;  %v13149_v8 = vld [vmem:[%s17951_s9 + $0x28] sm:$0xff] }
 0x85e   : > { %14316 = vmatprep.mubr.msk.f32.mxu1 %vm14708_vm3, %v17981_v7  ;;  %14379 = vmatpush3.msra.mxu0 %v13897_v4  ;;  %v13148_v4 = vld [vmem:[%s17951_s9 + $0x20] sm:$0xff] }
 0x85f   : > { %14317 = vmatmul.mubr.msk.f32.vlgmr.msra.gmra.mxu1 %vm11834_vm0, %v12000_v48  ;;  %14319 = vmatprep.subr.mxu1 %v17981_v7  ;;  %v13147_v48 = vld [vmem:[%s17951_s9 + $0x18] sm:$0xff] }
 0x860   : > { %14380 = vmatprep.subr.mxu0 %v17981_v7  ;;  %14320 = vmatpush3.msk.msra.mxu1 %vm11838_vm8, %v13869_v43  ;;  %v13146_v43 = vld [vmem:[%s17951_s9 + $0x10] sm:$0xff] }
 0x861   : > { %14381 = vmatpush3.msra.mxu0 %v13896_v2  ;;  %14382 = vmatprep.mubr.msk.f32.mxu0 %vm14708_vm3, %v17981_v7  ;;  %v13145_v2 = vld [vmem:[%s17951_s9 + $0x8] sm:$0xff] }
 0x862   : > { %14321 = vmatprep.subr.mxu1 %v17981_v7  ;;  %14383 = vmatmul.mubr.msk.f32.vlgmr.msra.gmra.mxu0 %vm11834_vm0, %v17484_v37  ;;  %v13156_v37 = vld [vmem:[%s17951_s9 + $0x60] sm:$0xff] }
 0x863   : > { %14396 = vmatprep.subr.mxu0 %v17981_v7  ;;  %14322 = vmatpush3.msra.mxu1 %v13868_v44  ;;  %v13144_v44 = vld [vmem:[%s17951_s9] sm:$0xff] }
 0x864   : > { %14397 = vmatpush3.msk.msra.mxu0 %vm11838_vm8, %v13911_v23  ;;  %14323 = vmatprep.subr.mxu1 %v17981_v7  ;;  %v13245_v23 = vld [vmem:[%s17953_s11 + $0x50] sm:$0xf] }
 0x865   : > { %14398 = vmatprep.subr.mxu0 %v17981_v7  ;;  %14324 = vmatpush3.msra.mxu1 %v13867_v58  ;;  %v13244_v58 = vld [vmem:[%s17953_s11 + $0x48] sm:$0xff] }
 0x866   : > { %14399 = vmatpush3.msra.mxu0 %v13910_v12  ;;  %14325 = vmatprep.subr.mxu1 %v17981_v7  ;;  %v13243_v12 = vld [vmem:[%s17953_s11 + $0x40] sm:$0xff] }
 0x867   : > { %14400 = vmatprep.subr.mxu0 %v17981_v7  ;;  %14326 = vmatpush3.msra.mxu1 %v13866_v9  ;;  %v13242_v9 = vld [vmem:[%s17953_s11 + $0x38] sm:$0xff] }
 0x868   : > { %14327 = vmatprep.mubr.msk.f32.mxu1 %vm14708_vm3, %v17981_v7  ;;  %14401 = vmatpush3.msra.mxu0 %v13909_v33  ;;  %v13241_v33 = vld [vmem:[%s17953_s11 + $0x30] sm:$0xff] }
 0x869   : > { %14328 = vmatmul.mubr.msk.f32.vlgmr.msra.gmra.mxu1 %vm11834_vm0, %v12082_v1  ;;  %14341 = vmatprep.subr.mxu1 %v17981_v7  ;;  %v13240_v1 = vld [vmem:[%s17953_s11 + $0x28] sm:$0xff] }
 0x86a   : > { %14402 = vmatprep.subr.mxu0 %v17981_v7  ;;  %14342 = vmatpush3.msk.msra.mxu1 %vm11838_vm8, %v13881_v49  ;;  %v13239_v49 = vld [vmem:[%s17953_s11 + $0x20] sm:$0xff] }
 0x86b   : > { %14403 = vmatpush3.msra.mxu0 %v13908_v53  ;;  %14404 = vmatprep.mubr.msk.f32.mxu0 %vm14708_vm3, %v17981_v7  ;;  %v13238_v53 = vld [vmem:[%s17953_s11 + $0x18] sm:$0xff] }
 0x86c   : > { %14343 = vmatprep.subr.mxu1 %v17981_v7  ;;  %14405 = vmatmul.mubr.msk.f32.vlgmr.msra.gmra.mxu0 %vm11834_vm0, %v12656_v63 }
 0x86d   : > { %14418 = vmatprep.subr.mxu0 %v17981_v7  ;;  %14344 = vmatpush3.msra.mxu1 %v13880_v24 }
 0x86e   : > { %14419 = vmatpush3.msk.msra.mxu0 %vm11838_vm8, %v13923_v52  ;;  %14345 = vmatprep.subr.mxu1 %v17981_v7 }
 0x86f   : > { %14420 = vmatprep.subr.mxu0 %v17981_v7  ;;  %14346 = vmatpush3.msra.mxu1 %v13879_v39 }
 0x870   : > { %14421 = vmatpush3.msra.mxu0 %v13922_v22  ;;  %14347 = vmatprep.subr.mxu1 %v17981_v7 }
 0x871   : > { %14422 = vmatprep.subr.mxu0 %v17981_v7  ;;  %14348 = vmatpush3.msra.mxu1 %v13878_v61 }
 0x872   : > { %14349 = vmatprep.mubr.msk.f32.mxu1 %vm14708_vm3, %v17981_v7  ;;  %14423 = vmatpush3.msra.mxu0 %v13921_v57 }
 0x873   : > { %14350 = vmatmul.mubr.msk.f32.vlgmr.msra.gmra.mxu1 %vm11834_vm0, %v12246_v3  ;;  %14363 = vmatprep.subr.mxu1 %v17981_v7 }
 0x874   : > { %14424 = vmatprep.subr.mxu0 %v17981_v7  ;;  %14364 = vmatpush3.msk.msra.mxu1 %vm11838_vm8, %v13893_v56 }
 0x875   : > { %14425 = vmatpush3.msra.mxu0 %v13920_v60  ;;  %14426 = vmatprep.mubr.msk.f32.mxu0 %vm14708_vm3, %v17981_v7 }
 0x876   : > { %14365 = vmatprep.subr.mxu1 %v17981_v7  ;;  %14427 = vmatmul.mubr.msk.f32.vlgmr.msra.gmra.mxu0 %vm11834_vm0, %v12820_v25 }
 0x877   : > { %14440 = vmatprep.subr.mxu0 %v17981_v7  ;;  %14366 = vmatpush3.msra.mxu1 %v13892_v18 }
 0x878   : > { %14441 = vmatpush3.msk.msra.mxu0 %vm11838_vm8, %v13935_v17  ;;  %14367 = vmatprep.subr.mxu1 %v17981_v7 }
 0x879   : > { %14442 = vmatprep.subr.mxu0 %v17981_v7  ;;  %14368 = vmatpush3.msra.mxu1 %v13891_v10 }
 0x87a   : > { %14443 = vmatpush3.msra.mxu0 %v13934_v59  ;;  %14369 = vmatprep.subr.mxu1 %v17981_v7 }
 0x87b   : > { %14444 = vmatprep.subr.mxu0 %v17981_v7  ;;  %14370 = vmatpush3.msra.mxu1 %v13890_v21 }
 0x87c   : > { %14371 = vmatprep.mubr.msk.f32.mxu1 %vm14708_vm3, %v17981_v7  ;;  %14445 = vmatpush3.msra.mxu0 %v13933_v14  ;;  %v11829_v14 = vld [vmem:[%s17950_s8] sm:$0x1] }
 0x87d   : > { %14372 = vmatmul.mubr.msk.f32.vlgmr.msra.gmra.mxu1 %vm11834_vm0, %v12410_v29  ;;  %14385 = vmatprep.subr.mxu1 %v17981_v7 }
 0x87e   : > { %14446 = vmatprep.subr.mxu0 %v17981_v7  ;;  %14386 = vmatpush3.msk.msra.mxu1 %vm11838_vm8, %v13905_v31 }
 0x87f   : > { %14447 = vmatpush3.msra.mxu0 %v13932_v62  ;;  %14448 = vmatprep.mubr.msk.f32.mxu0 %vm14708_vm3, %v17981_v7 }
 0x880   : > { %14387 = vmatprep.subr.mxu1 %v17981_v7  ;;  %14449 = vmatmul.mubr.msk.f32.vlgmr.msra.gmra.mxu0 %vm11834_vm0, %v12984_v36 }
 0x881   : > { %14388 = vmatpush3.msra.mxu1 %v13904_v5  ;;  %14393 = vmatprep.mubr.msk.f32.mxu1 %vm14708_vm3, %v17981_v7 }
 0x882   : > { %14389 = vmatprep.subr.mxu1 %v17981_v7  ;;  %14462 = vmatprep.subr.mxu0 %v17981_v7 }
 0x883   : > { %14390 = vmatpush3.msra.mxu1 %v13903_v47  ;;  %14492 = vmatprep.mubr.msk.f32.mxu0 %vm14708_vm3, %v17981_v7 }
 0x884   : > { %14391 = vmatprep.subr.mxu1 %v17981_v7  ;;  %14463 = vmatpush3.msra.mxu0 %v13158_v19 }
 0x885   : > { %14392 = vmatpush3.msra.mxu1 %v13902_v30  ;;  %14464 = vmatprep.subr.mxu0 %v17981_v7 }
 0x886   : > { %14394 = vmatmul.mubr.msk.f32.vlgmr.msra.gmra.mxu1 %vm11834_vm0, %v12574_v54  ;;  %14407 = vmatprep.subr.mxu1 %v17981_v7 }
 0x887   : > { %14408 = vmatpush3.msk.msra.mxu1 %vm11838_vm8, %v13917_v46  ;;  %14415 = vmatprep.mubr.msk.f32.mxu1 %vm14708_vm3, %v17981_v7 }
 0x888   : > { %14409 = vmatprep.subr.mxu1 %v17981_v7  ;;  %14465 = vmatpush3.msra.mxu0 %v13157_v0 }
 0x889   : > { %14410 = vmatpush3.msra.mxu1 %v13916_v20  ;;  %14466 = vmatprep.subr.mxu0 %v17981_v7 }
 0x88a   : > { %14411 = vmatprep.subr.mxu1 %v17981_v7  ;;  %14467 = vmatpush3.msra.mxu0 %v13156_v37 }
 0x88b   : > { %14412 = vmatpush3.msra.mxu1 %v13915_v55  ;;  %14468 = vmatprep.subr.mxu0 %v17981_v7 }
 0x88c   : > { %14413 = vmatprep.subr.mxu1 %v17981_v7  ;;  %14469 = vmatpush3.msra.mxu0 %v13155_v35 }
 0x88d   : > { %14414 = vmatpush3.msra.mxu1 %v13914_v15  ;;  %14470 = vmatprep.subr.mxu0 %v17981_v7 }
 0x88e   : > { %14416 = vmatmul.mubr.msk.f32.vlgmr.msra.gmra.mxu1 %vm11834_vm0, %v12738_v34  ;;  %14429 = vmatprep.subr.mxu1 %v17981_v7 }
 0x88f   : > { %14430 = vmatpush3.msk.msra.mxu1 %vm11838_vm8, %v13929_v13  ;;  %14437 = vmatprep.mubr.msk.f32.mxu1 %vm14708_vm3, %v17981_v7 }
 0x890   : > { %14431 = vmatprep.subr.mxu1 %v17981_v7  ;;  %14471 = vmatpush3.msra.mxu0 %v13154_v51 }
 0x891   : > { %14432 = vmatpush3.msra.mxu1 %v13928_v28  ;;  %14472 = vmatprep.subr.mxu0 %v17981_v7 }
 0x892   : > { %14433 = vmatprep.subr.mxu1 %v17981_v7  ;;  %14473 = vmatpush3.msra.mxu0 %v13153_v32 }
 0x893   : > { %14434 = vmatpush3.msra.mxu1 %v13927_v6  ;;  %14474 = vmatprep.subr.mxu0 %v17981_v7 }
 0x894   : > { %14435 = vmatprep.subr.mxu1 %v17981_v7  ;;  %14475 = vmatpush3.msra.mxu0 %v13152_v27 }
 0x895   : > { %14436 = vmatpush3.msra.mxu1 %v13926_v38  ;;  %14476 = vmatprep.subr.mxu0 %v17981_v7 }
 0x896   : > { %14438 = vmatmul.mubr.msk.f32.vlgmr.msra.gmra.mxu1 %vm11834_vm0, %v12902_v16  ;;  %14451 = vmatprep.subr.mxu1 %v17981_v7 }
 0x897   : > { %14452 = vmatpush3.msk.msra.mxu1 %vm11838_vm8, %v13941_v45  ;;  %14459 = vmatprep.mubr.msk.f32.mxu1 %vm14708_vm3, %v17981_v7 }
 0x898   : > { %14453 = vmatprep.subr.mxu1 %v17981_v7  ;;  %14477 = vmatpush3.msra.mxu0 %v13151_v42 }
 0x899   : > { %14454 = vmatpush3.msra.mxu1 %v13940_v40  ;;  %14478 = vmatprep.subr.mxu0 %v17981_v7 }
 0x89a   : > { %14455 = vmatprep.subr.mxu1 %v17981_v7  ;;  %14479 = vmatpush3.msra.mxu0 %v13150_v41 }
 0x89b   : > { %14456 = vmatpush3.msra.mxu1 %v13939_v11  ;;  %14480 = vmatprep.subr.mxu0 %v17981_v7 }
 0x89c   : > { %14457 = vmatprep.subr.mxu1 %v17981_v7  ;;  %14481 = vmatpush3.msra.mxu0 %v13149_v8 }
 0x89d   : > { %14458 = vmatpush3.msra.mxu1 %v13938_v50  ;;  %14482 = vmatprep.subr.mxu0 %v17981_v7 }
 0x89e   : > { %14460 = vmatmul.mubr.msk.f32.vlgmr.msra.gmra.mxu1 %vm11834_vm0, %v13066_v26  ;;  %14495 = vmatprep.subr.mxu1 %v17981_v7 }
 0x89f   : > { %14517 = vmatprep.mubr.msk.f32.mxu1 %vm14708_vm3, %v17981_v7  ;;  %14483 = vmatpush3.msra.mxu0 %v13148_v4  ;;  %vm13250_vm3 = vcmask 1043456   ;;  %v13237_v4 = vld [vmem:[%s17953_s11 + $0x10] sm:$0xff] }
 0x8a0   : > { %14484 = vmatprep.subr.mxu0 %v17981_v7  ;;  %14496 = vmatpush3.msk.msra.mxu1 %vm13250_vm3, %v13245_v23 }
 0x8a1   : > { %14485 = vmatpush3.msra.mxu0 %v13147_v48  ;;  %14497 = vmatprep.subr.mxu1 %v17981_v7  ;;  %v13236_v48 = vld [vmem:[%s17953_s11 + $0x8] sm:$0xff] }
 0x8a2   : > { %14486 = vmatprep.subr.mxu0 %v17981_v7  ;;  %14498 = vmatpush3.msra.mxu1 %v13244_v58 }
 0x8a3   : > { %14487 = vmatpush3.msra.mxu0 %v13146_v43  ;;  %14499 = vmatprep.subr.mxu1 %v17981_v7  ;;  %v13235_v43 = vld [vmem:[%s17953_s11] sm:$0xff] }
 0x8a4   : > { %14488 = vmatprep.subr.mxu0 %v17981_v7  ;;  %14500 = vmatpush3.msra.mxu1 %v13243_v12 }
 0x8a5   : > { %14489 = vmatpush3.msra.mxu0 %v13145_v2  ;;  %14501 = vmatprep.subr.mxu1 %v17981_v7  ;;  %v13159_v2 = vld [vmem:[%s17952_s10] sm:$0x1] }
 0x8a6   : > { %14490 = vmatprep.subr.mxu0 %v17981_v7  ;;  %14502 = vmatpush3.msra.mxu1 %v13242_v9 }
 0x8a7   : > { %14491 = vmatpush3.msra.mxu0 %v13144_v44  ;;  %14503 = vmatprep.subr.mxu1 %v17981_v7 }
 0x8a8   : > { %14504 = vmatpush3.msra.mxu1 %v13241_v33 }
 0x8a9   : > { %14505 = vmatprep.subr.mxu1 %v17981_v7 }
 0x8aa   : > { %14506 = vmatpush3.msra.mxu1 %v13240_v1 }
 0x8ab   : > { %14507 = vmatprep.subr.mxu1 %v17981_v7 }
 0x8ac   : > { %14508 = vmatpush3.msra.mxu1 %v13239_v49 }
 0x8ad   : > { %14509 = vmatprep.subr.mxu1 %v17981_v7 }
 0x8ae   : > { %14510 = vmatpush3.msra.mxu1 %v13238_v53 }
 0x8af   : > { %14511 = vmatprep.subr.mxu1 %v17981_v7 }
 0x8b0   : > { %14512 = vmatpush3.msra.mxu1 %v13237_v4 }
 0x8b1   : > { %14513 = vmatprep.subr.mxu1 %v17981_v7 }
 0x8b2   : > { %14514 = vmatpush3.msra.mxu1 %v13236_v48 }
 0x8b3   : > { %14515 = vmatprep.subr.mxu1 %v17981_v7  ;;  %v13246_v7 = vld [vmem:[%s17954_s12] sm:$0x1] }
 0x8b4   : > { %14516 = vmatpush3.msra.mxu1 %v13235_v43 }
 0x90d   : > { %v11908_v63 = vpop.f32.mrf.mxu1 }
 0x90e   : > { %v11912_v31 = vadd.f32 %v11908_v63, %v11829_v14 }
 0x90f   : > { %v14296_v24 = vpop.f32.mrf.mxu1  ;;  %v12236_v52 = vpop.f32.mrf.mxu0 }
 0x911   : > { %v14340_v39 = vpop.f32.mrf.mxu0 }
 0x915   : > { %v11990_v22 = vpop.f32.mrf.mxu1 }
 0x916   : > { %v11994_v5 = vadd.f32 %v11990_v22, %v11912_v31 }
 0x917   : > { %v14307_v61 = vpop.f32.mrf.mxu1 }
 0x918   : > { %v12400_v57 = vpop.f32.mrf.mxu0 }
 0x91a   : > { %v14362_v3 = vpop.f32.mrf.mxu0 }
 0x91f   : > { %v12072_v56 = vpop.f32.mrf.mxu1 }
 0x920   : > { %v12076_v30 = vadd.f32 %v12072_v56, %v11994_v5 }
 0x921   : > { %v14318_v60 = vpop.f32.mrf.mxu1 }
 0x922   : > { %v12564_v25 = vpop.f32.mrf.mxu0 }
 0x924   : > { %v14384_v18 = vpop.f32.mrf.mxu0 }
 0x929   : > { %v12154_v17 = vpop.f32.mrf.mxu1 }
 0x92a   : > { %v12158_v54 = vadd.f32 %v12154_v17, %v12076_v30 }
 0x92b   : > { %v14329_v10 = vpop.f32.mrf.mxu1 }
 0x92c   : > { %v12728_v59 = vpop.f32.mrf.mxu0  ;;  %v12240_v20 = vadd.f32 %v12236_v52, %v12158_v54 }
 0x92e   : > { %v14406_v21 = vpop.f32.mrf.mxu0 }
 0x933   : > { %v12318_v29 = vpop.f32.mrf.mxu1 }
 0x934   : > { %v12322_v34 = vadd.f32 %v12318_v29, %v12240_v20 }
 0x935   : > { %v14351_v62 = vpop.f32.mrf.mxu1 }
 0x936   : > { %v12892_v36 = vpop.f32.mrf.mxu0  ;;  %v12404_v28 = vadd.f32 %v12400_v57, %v12322_v34 }
 0x938   : > { %v14428_v47 = vpop.f32.mrf.mxu0 }
 0x93d   : > { %v12482_v46 = vpop.f32.mrf.mxu1 }
 0x93e   : > { %v12486_v38 = vadd.f32 %v12482_v46, %v12404_v28 }
 0x93f   : > { %v14373_v55 = vpop.f32.mrf.mxu1 }
 0x940   : > { %v13056_v15 = vpop.f32.mrf.mxu0  ;;  %v12568_v45 = vadd.f32 %v12564_v25, %v12486_v38 }
 0x942   : > { %v14450_v13 = vpop.f32.mrf.mxu0 }
 0x946   : > { %v12646_v6 = vpop.f32.mrf.mxu1 }
 0x947   : > { %v12650_v40 = vadd.f32 %v12646_v6, %v12568_v45 }
 0x948   : > { %v14395_v16 = vpop.f32.mrf.mxu1 }
 0x949   : > { %v12732_v26 = vadd.f32 %v12728_v59, %v12650_v40 }
 0x94e   : > { %v12810_v11 = vpop.f32.mrf.mxu1 }
 0x94f   : > { %v12814_v19 = vadd.f32 %v12810_v11, %v12732_v26 }
 0x950   : > { %v14417_v50 = vpop.f32.mrf.mxu1 }
 0x951   : > { %v12896_v37 = vadd.f32 %v12892_v36, %v12814_v19 }
 0x956   : > { %v12974_v0 = vpop.f32.mrf.mxu1 }
 0x957   : > { %v12978_v51 = vadd.f32 %v12974_v0, %v12896_v37 }
 0x958   : > { %v14439_v35 = vpop.f32.mrf.mxu1 }
 0x959   : > { %v13060_v32 = vadd.f32 %v13056_v15, %v12978_v51 }
 0x95e   : > { %v13138_v27 = vpop.f32.mrf.mxu1 }
 0x95f   : > { %v13142_v42 = vadd.f32 %v13138_v27, %v13060_v32 }
 0x960   : > { %v14461_v41 = vpop.f32.mrf.mxu1 }
 0x961   : > { %v13143_v8 = vmax.f32 %v13142_v42, 0.0 }
 0x963   : > { %14493 = vmatmul.mubr.msk.f32.vlgmr.msra.gmra.mxu0 %vm13160_vm5, %v13143_v8 }
 0xa23   : > { %v13230_v44 = vpop.f32.mrf.mxu0 }
 0xa24   : > { %v13231_v23 = vadd.f32 %v13230_v44, %v13159_v2 }
 0xa25   : > { %v14494_v58 = vpop.f32.mrf.mxu0 }
 0xa26   : > { %v13234_v12 = vmax.f32 %v13231_v23, 0.0 }
 0xa28   : > { %14518 = vmatmul.mubr.msk.f32.vlgmr.msra.gmra.mxu1 %vm10875_vm4, %v13234_v12 }
 0xae8   : > { %v13320_v9 = vpop.f32.mrf.mxu1 }
 0xae9   : > { %v13321_v33 = vadd.f32 %v13320_v9, %v13246_v7 }
 0xaea   : > { %v14519_v1 = vpop.f32.mrf.mxu1 }
 0xaeb   : > { %13325 = vst.msk [vmem:[%s432_s2] sm:$0x1] %vm13324_vm15, %v13321_v33 }
 0xaec   : > { %14649 = shalt.err (!%p14646_p3)
}
 0xaed   : > { %s14650_s15 = scalar_lea.hbm %s17907_s16, 16  ;;  %s14654_s2 = scalar_lea.hbm %s17955_s13, 64 }
 0xaee   : > { %p14651_p4 = scmp.ne.s32.totalorder %s17907_s16, %s14650_s15  ;;  %p14655_p9 = scmp.lt.s32.totalorder %s17907_s16, %s17955_s13 }
 0xaef   : > { %p14656_p10 = scmp.lt.s32.totalorder %s14654_s2, %s14650_s15 }
 0xaf0   : > { %p14652_p7 = pnand %p14651_p4, %p14848_p5 }
 0xaf1   : > { %p14657_p11 = por %p14656_p10, %p14655_p9 }
 0xaf2   : > { %p14653_p8 = pneg %p14652_p7 }
 0xaf4   : > { %p14658_p12 = pnand %p14657_p11, %p14653_p8 }
 0xaf6   : > { %14661 = shalt.err (!%p14658_p12)
}
 0xaf7   : > { %14521 = dma.vmem_to_hbm [thread:$0]  (%p14848_p5), %s13340_s0, 16, %s17907_s16, %s13327_s23  }
 0xaf8 PF: > { %p14527_p13 = scmp.ge.s32.totalorder %s14696_s28, 2  ;;  %s13351_s24 = sand.u32 1, %s14684_s25  }
 0xaf9   : > { %s13352_s29 = scalar_lea.sflag [#allocation3], %s13351_s24 }
 0xafa   : > { %p14524_p0 = pnand %p14527_p13, %p14852_p6 }
 0xafc   : > { %p14525_p1 = pneg %p14524_p0 }
 0xafe   : > { %14679 = dma.done.wait (%p14525_p1), %s13352_s29, 16  }
 0xaff   : > { %14681 = vsyncadd (%p14525_p1), %s13352_s29, 4294967280  ;;  %s18007_s21 = sld [smem:[#allocation5_spill]]  ;;  %p23_p2 = scmp.ge.s32.totalorder %s14835_s14, 6  }
 0xb00   : > { %s18008_s25 = smov %s14688_s26  ;;  %s18009_s26 = smov %s14692_s27 }
 0xb01   : > { %s18011_s28 = smov %s14835_s14  ;;  %25 = sbr.rel (!%p23_p2) target bundleno = 7 (0x7), region = 170 }
 0xb05   : > { %s18010_s27 = smov %s18007_s21 }
 0xb06   :  { %13356 = vsyncpa [#allocation3], 1 }
 0xb07   :  { %13358 = vsyncpa [#allocation3 + $0x1], 1 }

</bundles_post_ra>
